<compile_context>
chip_gen: v7x
topology: tpu7x:2x2x1
jax: 0.10.0
libtpu: 0.0.40
codegen_flags: <defaults>
</compile_context>

<pallas_src>
import functools

import jax
import jax.numpy as jnp
from jax.experimental import pallas as pl
from jax.experimental.pallas import tpu as pltpu


# Fixed packing order for the stacked attention / transfer parameter tensors.
_ATTN_ORDER = ("attn_E_right", "attn_E_wrong", "attn_C", "attn_S")
_TRANS_ORDER = ("transfer_stu", "transfer_exer", "transfer_concept")


# ----------------------------------------------------------------------------
# Fused kernel
# ----------------------------------------------------------------------------
def _ignet_fused_kernel(*refs, S, P, K, D, B, khop, gcn_layers, n_mlp):
    (ec_ref, ser_ref, sew_ref, sc_ref,
     aq_ref, ar_ref, aw_ref, ai_ref, nadj_ref,
     disc_ref, attn_W_ref, attn_b_ref, attn_a_ref, tW_ref, tb_ref) = refs[:15]
    mlp_refs = refs[15:15 + 2 * n_mlp]
    kp_ref, sid_ref, eid_ref, out_ref, emb_scr = refs[15 + 2 * n_mlp:]

    f32 = jnp.float32
    bf16 = jnp.bfloat16

    # ---------------- SAGENet ('mean' aggregator, residual accumulation) ----
    # Adjacency is pre-row-normalized (wrapper), so mean-aggregation is one
    # exact bf16 matmul per hop; accumulation stays in f32.
    def sage_net(a_ref, h_ref):
        A = a_ref[...]                       # (N, N) bf16
        h = h_ref[...].astype(f32)           # (N, F)
        res = h
        tmp = h
        for i in range(khop):
            tmp = tmp + jnp.dot(A, tmp.astype(bf16), preferred_element_type=f32)
            res = res + tmp * (1.0 / float(1 + i))
        return res

    # Two A_Q passes fused into one of feature-width 2D, then split by columns.
    ec_fused = sage_net(aq_ref, ec_ref)                     # (P+K, 2D)
    E_C_info_right = ec_fused[:, :D]
    E_C_info_wrong = ec_fused[:, D:]
    S_E_info_right = sage_net(ar_ref, ser_ref)              # (S+P, D)
    S_E_info_wrong = sage_net(aw_ref, sew_ref)              # (S+P, D)
    S_C_info = sage_net(ai_ref, sc_ref)                     # (S+K, D)

    # ---------------- Semantic attention (one batched matmul per module) ----
    def attn(embeds, idx):
        W = attn_W_ref[idx]                                 # (D, D)
        b = attn_b_ref[idx]                                 # (1, D)
        a = attn_a_ref[idx]                                 # (1, D)
        M = embeds[0].shape[0]
        E = jnp.concatenate(embeds, axis=0)                 # (n*M, D)
        H = jnp.tanh(jnp.dot(E, W, preferred_element_type=f32) + b)
        scores = []
        for k in range(len(embeds)):
            sp = jnp.mean(H[k * M:(k + 1) * M, :], axis=0, keepdims=True)   # (1, D)
            scores.append(jnp.sum(a * sp, axis=1, keepdims=True))           # (1, 1)
        m = scores[0]
        for s in scores[1:]:
            m = jnp.maximum(m, s)
        exps = [jnp.exp(s - m) for s in scores]
        denom = exps[0]
        for e in exps[1:]:
            denom = denom + e
        # (1,1) denominator — exact division (cold & tiny).
        z = jnp.zeros_like(embeds[0])
        for k in range(len(embeds)):
            z = z + embeds[k] * (exps[k] / denom)
        return z

    E_forward = (attn([E_C_info_right[:P], S_E_info_right[S:]], 0) *
                 attn([E_C_info_wrong[:P], S_E_info_wrong[S:]], 1))          # (P, D)
    C_forward = attn([E_C_info_right[P:], E_C_info_wrong[P:], S_C_info[S:]], 2)  # (K, D)
    S_forward = attn([S_E_info_right[:S], S_E_info_wrong[:S], S_C_info[:S]], 3)  # (S, D)

    # ---------------- IGNet.compute (LightGCN-style propagation) ------------
    nadj = nadj_ref[...]                                    # (S+P, S+P) bf16
    emb = jnp.concatenate([S_forward, E_forward], axis=0)   # (S+P, D) f32
    acc = emb
    cur = emb
    for _ in range(gcn_layers):
        cur = jnp.dot(nadj, cur.astype(bf16), preferred_element_type=f32)
        acc = acc + cur
    # Keep the propagated node embeddings in a VMEM scratch so B rows can be
    # dynamically gathered before the transfer linears.
    emb_scr[...] = acc * (1.0 / float(gcn_layers + 1))      # (S+P, D)

    # ---------------- gather-before-transfer (ids live in SMEM) -------------
    s_rows, e_rows, d_rows = [], [], []
    for b in range(B):
        sid = sid_ref[b]
        eid = eid_ref[b]
        s_rows.append(emb_scr[pl.ds(sid, 1), :])            # (1, D)
        e_rows.append(emb_scr[pl.ds(S + eid, 1), :])        # (1, D)
        d_rows.append(disc_ref[pl.ds(eid, 1), :])           # (1, 1)
    S_sel = jnp.concatenate(s_rows, axis=0)                 # (B, D)
    E_sel = jnp.concatenate(e_rows, axis=0)                 # (B, D)
    disc = jax.nn.sigmoid(jnp.concatenate(d_rows, axis=0))  # (B, 1)

    S_t = jnp.dot(S_sel, tW_ref[0], preferred_element_type=f32) + tb_ref[0]      # (B, K)
    E_t = jnp.dot(E_sel, tW_ref[1], preferred_element_type=f32) + tb_ref[1]      # (B, K)
    C_t = jnp.dot(C_forward, tW_ref[2], preferred_element_type=f32) + tb_ref[2]  # (K, K)

    # ---------------- concept distill + interaction state -------------------
    kp = kp_ref[...]                                        # (B, K)
    kp_sum = jnp.maximum(jnp.sum(kp, axis=1, keepdims=True), 1.0)   # zero-row guard
    ecd = jnp.dot(kp, C_t, preferred_element_type=f32) / kp_sum     # exact divide
    state = disc * (jax.nn.sigmoid(S_t * ecd) - jax.nn.sigmoid(E_t * ecd)) * kp  # (B, K)

    # ---------------- prediction MLP (transposed: lane-dense batch axis) ----
    h = state.T                                             # (K, B)
    for li in range(n_mlp):
        wT = mlp_refs[2 * li][...]                          # (out, in)
        bT = mlp_refs[2 * li + 1][...]                      # (out, 1)
        h = jnp.dot(wT, h, preferred_element_type=f32) + bT
        h = jnp.tanh(h) if li < n_mlp - 1 else jax.nn.sigmoid(h)
    out_ref[...] = h                                        # (1, B)


# ----------------------------------------------------------------------------
# Wrapper
# ----------------------------------------------------------------------------
def ignet_forward(params, graphs, stu_id, exer_id, knowledge_point,
                  stu_num, prob_num, know_num, khop=2, gcn_layers=3):
    S, P, K = stu_num, prob_num, know_num
    D = params["stu_emb"].shape[1]
    B = knowledge_point.shape[0]
    n_mlp = len(params["mlp"])
    f32, bf16 = jnp.float32, jnp.bfloat16

    # Graphs are static across calls: pre-row-normalize once ('mean' SAGE
    # aggregation becomes a plain matmul) and cast to bf16 (MXU-native, halves
    # the bytes of the dominant (N, N) operands).
    def row_normalize(A):
        deg = jnp.sum(A, axis=1, keepdims=True)
        return jnp.where(deg > 0.0, A / jnp.maximum(deg, 1.0), 0.0)

    A_Q = row_normalize(graphs["Q"]).astype(bf16)
    A_r = row_normalize(graphs["right"]).astype(bf16)
    A_w = row_normalize(graphs["wrong"]).astype(bf16)
    A_I = row_normalize(graphs["I"]).astype(bf16)
    nadj = graphs["norm_adj"].astype(bf16)

    # Pre-concatenated node-feature buffers; the two A_Q SAGE passes share a
    # single buffer of feature width 2*D (fused in-kernel).
    stu = params["stu_emb"]
    ex_r = params["exer_emb_right"]
    ex_w = params["exer_emb_wrong"]
    kn = params["know_emb"]
    ec_feat = jnp.concatenate(
        [jnp.concatenate([ex_r, ex_w], axis=1),
         jnp.concatenate([kn, kn], axis=1)], axis=0).astype(bf16)   # (P+K, 2D)
    ser_feat = jnp.concatenate([stu, ex_r], axis=0).astype(bf16)    # (S+P, D)
    sew_feat = jnp.concatenate([stu, ex_w], axis=0).astype(bf16)    # (S+P, D)
    sc_feat = jnp.concatenate([stu, kn], axis=0).astype(bf16)       # (S+K, D)

    attn_W = jnp.stack([params[n]["W"] for n in _ATTN_ORDER])                   # (4, D, D)
    attn_b = jnp.stack([params[n]["b"].reshape(1, -1) for n in _ATTN_ORDER])    # (4, 1, D)
    attn_a = jnp.stack([params[n]["att"] for n in _ATTN_ORDER])                 # (4, 1, D)
    trans_W = jnp.stack([params[n]["W"] for n in _TRANS_ORDER])                 # (3, D, K)
    trans_b = jnp.stack([params[n]["b"].reshape(1, -1) for n in _TRANS_ORDER])  # (3, 1, K)

    mlp_flat = []
    for layer in params["mlp"]:
        mlp_flat.append(layer["W"].T)                       # (out, in) — transposed MLP
        mlp_flat.append(layer["b"].reshape(-1, 1))          # (out, 1)

    inputs = [
        ec_feat, ser_feat, sew_feat, sc_feat,
        A_Q, A_r, A_w, A_I, nadj,
        params["disc_emb"], attn_W, attn_b, attn_a, trans_W, trans_b,
        *mlp_flat,
        knowledge_point.astype(f32),
        stu_id.astype(jnp.int32), exer_id.astype(jnp.int32),
    ]

    vmem_spec = pl.BlockSpec(memory_space=pltpu.MemorySpace.VMEM)
    smem_spec = pl.BlockSpec(memory_space=pltpu.MemorySpace.SMEM)
    in_specs = [vmem_spec] * (len(inputs) - 2) + [smem_spec, smem_spec]

    kernel = functools.partial(
        _ignet_fused_kernel,
        S=S, P=P, K=K, D=D, B=B, khop=khop, gcn_layers=gcn_layers, n_mlp=n_mlp)

    out = pl.pallas_call(
        kernel,
        out_shape=jax.ShapeDtypeStruct((1, B), f32),
        in_specs=in_specs,
        out_specs=pl.BlockSpec(memory_space=pltpu.MemorySpace.VMEM),
        scratch_shapes=[pltpu.VMEM((S + P, D), f32)],
        compiler_params=pltpu.CompilerParams(vmem_limit_bytes=64 * 1024 * 1024),
    )(*inputs)
    return out.reshape(-1)


# ----------------------------------------------------------------------------
# Pure-JAX f32 reference (PyTorch-equivalent math) for a correctness check.
# ----------------------------------------------------------------------------
def ignet_reference(params, graphs, stu_id, exer_id, kp,
                    stu_num, prob_num, know_num, khop=2, gcn_layers=3):
    def sage_net(A, h):
        deg = jnp.sum(A, axis=1, keepdims=True)
        res, tmp = h, h
        for i in range(khop):
            neigh = jnp.where(deg > 0, (A @ tmp) / jnp.maximum(deg, 1.0), 0.0)
            tmp = tmp + neigh
            res = res + tmp / float(1 + i)
        return res

    def attn(embeds, prm):
        W, b, att = prm["W"], prm["b"], prm["att"]
        scores = jnp.stack(
            [jnp.sum(att[0] * jnp.mean(jnp.tanh(e @ W + b), axis=0)) for e in embeds])
        beta = jax.nn.softmax(scores)
        z = jnp.zeros_like(embeds[0])
        for i, e in enumerate(embeds):
            z = z + e * beta[i]
        return z

    stu = params["stu_emb"]
    ex_r = params["exer_emb_right"]
    ex_w = params["exer_emb_wrong"]
    kn = params["know_emb"]

    E_C_r = sage_net(graphs["Q"], jnp.concatenate([ex_r, kn], axis=0))
    E_C_w = sage_net(graphs["Q"], jnp.concatenate([ex_w, kn], axis=0))
    S_E_r = sage_net(graphs["right"], jnp.concatenate([stu, ex_r], axis=0))
    S_E_w = sage_net(graphs["wrong"], jnp.concatenate([stu, ex_w], axis=0))
    S_C = sage_net(graphs["I"], jnp.concatenate([stu, kn], axis=0))

    E_f = (attn([E_C_r[:prob_num], S_E_r[stu_num:]], params["attn_E_right"]) *
           attn([E_C_w[:prob_num], S_E_w[stu_num:]], params["attn_E_wrong"]))
    C_f = attn([E_C_r[prob_num:], E_C_w[prob_num:], S_C[stu_num:]], params["attn_C"])
    S_f = attn([S_E_r[:stu_num], S_E_w[:stu_num], S_C[:stu_num]], params["attn_S"])

    emb = jnp.concatenate([S_f, E_f], axis=0)
    acc, cur = emb, emb
    for _ in range(gcn_layers):
        cur = graphs["norm_adj"] @ cur
        acc = acc + cur
    out = acc / float(gcn_layers + 1)

    S_t = out[:stu_num] @ params["transfer_stu"]["W"] + params["transfer_stu"]["b"]
    E_t = out[stu_num:] @ params["transfer_exer"]["W"] + params["transfer_exer"]["b"]
    C_t = C_f @ params["transfer_concept"]["W"] + params["transfer_concept"]["b"]

    disc = jax.nn.sigmoid(params["disc_emb"][exer_id])
    ecd = (kp @ C_t) / jnp.maximum(jnp.sum(kp, axis=1, keepdims=True), 1.0)
    state = disc * (jax.nn.sigmoid(S_t[stu_id] * ecd) - jax.nn.sigmoid(E_t[exer_id] * ecd)) * kp

    h = state
    for layer in params["mlp"][:-1]:
        h = jnp.tanh(h @ layer["W"] + layer["b"])
    h = jax.nn.sigmoid(h @ params["mlp"][-1]["W"] + params["mlp"][-1]["b"])
    return h.reshape(-1)


# ----------------------------------------------------------------------------
# Parameter / graph construction (deterministic, synthetic)
# ----------------------------------------------------------------------------
def xavier_normal(key, fan_in, fan_out, gain=1.0, shape=None):
    std = gain * (2.0 / (fan_in + fan_out)) ** 0.5
    shape = shape if shape is not None else (fan_in, fan_out)
    return std * jax.random.normal(key, shape, dtype=jnp.float32)


def make_params(key, stu_num, prob_num, know_num, dim, hidden_dim, inter_layers):
    ks = iter(jax.random.split(key, 64))
    p = {}
    p["stu_emb"] = xavier_normal(next(ks), stu_num, dim)
    p["exer_emb_right"] = xavier_normal(next(ks), prob_num, dim)
    p["exer_emb_wrong"] = xavier_normal(next(ks), prob_num, dim)
    p["know_emb"] = xavier_normal(next(ks), know_num, dim)
    p["disc_emb"] = xavier_normal(next(ks), prob_num, 1)

    for name in ["attn_S", "attn_E_right", "attn_E_wrong", "attn_C"]:
        p[name] = {
            "W": xavier_normal(next(ks), dim, dim),         # stored (in, out)
            "b": jnp.zeros((dim,), jnp.float32),
            "att": xavier_normal(next(ks), 1, dim, gain=1.414, shape=(1, dim)),
        }

    for name in ["transfer_stu", "transfer_exer", "transfer_concept"]:
        p[name] = {"W": xavier_normal(next(ks), dim, know_num),
                   "b": jnp.zeros((know_num,), jnp.float32)}

    # prediction MLP: know -> h -> h/2 -> h/4 -> 1
    dims = [know_num] + [hidden_dim // (2 ** i) for i in range(inter_layers)] + [1]
    p["mlp"] = []
    for i in range(len(dims) - 1):
        p["mlp"].append({"W": xavier_normal(next(ks), dims[i], dims[i + 1]),
                         "b": jnp.zeros((dims[i + 1],), jnp.float32)})
    return p


def bipartite_adj(key, n_a, n_b, p=0.4):
    mask = (jax.random.uniform(key, (n_a, n_b)) < p).astype(jnp.float32)
    n = n_a + n_b
    A = jnp.zeros((n, n), jnp.float32)
    A = A.at[:n_a, n_a:].set(mask)
    A = A.at[n_a:, :n_a].set(mask.T)
    return A


def sym_normalize(A):
    deg = jnp.sum(A, axis=1)
    d = jnp.where(deg > 0, 1.0 / jnp.sqrt(jnp.maximum(deg, 1.0)), 0.0)
    return A * d[:, None] * d[None, :]


# ----------------------------------------------------------------------------
# Main
# ----------------------------------------------------------------------------
if __name__ == "__main__":
    # S, P, K are multiples of 8 so the in-kernel [:S]/[S:]/[:P]/[P:] splits land
    # on sublane-tile boundaries.
    stu_num, prob_num, know_num = 16, 16, 8
    dim, hidden_dim, inter_layers, khop, gcn_layers = 16, 32, 3, 2, 3
    batch = 4

    key = jax.random.PRNGKey(0)
    k_param, k_r, k_w, k_i, k_q, k_n, k_kp, k_sid, k_eid = jax.random.split(key, 9)

    params = make_params(k_param, stu_num, prob_num, know_num, dim, hidden_dim, inter_layers)

    graphs = {
        "right": bipartite_adj(k_r, stu_num, prob_num, p=0.4),
        "wrong": bipartite_adj(k_w, stu_num, prob_num, p=0.4),
        "I": bipartite_adj(k_i, stu_num, know_num, p=0.5),
        "Q": bipartite_adj(k_q, prob_num, know_num, p=0.5),
        "norm_adj": sym_normalize(bipartite_adj(k_n, stu_num, prob_num, p=0.4)),
    }

    knowledge_point = (jax.random.uniform(k_kp, (batch, know_num)) < 0.5).astype(jnp.float32)
    knowledge_point = knowledge_point.at[:, 0].set(1.0)          # non-empty rows
    stu_id = jax.random.randint(k_sid, (batch,), 0, stu_num)
    exer_id = jax.random.randint(k_eid, (batch,), 0, prob_num)

    out = ignet_forward(params, graphs, stu_id, exer_id, knowledge_point,
                        stu_num, prob_num, know_num, khop=khop, gcn_layers=gcn_layers)
    out = jax.block_until_ready(out)

    ref = ignet_reference(params, graphs, stu_id, exer_id, knowledge_point,
                          stu_num, prob_num, know_num, khop=khop, gcn_layers=gcn_layers)
    ref = jax.block_until_ready(ref)

    assert out.shape == (batch,)
    assert bool(jnp.all(jnp.isfinite(out)))
    # Kernel uses bf16 matmul operands for the graph propagation (f32 accum);
    # the reference is pure f32 — allow a small absolute tolerance on the final
    # probabilities.
    max_err = float(jnp.max(jnp.abs(out - ref)))
    assert max_err < 2e-2, (max_err, out, ref)
    print("KERNEL_OK")
</pallas_src>

<mosaic_0001>
module attributes {stable_mosaic.version = 11 : i64} {
  func.func @_ignet_fused_kernel(%arg0: memref<24x32xbf16, #tpu.memory_space<vmem>>, %arg1: memref<32x16xbf16, #tpu.memory_space<vmem>>, %arg2: memref<32x16xbf16, #tpu.memory_space<vmem>>, %arg3: memref<24x16xbf16, #tpu.memory_space<vmem>>, %arg4: memref<24x24xbf16, #tpu.memory_space<vmem>>, %arg5: memref<32x32xbf16, #tpu.memory_space<vmem>>, %arg6: memref<32x32xbf16, #tpu.memory_space<vmem>>, %arg7: memref<24x24xbf16, #tpu.memory_space<vmem>>, %arg8: memref<32x32xbf16, #tpu.memory_space<vmem>>, %arg9: memref<16x1xf32, #tpu.memory_space<vmem>>, %arg10: memref<4x16x16xf32, #tpu.memory_space<vmem>>, %arg11: memref<4x1x16xf32, #tpu.memory_space<vmem>>, %arg12: memref<4x1x16xf32, #tpu.memory_space<vmem>>, %arg13: memref<3x16x8xf32, #tpu.memory_space<vmem>>, %arg14: memref<3x1x8xf32, #tpu.memory_space<vmem>>, %arg15: memref<32x8xf32, #tpu.memory_space<vmem>>, %arg16: memref<32x1xf32, #tpu.memory_space<vmem>>, %arg17: memref<16x32xf32, #tpu.memory_space<vmem>>, %arg18: memref<16x1xf32, #tpu.memory_space<vmem>>, %arg19: memref<8x16xf32, #tpu.memory_space<vmem>>, %arg20: memref<8x1xf32, #tpu.memory_space<vmem>>, %arg21: memref<1x8xf32, #tpu.memory_space<vmem>>, %arg22: memref<1x1xf32, #tpu.memory_space<vmem>>, %arg23: memref<4x8xf32, #tpu.memory_space<vmem>>, %arg24: memref<4xi32, #tpu.memory_space<smem>>, %arg25: memref<4xi32, #tpu.memory_space<smem>>, %arg26: memref<1x4xf32, #tpu.memory_space<vmem>>, %arg27: memref<32x16xf32, #tpu.memory_space<vmem>>) attributes {dimension_semantics = [], scalar_prefetch = 0 : i64, scratch_operands = 1 : i64, tpu.core_type = #tpu.core_type<tc>} {
    %c0 = arith.constant 0 : index
    %c0_0 = arith.constant 0 : index
    %0 = vector.load %arg4[%c0, %c0_0] : memref<24x24xbf16, #tpu.memory_space<vmem>>, vector<24x24xbf16>
    %c0_1 = arith.constant 0 : index
    %c0_2 = arith.constant 0 : index
    %1 = vector.load %arg0[%c0_1, %c0_2] : memref<24x32xbf16, #tpu.memory_space<vmem>>, vector<24x32xbf16>
    %2 = arith.extf %1 : vector<24x32xbf16> to vector<24x32xf32>
    %3 = arith.truncf %2 : vector<24x32xf32> to vector<24x32xbf16>
    %cst = arith.constant dense<0.000000e+00> : vector<24x32xf32>
    %4 = tpu.matmul %0, %3, %cst {dimension_numbers = #tpu.dot_dimension_numbers<[1], [0], [0], [1], [0, 0, 1, 1], [], []>} : vector<24x24xbf16>, vector<24x32xbf16>, vector<24x32xf32> -> vector<24x32xf32>
    %5 = arith.addf %2, %4 : vector<24x32xf32>
    %cst_3 = arith.constant 1.000000e+00 : f32
    %6 = vector.broadcast %cst_3 : f32 to vector<24x32xf32>
    %7 = arith.mulf %5, %6 : vector<24x32xf32>
    %8 = arith.addf %2, %7 : vector<24x32xf32>
    %9 = arith.truncf %5 : vector<24x32xf32> to vector<24x32xbf16>
    %cst_4 = arith.constant dense<0.000000e+00> : vector<24x32xf32>
    %10 = tpu.matmul %0, %9, %cst_4 {dimension_numbers = #tpu.dot_dimension_numbers<[1], [0], [0], [1], [0, 0, 1, 1], [], []>} : vector<24x24xbf16>, vector<24x32xbf16>, vector<24x32xf32> -> vector<24x32xf32>
    %11 = arith.addf %5, %10 : vector<24x32xf32>
    %cst_5 = arith.constant 5.000000e-01 : f32
    %12 = vector.broadcast %cst_5 : f32 to vector<24x32xf32>
    %13 = arith.mulf %11, %12 : vector<24x32xf32>
    %14 = arith.addf %8, %13 : vector<24x32xf32>
    %15 = vector.extract_strided_slice %14 {offsets = [0, 0], sizes = [24, 16], strides = [1, 1]} : vector<24x32xf32> to vector<24x16xf32>
    %16 = vector.extract_strided_slice %14 {offsets = [0, 16], sizes = [24, 16], strides = [1, 1]} : vector<24x32xf32> to vector<24x16xf32>
    %c0_6 = arith.constant 0 : index
    %c0_7 = arith.constant 0 : index
    %17 = vector.load %arg5[%c0_6, %c0_7] : memref<32x32xbf16, #tpu.memory_space<vmem>>, vector<32x32xbf16>
    %c0_8 = arith.constant 0 : index
    %c0_9 = arith.constant 0 : index
    %18 = vector.load %arg1[%c0_8, %c0_9] : memref<32x16xbf16, #tpu.memory_space<vmem>>, vector<32x16xbf16>
    %19 = arith.extf %18 : vector<32x16xbf16> to vector<32x16xf32>
    %20 = arith.truncf %19 : vector<32x16xf32> to vector<32x16xbf16>
    %cst_10 = arith.constant dense<0.000000e+00> : vector<32x16xf32>
    %21 = tpu.matmul %17, %20, %cst_10 {dimension_numbers = #tpu.dot_dimension_numbers<[1], [0], [0], [1], [0, 0, 1, 1], [], []>} : vector<32x32xbf16>, vector<32x16xbf16>, vector<32x16xf32> -> vector<32x16xf32>
    %22 = arith.addf %19, %21 : vector<32x16xf32>
    %cst_11 = arith.constant 1.000000e+00 : f32
    %23 = vector.broadcast %cst_11 : f32 to vector<32x16xf32>
    %24 = arith.mulf %22, %23 : vector<32x16xf32>
    %25 = arith.addf %19, %24 : vector<32x16xf32>
    %26 = arith.truncf %22 : vector<32x16xf32> to vector<32x16xbf16>
    %cst_12 = arith.constant dense<0.000000e+00> : vector<32x16xf32>
    %27 = tpu.matmul %17, %26, %cst_12 {dimension_numbers = #tpu.dot_dimension_numbers<[1], [0], [0], [1], [0, 0, 1, 1], [], []>} : vector<32x32xbf16>, vector<32x16xbf16>, vector<32x16xf32> -> vector<32x16xf32>
    %28 = arith.addf %22, %27 : vector<32x16xf32>
    %cst_13 = arith.constant 5.000000e-01 : f32
    %29 = vector.broadcast %cst_13 : f32 to vector<32x16xf32>
    %30 = arith.mulf %28, %29 : vector<32x16xf32>
    %31 = arith.addf %25, %30 : vector<32x16xf32>
    %c0_14 = arith.constant 0 : index
    %c0_15 = arith.constant 0 : index
    %32 = vector.load %arg6[%c0_14, %c0_15] : memref<32x32xbf16, #tpu.memory_space<vmem>>, vector<32x32xbf16>
    %c0_16 = arith.constant 0 : index
    %c0_17 = arith.constant 0 : index
    %33 = vector.load %arg2[%c0_16, %c0_17] : memref<32x16xbf16, #tpu.memory_space<vmem>>, vector<32x16xbf16>
    %34 = arith.extf %33 : vector<32x16xbf16> to vector<32x16xf32>
    %35 = arith.truncf %34 : vector<32x16xf32> to vector<32x16xbf16>
    %cst_18 = arith.constant dense<0.000000e+00> : vector<32x16xf32>
    %36 = tpu.matmul %32, %35, %cst_18 {dimension_numbers = #tpu.dot_dimension_numbers<[1], [0], [0], [1], [0, 0, 1, 1], [], []>} : vector<32x32xbf16>, vector<32x16xbf16>, vector<32x16xf32> -> vector<32x16xf32>
    %37 = arith.addf %34, %36 : vector<32x16xf32>
    %cst_19 = arith.constant 1.000000e+00 : f32
    %38 = vector.broadcast %cst_19 : f32 to vector<32x16xf32>
    %39 = arith.mulf %37, %38 : vector<32x16xf32>
    %40 = arith.addf %34, %39 : vector<32x16xf32>
    %41 = arith.truncf %37 : vector<32x16xf32> to vector<32x16xbf16>
    %cst_20 = arith.constant dense<0.000000e+00> : vector<32x16xf32>
    %42 = tpu.matmul %32, %41, %cst_20 {dimension_numbers = #tpu.dot_dimension_numbers<[1], [0], [0], [1], [0, 0, 1, 1], [], []>} : vector<32x32xbf16>, vector<32x16xbf16>, vector<32x16xf32> -> vector<32x16xf32>
    %43 = arith.addf %37, %42 : vector<32x16xf32>
    %cst_21 = arith.constant 5.000000e-01 : f32
    %44 = vector.broadcast %cst_21 : f32 to vector<32x16xf32>
    %45 = arith.mulf %43, %44 : vector<32x16xf32>
    %46 = arith.addf %40, %45 : vector<32x16xf32>
    %c0_22 = arith.constant 0 : index
    %c0_23 = arith.constant 0 : index
    %47 = vector.load %arg7[%c0_22, %c0_23] : memref<24x24xbf16, #tpu.memory_space<vmem>>, vector<24x24xbf16>
    %c0_24 = arith.constant 0 : index
    %c0_25 = arith.constant 0 : index
    %48 = vector.load %arg3[%c0_24, %c0_25] : memref<24x16xbf16, #tpu.memory_space<vmem>>, vector<24x16xbf16>
    %49 = arith.extf %48 : vector<24x16xbf16> to vector<24x16xf32>
    %50 = arith.truncf %49 : vector<24x16xf32> to vector<24x16xbf16>
    %cst_26 = arith.constant dense<0.000000e+00> : vector<24x16xf32>
    %51 = tpu.matmul %47, %50, %cst_26 {dimension_numbers = #tpu.dot_dimension_numbers<[1], [0], [0], [1], [0, 0, 1, 1], [], []>} : vector<24x24xbf16>, vector<24x16xbf16>, vector<24x16xf32> -> vector<24x16xf32>
    %52 = arith.addf %49, %51 : vector<24x16xf32>
    %cst_27 = arith.constant 1.000000e+00 : f32
    %53 = vector.broadcast %cst_27 : f32 to vector<24x16xf32>
    %54 = arith.mulf %52, %53 : vector<24x16xf32>
    %55 = arith.addf %49, %54 : vector<24x16xf32>
    %56 = arith.truncf %52 : vector<24x16xf32> to vector<24x16xbf16>
    %cst_28 = arith.constant dense<0.000000e+00> : vector<24x16xf32>
    %57 = tpu.matmul %47, %56, %cst_28 {dimension_numbers = #tpu.dot_dimension_numbers<[1], [0], [0], [1], [0, 0, 1, 1], [], []>} : vector<24x24xbf16>, vector<24x16xbf16>, vector<24x16xf32> -> vector<24x16xf32>
    %58 = arith.addf %52, %57 : vector<24x16xf32>
    %cst_29 = arith.constant 5.000000e-01 : f32
    %59 = vector.broadcast %cst_29 : f32 to vector<24x16xf32>
    %60 = arith.mulf %58, %59 : vector<24x16xf32>
    %61 = arith.addf %55, %60 : vector<24x16xf32>
    %62 = vector.extract_strided_slice %15 {offsets = [0, 0], sizes = [16, 16], strides = [1, 1]} : vector<24x16xf32> to vector<16x16xf32>
    %63 = vector.extract_strided_slice %31 {offsets = [16, 0], sizes = [16, 16], strides = [1, 1]} : vector<32x16xf32> to vector<16x16xf32>
    %c0_30 = arith.constant 0 : index
    %c0_31 = arith.constant 0 : index
    %c0_32 = arith.constant 0 : index
    %64 = vector.load %arg10[%c0_30, %c0_31, %c0_32] : memref<4x16x16xf32, #tpu.memory_space<vmem>>, vector<1x16x16xf32>
    %65 = vector.shape_cast %64 : vector<1x16x16xf32> to vector<16x16xf32>
    %c0_33 = arith.constant 0 : index
    %c0_34 = arith.constant 0 : index
    %c0_35 = arith.constant 0 : index
    %66 = vector.load %arg11[%c0_33, %c0_34, %c0_35] : memref<4x1x16xf32, #tpu.memory_space<vmem>>, vector<1x1x16xf32>
    %67 = vector.shape_cast %66 : vector<1x1x16xf32> to vector<1x16xf32>
    %c0_36 = arith.constant 0 : index
    %c0_37 = arith.constant 0 : index
    %c0_38 = arith.constant 0 : index
    %68 = vector.load %arg12[%c0_36, %c0_37, %c0_38] : memref<4x1x16xf32, #tpu.memory_space<vmem>>, vector<1x1x16xf32>
    %69 = vector.shape_cast %68 : vector<1x1x16xf32> to vector<1x16xf32>
    %70 = tpu.concatenate %62, %63 in 0 : vector<16x16xf32>, vector<16x16xf32> -> vector<32x16xf32>
    %cst_39 = arith.constant dense<0.000000e+00> : vector<32x16xf32>
    %71 = tpu.matmul %70, %65, %cst_39 {dimension_numbers = #tpu.dot_dimension_numbers<[1], [0], [0], [1], [0, 0, 1, 1], [], []>} : vector<32x16xf32>, vector<16x16xf32>, vector<32x16xf32> -> vector<32x16xf32>
    %72 = vector.broadcast %67 : vector<1x16xf32> to vector<32x16xf32>
    %73 = arith.addf %71, %72 : vector<32x16xf32>
    %74 = math.tanh %73 : vector<32x16xf32>
    %75 = vector.extract_strided_slice %74 {offsets = [0, 0], sizes = [16, 16], strides = [1, 1]} : vector<32x16xf32> to vector<16x16xf32>
    %cst_40 = arith.constant dense<0.000000e+00> : vector<16xf32>
    %76 = vector.multi_reduction <add>, %75, %cst_40 [0] : vector<16x16xf32> to vector<16xf32>
    %77 = vector.shape_cast %76 : vector<16xf32> to vector<1x16xf32>
    %cst_41 = arith.constant 1.600000e+01 : f32
    %78 = vector.broadcast %cst_41 : f32 to vector<1x16xf32>
    %79 = arith.divf %77, %78 : vector<1x16xf32>
    %80 = arith.mulf %69, %79 : vector<1x16xf32>
    %cst_42 = arith.constant dense<0.000000e+00> : vector<1xf32>
    %81 = vector.multi_reduction <add>, %80, %cst_42 [1] : vector<1x16xf32> to vector<1xf32>
    %82 = vector.shape_cast %81 : vector<1xf32> to vector<1x1xf32>
    %83 = vector.extract_strided_slice %74 {offsets = [16, 0], sizes = [16, 16], strides = [1, 1]} : vector<32x16xf32> to vector<16x16xf32>
    %cst_43 = arith.constant dense<0.000000e+00> : vector<16xf32>
    %84 = vector.multi_reduction <add>, %83, %cst_43 [0] : vector<16x16xf32> to vector<16xf32>
    %85 = vector.shape_cast %84 : vector<16xf32> to vector<1x16xf32>
    %cst_44 = arith.constant 1.600000e+01 : f32
    %86 = vector.broadcast %cst_44 : f32 to vector<1x16xf32>
    %87 = arith.divf %85, %86 : vector<1x16xf32>
    %88 = arith.mulf %69, %87 : vector<1x16xf32>
    %cst_45 = arith.constant dense<0.000000e+00> : vector<1xf32>
    %89 = vector.multi_reduction <add>, %88, %cst_45 [1] : vector<1x16xf32> to vector<1xf32>
    %90 = vector.shape_cast %89 : vector<1xf32> to vector<1x1xf32>
    %91 = arith.maximumf %82, %90 : vector<1x1xf32>
    %92 = arith.subf %82, %91 : vector<1x1xf32>
    %93 = math.exp %92 : vector<1x1xf32>
    %94 = arith.subf %90, %91 : vector<1x1xf32>
    %95 = math.exp %94 : vector<1x1xf32>
    %96 = arith.addf %93, %95 : vector<1x1xf32>
    %cst_46 = arith.constant 0.000000e+00 : f32
    %97 = vector.broadcast %cst_46 : f32 to vector<16x16xf32>
    %98 = arith.divf %93, %96 : vector<1x1xf32>
    %99 = vector.broadcast %98 : vector<1x1xf32> to vector<16x16xf32>
    %100 = arith.mulf %62, %99 : vector<16x16xf32>
    %101 = arith.addf %97, %100 : vector<16x16xf32>
    %102 = arith.divf %95, %96 : vector<1x1xf32>
    %103 = vector.broadcast %102 : vector<1x1xf32> to vector<16x16xf32>
    %104 = arith.mulf %63, %103 : vector<16x16xf32>
    %105 = arith.addf %101, %104 : vector<16x16xf32>
    %106 = vector.extract_strided_slice %16 {offsets = [0, 0], sizes = [16, 16], strides = [1, 1]} : vector<24x16xf32> to vector<16x16xf32>
    %107 = vector.extract_strided_slice %46 {offsets = [16, 0], sizes = [16, 16], strides = [1, 1]} : vector<32x16xf32> to vector<16x16xf32>
    %c1 = arith.constant 1 : index
    %c0_47 = arith.constant 0 : index
    %c0_48 = arith.constant 0 : index
    %108 = vector.load %arg10[%c1, %c0_47, %c0_48] : memref<4x16x16xf32, #tpu.memory_space<vmem>>, vector<1x16x16xf32>
    %109 = vector.shape_cast %108 : vector<1x16x16xf32> to vector<16x16xf32>
    %c1_49 = arith.constant 1 : index
    %c0_50 = arith.constant 0 : index
    %c0_51 = arith.constant 0 : index
    %110 = vector.load %arg11[%c1_49, %c0_50, %c0_51] : memref<4x1x16xf32, #tpu.memory_space<vmem>>, vector<1x1x16xf32>
    %111 = vector.shape_cast %110 : vector<1x1x16xf32> to vector<1x16xf32>
    %c1_52 = arith.constant 1 : index
    %c0_53 = arith.constant 0 : index
    %c0_54 = arith.constant 0 : index
    %112 = vector.load %arg12[%c1_52, %c0_53, %c0_54] : memref<4x1x16xf32, #tpu.memory_space<vmem>>, vector<1x1x16xf32>
    %113 = vector.shape_cast %112 : vector<1x1x16xf32> to vector<1x16xf32>
    %114 = tpu.concatenate %106, %107 in 0 : vector<16x16xf32>, vector<16x16xf32> -> vector<32x16xf32>
    %cst_55 = arith.constant dense<0.000000e+00> : vector<32x16xf32>
    %115 = tpu.matmul %114, %109, %cst_55 {dimension_numbers = #tpu.dot_dimension_numbers<[1], [0], [0], [1], [0, 0, 1, 1], [], []>} : vector<32x16xf32>, vector<16x16xf32>, vector<32x16xf32> -> vector<32x16xf32>
    %116 = vector.broadcast %111 : vector<1x16xf32> to vector<32x16xf32>
    %117 = arith.addf %115, %116 : vector<32x16xf32>
    %118 = math.tanh %117 : vector<32x16xf32>
    %119 = vector.extract_strided_slice %118 {offsets = [0, 0], sizes = [16, 16], strides = [1, 1]} : vector<32x16xf32> to vector<16x16xf32>
    %cst_56 = arith.constant dense<0.000000e+00> : vector<16xf32>
    %120 = vector.multi_reduction <add>, %119, %cst_56 [0] : vector<16x16xf32> to vector<16xf32>
    %121 = vector.shape_cast %120 : vector<16xf32> to vector<1x16xf32>
    %cst_57 = arith.constant 1.600000e+01 : f32
    %122 = vector.broadcast %cst_57 : f32 to vector<1x16xf32>
    %123 = arith.divf %121, %122 : vector<1x16xf32>
    %124 = arith.mulf %113, %123 : vector<1x16xf32>
    %cst_58 = arith.constant dense<0.000000e+00> : vector<1xf32>
    %125 = vector.multi_reduction <add>, %124, %cst_58 [1] : vector<1x16xf32> to vector<1xf32>
    %126 = vector.shape_cast %125 : vector<1xf32> to vector<1x1xf32>
    %127 = vector.extract_strided_slice %118 {offsets = [16, 0], sizes = [16, 16], strides = [1, 1]} : vector<32x16xf32> to vector<16x16xf32>
    %cst_59 = arith.constant dense<0.000000e+00> : vector<16xf32>
    %128 = vector.multi_reduction <add>, %127, %cst_59 [0] : vector<16x16xf32> to vector<16xf32>
    %129 = vector.shape_cast %128 : vector<16xf32> to vector<1x16xf32>
    %cst_60 = arith.constant 1.600000e+01 : f32
    %130 = vector.broadcast %cst_60 : f32 to vector<1x16xf32>
    %131 = arith.divf %129, %130 : vector<1x16xf32>
    %132 = arith.mulf %113, %131 : vector<1x16xf32>
    %cst_61 = arith.constant dense<0.000000e+00> : vector<1xf32>
    %133 = vector.multi_reduction <add>, %132, %cst_61 [1] : vector<1x16xf32> to vector<1xf32>
    %134 = vector.shape_cast %133 : vector<1xf32> to vector<1x1xf32>
    %135 = arith.maximumf %126, %134 : vector<1x1xf32>
    %136 = arith.subf %126, %135 : vector<1x1xf32>
    %137 = math.exp %136 : vector<1x1xf32>
    %138 = arith.subf %134, %135 : vector<1x1xf32>
    %139 = math.exp %138 : vector<1x1xf32>
    %140 = arith.addf %137, %139 : vector<1x1xf32>
    %cst_62 = arith.constant 0.000000e+00 : f32
    %141 = vector.broadcast %cst_62 : f32 to vector<16x16xf32>
    %142 = arith.divf %137, %140 : vector<1x1xf32>
    %143 = vector.broadcast %142 : vector<1x1xf32> to vector<16x16xf32>
    %144 = arith.mulf %106, %143 : vector<16x16xf32>
    %145 = arith.addf %141, %144 : vector<16x16xf32>
    %146 = arith.divf %139, %140 : vector<1x1xf32>
    %147 = vector.broadcast %146 : vector<1x1xf32> to vector<16x16xf32>
    %148 = arith.mulf %107, %147 : vector<16x16xf32>
    %149 = arith.addf %145, %148 : vector<16x16xf32>
    %150 = arith.mulf %105, %149 : vector<16x16xf32>
    %151 = vector.extract_strided_slice %15 {offsets = [16, 0], sizes = [8, 16], strides = [1, 1]} : vector<24x16xf32> to vector<8x16xf32>
    %152 = vector.extract_strided_slice %16 {offsets = [16, 0], sizes = [8, 16], strides = [1, 1]} : vector<24x16xf32> to vector<8x16xf32>
    %153 = vector.extract_strided_slice %61 {offsets = [16, 0], sizes = [8, 16], strides = [1, 1]} : vector<24x16xf32> to vector<8x16xf32>
    %c2 = arith.constant 2 : index
    %c0_63 = arith.constant 0 : index
    %c0_64 = arith.constant 0 : index
    %154 = vector.load %arg10[%c2, %c0_63, %c0_64] : memref<4x16x16xf32, #tpu.memory_space<vmem>>, vector<1x16x16xf32>
    %155 = vector.shape_cast %154 : vector<1x16x16xf32> to vector<16x16xf32>
    %c2_65 = arith.constant 2 : index
    %c0_66 = arith.constant 0 : index
    %c0_67 = arith.constant 0 : index
    %156 = vector.load %arg11[%c2_65, %c0_66, %c0_67] : memref<4x1x16xf32, #tpu.memory_space<vmem>>, vector<1x1x16xf32>
    %157 = vector.shape_cast %156 : vector<1x1x16xf32> to vector<1x16xf32>
    %c2_68 = arith.constant 2 : index
    %c0_69 = arith.constant 0 : index
    %c0_70 = arith.constant 0 : index
    %158 = vector.load %arg12[%c2_68, %c0_69, %c0_70] : memref<4x1x16xf32, #tpu.memory_space<vmem>>, vector<1x1x16xf32>
    %159 = vector.shape_cast %158 : vector<1x1x16xf32> to vector<1x16xf32>
    %160 = tpu.concatenate %151, %152, %153 in 0 : vector<8x16xf32>, vector<8x16xf32>, vector<8x16xf32> -> vector<24x16xf32>
    %cst_71 = arith.constant dense<0.000000e+00> : vector<24x16xf32>
    %161 = tpu.matmul %160, %155, %cst_71 {dimension_numbers = #tpu.dot_dimension_numbers<[1], [0], [0], [1], [0, 0, 1, 1], [], []>} : vector<24x16xf32>, vector<16x16xf32>, vector<24x16xf32> -> vector<24x16xf32>
    %162 = vector.broadcast %157 : vector<1x16xf32> to vector<24x16xf32>
    %163 = arith.addf %161, %162 : vector<24x16xf32>
    %164 = math.tanh %163 : vector<24x16xf32>
    %165 = vector.extract_strided_slice %164 {offsets = [0, 0], sizes = [8, 16], strides = [1, 1]} : vector<24x16xf32> to vector<8x16xf32>
    %cst_72 = arith.constant dense<0.000000e+00> : vector<16xf32>
    %166 = vector.multi_reduction <add>, %165, %cst_72 [0] : vector<8x16xf32> to vector<16xf32>
    %167 = vector.shape_cast %166 : vector<16xf32> to vector<1x16xf32>
    %cst_73 = arith.constant 8.000000e+00 : f32
    %168 = vector.broadcast %cst_73 : f32 to vector<1x16xf32>
    %169 = arith.divf %167, %168 : vector<1x16xf32>
    %170 = arith.mulf %159, %169 : vector<1x16xf32>
    %cst_74 = arith.constant dense<0.000000e+00> : vector<1xf32>
    %171 = vector.multi_reduction <add>, %170, %cst_74 [1] : vector<1x16xf32> to vector<1xf32>
    %172 = vector.shape_cast %171 : vector<1xf32> to vector<1x1xf32>
    %173 = vector.extract_strided_slice %164 {offsets = [8, 0], sizes = [8, 16], strides = [1, 1]} : vector<24x16xf32> to vector<8x16xf32>
    %cst_75 = arith.constant dense<0.000000e+00> : vector<16xf32>
    %174 = vector.multi_reduction <add>, %173, %cst_75 [0] : vector<8x16xf32> to vector<16xf32>
    %175 = vector.shape_cast %174 : vector<16xf32> to vector<1x16xf32>
    %cst_76 = arith.constant 8.000000e+00 : f32
    %176 = vector.broadcast %cst_76 : f32 to vector<1x16xf32>
    %177 = arith.divf %175, %176 : vector<1x16xf32>
    %178 = arith.mulf %159, %177 : vector<1x16xf32>
    %cst_77 = arith.constant dense<0.000000e+00> : vector<1xf32>
    %179 = vector.multi_reduction <add>, %178, %cst_77 [1] : vector<1x16xf32> to vector<1xf32>
    %180 = vector.shape_cast %179 : vector<1xf32> to vector<1x1xf32>
    %181 = vector.extract_strided_slice %164 {offsets = [16, 0], sizes = [8, 16], strides = [1, 1]} : vector<24x16xf32> to vector<8x16xf32>
    %cst_78 = arith.constant dense<0.000000e+00> : vector<16xf32>
    %182 = vector.multi_reduction <add>, %181, %cst_78 [0] : vector<8x16xf32> to vector<16xf32>
    %183 = vector.shape_cast %182 : vector<16xf32> to vector<1x16xf32>
    %cst_79 = arith.constant 8.000000e+00 : f32
    %184 = vector.broadcast %cst_79 : f32 to vector<1x16xf32>
    %185 = arith.divf %183, %184 : vector<1x16xf32>
    %186 = arith.mulf %159, %185 : vector<1x16xf32>
    %cst_80 = arith.constant dense<0.000000e+00> : vector<1xf32>
    %187 = vector.multi_reduction <add>, %186, %cst_80 [1] : vector<1x16xf32> to vector<1xf32>
    %188 = vector.shape_cast %187 : vector<1xf32> to vector<1x1xf32>
    %189 = arith.maximumf %172, %180 : vector<1x1xf32>
    %190 = arith.maximumf %189, %188 : vector<1x1xf32>
    %191 = arith.subf %172, %190 : vector<1x1xf32>
    %192 = math.exp %191 : vector<1x1xf32>
    %193 = arith.subf %180, %190 : vector<1x1xf32>
    %194 = math.exp %193 : vector<1x1xf32>
    %195 = arith.subf %188, %190 : vector<1x1xf32>
    %196 = math.exp %195 : vector<1x1xf32>
    %197 = arith.addf %192, %194 : vector<1x1xf32>
    %198 = arith.addf %197, %196 : vector<1x1xf32>
    %cst_81 = arith.constant 0.000000e+00 : f32
    %199 = vector.broadcast %cst_81 : f32 to vector<8x16xf32>
    %200 = arith.divf %192, %198 : vector<1x1xf32>
    %201 = vector.broadcast %200 : vector<1x1xf32> to vector<8x16xf32>
    %202 = arith.mulf %151, %201 : vector<8x16xf32>
    %203 = arith.addf %199, %202 : vector<8x16xf32>
    %204 = arith.divf %194, %198 : vector<1x1xf32>
    %205 = vector.broadcast %204 : vector<1x1xf32> to vector<8x16xf32>
    %206 = arith.mulf %152, %205 : vector<8x16xf32>
    %207 = arith.addf %203, %206 : vector<8x16xf32>
    %208 = arith.divf %196, %198 : vector<1x1xf32>
    %209 = vector.broadcast %208 : vector<1x1xf32> to vector<8x16xf32>
    %210 = arith.mulf %153, %209 : vector<8x16xf32>
    %211 = arith.addf %207, %210 : vector<8x16xf32>
    %212 = vector.extract_strided_slice %31 {offsets = [0, 0], sizes = [16, 16], strides = [1, 1]} : vector<32x16xf32> to vector<16x16xf32>
    %213 = vector.extract_strided_slice %46 {offsets = [0, 0], sizes = [16, 16], strides = [1, 1]} : vector<32x16xf32> to vector<16x16xf32>
    %214 = vector.extract_strided_slice %61 {offsets = [0, 0], sizes = [16, 16], strides = [1, 1]} : vector<24x16xf32> to vector<16x16xf32>
    %c3 = arith.constant 3 : index
    %c0_82 = arith.constant 0 : index
    %c0_83 = arith.constant 0 : index
    %215 = vector.load %arg10[%c3, %c0_82, %c0_83] : memref<4x16x16xf32, #tpu.memory_space<vmem>>, vector<1x16x16xf32>
    %216 = vector.shape_cast %215 : vector<1x16x16xf32> to vector<16x16xf32>
    %c3_84 = arith.constant 3 : index
    %c0_85 = arith.constant 0 : index
    %c0_86 = arith.constant 0 : index
    %217 = vector.load %arg11[%c3_84, %c0_85, %c0_86] : memref<4x1x16xf32, #tpu.memory_space<vmem>>, vector<1x1x16xf32>
    %218 = vector.shape_cast %217 : vector<1x1x16xf32> to vector<1x16xf32>
    %c3_87 = arith.constant 3 : index
    %c0_88 = arith.constant 0 : index
    %c0_89 = arith.constant 0 : index
    %219 = vector.load %arg12[%c3_87, %c0_88, %c0_89] : memref<4x1x16xf32, #tpu.memory_space<vmem>>, vector<1x1x16xf32>
    %220 = vector.shape_cast %219 : vector<1x1x16xf32> to vector<1x16xf32>
    %221 = tpu.concatenate %212, %213, %214 in 0 : vector<16x16xf32>, vector<16x16xf32>, vector<16x16xf32> -> vector<48x16xf32>
    %cst_90 = arith.constant dense<0.000000e+00> : vector<48x16xf32>
    %222 = tpu.matmul %221, %216, %cst_90 {dimension_numbers = #tpu.dot_dimension_numbers<[1], [0], [0], [1], [0, 0, 1, 1], [], []>} : vector<48x16xf32>, vector<16x16xf32>, vector<48x16xf32> -> vector<48x16xf32>
    %223 = vector.broadcast %218 : vector<1x16xf32> to vector<48x16xf32>
    %224 = arith.addf %222, %223 : vector<48x16xf32>
    %225 = math.tanh %224 : vector<48x16xf32>
    %226 = vector.extract_strided_slice %225 {offsets = [0, 0], sizes = [16, 16], strides = [1, 1]} : vector<48x16xf32> to vector<16x16xf32>
    %cst_91 = arith.constant dense<0.000000e+00> : vector<16xf32>
    %227 = vector.multi_reduction <add>, %226, %cst_91 [0] : vector<16x16xf32> to vector<16xf32>
    %228 = vector.shape_cast %227 : vector<16xf32> to vector<1x16xf32>
    %cst_92 = arith.constant 1.600000e+01 : f32
    %229 = vector.broadcast %cst_92 : f32 to vector<1x16xf32>
    %230 = arith.divf %228, %229 : vector<1x16xf32>
    %231 = arith.mulf %220, %230 : vector<1x16xf32>
    %cst_93 = arith.constant dense<0.000000e+00> : vector<1xf32>
    %232 = vector.multi_reduction <add>, %231, %cst_93 [1] : vector<1x16xf32> to vector<1xf32>
    %233 = vector.shape_cast %232 : vector<1xf32> to vector<1x1xf32>
    %234 = vector.extract_strided_slice %225 {offsets = [16, 0], sizes = [16, 16], strides = [1, 1]} : vector<48x16xf32> to vector<16x16xf32>
    %cst_94 = arith.constant dense<0.000000e+00> : vector<16xf32>
    %235 = vector.multi_reduction <add>, %234, %cst_94 [0] : vector<16x16xf32> to vector<16xf32>
    %236 = vector.shape_cast %235 : vector<16xf32> to vector<1x16xf32>
    %cst_95 = arith.constant 1.600000e+01 : f32
    %237 = vector.broadcast %cst_95 : f32 to vector<1x16xf32>
    %238 = arith.divf %236, %237 : vector<1x16xf32>
    %239 = arith.mulf %220, %238 : vector<1x16xf32>
    %cst_96 = arith.constant dense<0.000000e+00> : vector<1xf32>
    %240 = vector.multi_reduction <add>, %239, %cst_96 [1] : vector<1x16xf32> to vector<1xf32>
    %241 = vector.shape_cast %240 : vector<1xf32> to vector<1x1xf32>
    %242 = vector.extract_strided_slice %225 {offsets = [32, 0], sizes = [16, 16], strides = [1, 1]} : vector<48x16xf32> to vector<16x16xf32>
    %cst_97 = arith.constant dense<0.000000e+00> : vector<16xf32>
    %243 = vector.multi_reduction <add>, %242, %cst_97 [0] : vector<16x16xf32> to vector<16xf32>
    %244 = vector.shape_cast %243 : vector<16xf32> to vector<1x16xf32>
    %cst_98 = arith.constant 1.600000e+01 : f32
    %245 = vector.broadcast %cst_98 : f32 to vector<1x16xf32>
    %246 = arith.divf %244, %245 : vector<1x16xf32>
    %247 = arith.mulf %220, %246 : vector<1x16xf32>
    %cst_99 = arith.constant dense<0.000000e+00> : vector<1xf32>
    %248 = vector.multi_reduction <add>, %247, %cst_99 [1] : vector<1x16xf32> to vector<1xf32>
    %249 = vector.shape_cast %248 : vector<1xf32> to vector<1x1xf32>
    %250 = arith.maximumf %233, %241 : vector<1x1xf32>
    %251 = arith.maximumf %250, %249 : vector<1x1xf32>
    %252 = arith.subf %233, %251 : vector<1x1xf32>
    %253 = math.exp %252 : vector<1x1xf32>
    %254 = arith.subf %241, %251 : vector<1x1xf32>
    %255 = math.exp %254 : vector<1x1xf32>
    %256 = arith.subf %249, %251 : vector<1x1xf32>
    %257 = math.exp %256 : vector<1x1xf32>
    %258 = arith.addf %253, %255 : vector<1x1xf32>
    %259 = arith.addf %258, %257 : vector<1x1xf32>
    %cst_100 = arith.constant 0.000000e+00 : f32
    %260 = vector.broadcast %cst_100 : f32 to vector<16x16xf32>
    %261 = arith.divf %253, %259 : vector<1x1xf32>
    %262 = vector.broadcast %261 : vector<1x1xf32> to vector<16x16xf32>
    %263 = arith.mulf %212, %262 : vector<16x16xf32>
    %264 = arith.addf %260, %263 : vector<16x16xf32>
    %265 = arith.divf %255, %259 : vector<1x1xf32>
    %266 = vector.broadcast %265 : vector<1x1xf32> to vector<16x16xf32>
    %267 = arith.mulf %213, %266 : vector<16x16xf32>
    %268 = arith.addf %264, %267 : vector<16x16xf32>
    %269 = arith.divf %257, %259 : vector<1x1xf32>
    %270 = vector.broadcast %269 : vector<1x1xf32> to vector<16x16xf32>
    %271 = arith.mulf %214, %270 : vector<16x16xf32>
    %272 = arith.addf %268, %271 : vector<16x16xf32>
    %c0_101 = arith.constant 0 : index
    %c0_102 = arith.constant 0 : index
    %273 = vector.load %arg8[%c0_101, %c0_102] : memref<32x32xbf16, #tpu.memory_space<vmem>>, vector<32x32xbf16>
    %274 = tpu.concatenate %272, %150 in 0 : vector<16x16xf32>, vector<16x16xf32> -> vector<32x16xf32>
    %275 = arith.truncf %274 : vector<32x16xf32> to vector<32x16xbf16>
    %cst_103 = arith.constant dense<0.000000e+00> : vector<32x16xf32>
    %276 = tpu.matmul %273, %275, %cst_103 {dimension_numbers = #tpu.dot_dimension_numbers<[1], [0], [0], [1], [0, 0, 1, 1], [], []>} : vector<32x32xbf16>, vector<32x16xbf16>, vector<32x16xf32> -> vector<32x16xf32>
    %277 = arith.addf %274, %276 : vector<32x16xf32>
    %278 = arith.truncf %276 : vector<32x16xf32> to vector<32x16xbf16>
    %cst_104 = arith.constant dense<0.000000e+00> : vector<32x16xf32>
    %279 = tpu.matmul %273, %278, %cst_104 {dimension_numbers = #tpu.dot_dimension_numbers<[1], [0], [0], [1], [0, 0, 1, 1], [], []>} : vector<32x32xbf16>, vector<32x16xbf16>, vector<32x16xf32> -> vector<32x16xf32>
    %280 = arith.addf %277, %279 : vector<32x16xf32>
    %281 = arith.truncf %279 : vector<32x16xf32> to vector<32x16xbf16>
    %cst_105 = arith.constant dense<0.000000e+00> : vector<32x16xf32>
    %282 = tpu.matmul %273, %281, %cst_105 {dimension_numbers = #tpu.dot_dimension_numbers<[1], [0], [0], [1], [0, 0, 1, 1], [], []>} : vector<32x32xbf16>, vector<32x16xbf16>, vector<32x16xf32> -> vector<32x16xf32>
    %283 = arith.addf %280, %282 : vector<32x16xf32>
    %cst_106 = arith.constant 2.500000e-01 : f32
    %284 = vector.broadcast %cst_106 : f32 to vector<32x16xf32>
    %285 = arith.mulf %283, %284 : vector<32x16xf32>
    %c0_107 = arith.constant 0 : index
    %c0_108 = arith.constant 0 : index
    %286 = vector.load %arg27[%c0_107, %c0_108] : memref<32x16xf32, #tpu.memory_space<vmem>>, vector<32x16xf32>
    tpu.vector_store %arg27[%c0_107, %c0_108], %285 {strides = array<i32>} : memref<32x16xf32, #tpu.memory_space<vmem>>, vector<32x16xf32>,
    %c0_109 = arith.constant 0 : index
    %287 = memref.load %arg24[%c0_109] : memref<4xi32, #tpu.memory_space<smem>>
    %c0_110 = arith.constant 0 : index
    %288 = memref.load %arg25[%c0_110] : memref<4xi32, #tpu.memory_space<smem>>
    %289 = arith.index_cast %287 : i32 to index
    %c0_111 = arith.constant 0 : index
    %290 = vector.load %arg27[%289, %c0_111] : memref<32x16xf32, #tpu.memory_space<vmem>>, vector<1x16xf32>
    %c16_i32 = arith.constant 16 : i32
    %291 = arith.addi %c16_i32, %288 : i32
    %292 = arith.index_cast %291 : i32 to index
    %c0_112 = arith.constant 0 : index
    %293 = vector.load %arg27[%292, %c0_112] : memref<32x16xf32, #tpu.memory_space<vmem>>, vector<1x16xf32>
    %294 = arith.index_cast %288 : i32 to index
    %c0_113 = arith.constant 0 : index
    %295 = vector.load %arg9[%294, %c0_113] : memref<16x1xf32, #tpu.memory_space<vmem>>, vector<1x1xf32>
    %c1_114 = arith.constant 1 : index
    %296 = memref.load %arg24[%c1_114] : memref<4xi32, #tpu.memory_space<smem>>
    %c1_115 = arith.constant 1 : index
    %297 = memref.load %arg25[%c1_115] : memref<4xi32, #tpu.memory_space<smem>>
    %298 = arith.index_cast %296 : i32 to index
    %c0_116 = arith.constant 0 : index
    %299 = vector.load %arg27[%298, %c0_116] : memref<32x16xf32, #tpu.memory_space<vmem>>, vector<1x16xf32>
    %c16_i32_117 = arith.constant 16 : i32
    %300 = arith.addi %c16_i32_117, %297 : i32
    %301 = arith.index_cast %300 : i32 to index
    %c0_118 = arith.constant 0 : index
    %302 = vector.load %arg27[%301, %c0_118] : memref<32x16xf32, #tpu.memory_space<vmem>>, vector<1x16xf32>
    %303 = arith.index_cast %297 : i32 to index
    %c0_119 = arith.constant 0 : index
    %304 = vector.load %arg9[%303, %c0_119] : memref<16x1xf32, #tpu.memory_space<vmem>>, vector<1x1xf32>
    %c2_120 = arith.constant 2 : index
    %305 = memref.load %arg24[%c2_120] : memref<4xi32, #tpu.memory_space<smem>>
    %c2_121 = arith.constant 2 : index
    %306 = memref.load %arg25[%c2_121] : memref<4xi32, #tpu.memory_space<smem>>
    %307 = arith.index_cast %305 : i32 to index
    %c0_122 = arith.constant 0 : index
    %308 = vector.load %arg27[%307, %c0_122] : memref<32x16xf32, #tpu.memory_space<vmem>>, vector<1x16xf32>
    %c16_i32_123 = arith.constant 16 : i32
    %309 = arith.addi %c16_i32_123, %306 : i32
    %310 = arith.index_cast %309 : i32 to index
    %c0_124 = arith.constant 0 : index
    %311 = vector.load %arg27[%310, %c0_124] : memref<32x16xf32, #tpu.memory_space<vmem>>, vector<1x16xf32>
    %312 = arith.index_cast %306 : i32 to index
    %c0_125 = arith.constant 0 : index
    %313 = vector.load %arg9[%312, %c0_125] : memref<16x1xf32, #tpu.memory_space<vmem>>, vector<1x1xf32>
    %c3_126 = arith.constant 3 : index
    %314 = memref.load %arg24[%c3_126] : memref<4xi32, #tpu.memory_space<smem>>
    %c3_127 = arith.constant 3 : index
    %315 = memref.load %arg25[%c3_127] : memref<4xi32, #tpu.memory_space<smem>>
    %316 = arith.index_cast %314 : i32 to index
    %c0_128 = arith.constant 0 : index
    %317 = vector.load %arg27[%316, %c0_128] : memref<32x16xf32, #tpu.memory_space<vmem>>, vector<1x16xf32>
    %c16_i32_129 = arith.constant 16 : i32
    %318 = arith.addi %c16_i32_129, %315 : i32
    %319 = arith.index_cast %318 : i32 to index
    %c0_130 = arith.constant 0 : index
    %320 = vector.load %arg27[%319, %c0_130] : memref<32x16xf32, #tpu.memory_space<vmem>>, vector<1x16xf32>
    %321 = arith.index_cast %315 : i32 to index
    %c0_131 = arith.constant 0 : index
    %322 = vector.load %arg9[%321, %c0_131] : memref<16x1xf32, #tpu.memory_space<vmem>>, vector<1x1xf32>
    %323 = tpu.concatenate %290, %299, %308, %317 in 0 : vector<1x16xf32>, vector<1x16xf32>, vector<1x16xf32>, vector<1x16xf32> -> vector<4x16xf32>
    %324 = tpu.concatenate %293, %302, %311, %320 in 0 : vector<1x16xf32>, vector<1x16xf32>, vector<1x16xf32>, vector<1x16xf32> -> vector<4x16xf32>
    %325 = tpu.concatenate %295, %304, %313, %322 in 0 : vector<1x1xf32>, vector<1x1xf32>, vector<1x1xf32>, vector<1x1xf32> -> vector<4x1xf32>
    %326 = arith.negf %325 : vector<4x1xf32>
    %327 = math.exp %326 : vector<4x1xf32>
    %cst_132 = arith.constant 1.000000e+00 : f32
    %328 = vector.broadcast %cst_132 : f32 to vector<4x1xf32>
    %329 = arith.addf %328, %327 : vector<4x1xf32>
    %330 = arith.divf %328, %329 : vector<4x1xf32>
    %c0_133 = arith.constant 0 : index
    %c0_134 = arith.constant 0 : index
    %c0_135 = arith.constant 0 : index
    %331 = vector.load %arg13[%c0_133, %c0_134, %c0_135] : memref<3x16x8xf32, #tpu.memory_space<vmem>>, vector<1x16x8xf32>
    %332 = vector.shape_cast %331 : vector<1x16x8xf32> to vector<16x8xf32>
    %cst_136 = arith.constant dense<0.000000e+00> : vector<4x8xf32>
    %333 = tpu.matmul %323, %332, %cst_136 {dimension_numbers = #tpu.dot_dimension_numbers<[1], [0], [0], [1], [0, 0, 1, 1], [], []>} : vector<4x16xf32>, vector<16x8xf32>, vector<4x8xf32> -> vector<4x8xf32>
    %c0_137 = arith.constant 0 : index
    %c0_138 = arith.constant 0 : index
    %c0_139 = arith.constant 0 : index
    %334 = vector.load %arg14[%c0_137, %c0_138, %c0_139] : memref<3x1x8xf32, #tpu.memory_space<vmem>>, vector<1x1x8xf32>
    %335 = vector.shape_cast %334 : vector<1x1x8xf32> to vector<1x8xf32>
    %336 = vector.broadcast %335 : vector<1x8xf32> to vector<4x8xf32>
    %337 = arith.addf %333, %336 : vector<4x8xf32>
    %c1_140 = arith.constant 1 : index
    %c0_141 = arith.constant 0 : index
    %c0_142 = arith.constant 0 : index
    %338 = vector.load %arg13[%c1_140, %c0_141, %c0_142] : memref<3x16x8xf32, #tpu.memory_space<vmem>>, vector<1x16x8xf32>
    %339 = vector.shape_cast %338 : vector<1x16x8xf32> to vector<16x8xf32>
    %cst_143 = arith.constant dense<0.000000e+00> : vector<4x8xf32>
    %340 = tpu.matmul %324, %339, %cst_143 {dimension_numbers = #tpu.dot_dimension_numbers<[1], [0], [0], [1], [0, 0, 1, 1], [], []>} : vector<4x16xf32>, vector<16x8xf32>, vector<4x8xf32> -> vector<4x8xf32>
    %c1_144 = arith.constant 1 : index
    %c0_145 = arith.constant 0 : index
    %c0_146 = arith.constant 0 : index
    %341 = vector.load %arg14[%c1_144, %c0_145, %c0_146] : memref<3x1x8xf32, #tpu.memory_space<vmem>>, vector<1x1x8xf32>
    %342 = vector.shape_cast %341 : vector<1x1x8xf32> to vector<1x8xf32>
    %343 = vector.broadcast %342 : vector<1x8xf32> to vector<4x8xf32>
    %344 = arith.addf %340, %343 : vector<4x8xf32>
    %c2_147 = arith.constant 2 : index
    %c0_148 = arith.constant 0 : index
    %c0_149 = arith.constant 0 : index
    %345 = vector.load %arg13[%c2_147, %c0_148, %c0_149] : memref<3x16x8xf32, #tpu.memory_space<vmem>>, vector<1x16x8xf32>
    %346 = vector.shape_cast %345 : vector<1x16x8xf32> to vector<16x8xf32>
    %cst_150 = arith.constant dense<0.000000e+00> : vector<8x8xf32>
    %347 = tpu.matmul %211, %346, %cst_150 {dimension_numbers = #tpu.dot_dimension_numbers<[1], [0], [0], [1], [0, 0, 1, 1], [], []>} : vector<8x16xf32>, vector<16x8xf32>, vector<8x8xf32> -> vector<8x8xf32>
    %c2_151 = arith.constant 2 : index
    %c0_152 = arith.constant 0 : index
    %c0_153 = arith.constant 0 : index
    %348 = vector.load %arg14[%c2_151, %c0_152, %c0_153] : memref<3x1x8xf32, #tpu.memory_space<vmem>>, vector<1x1x8xf32>
    %349 = vector.shape_cast %348 : vector<1x1x8xf32> to vector<1x8xf32>
    %350 = vector.broadcast %349 : vector<1x8xf32> to vector<8x8xf32>
    %351 = arith.addf %347, %350 : vector<8x8xf32>
    %c0_154 = arith.constant 0 : index
    %c0_155 = arith.constant 0 : index
    %352 = vector.load %arg23[%c0_154, %c0_155] : memref<4x8xf32, #tpu.memory_space<vmem>>, vector<4x8xf32>
    %cst_156 = arith.constant dense<0.000000e+00> : vector<4xf32>
    %353 = vector.multi_reduction <add>, %352, %cst_156 [1] : vector<4x8xf32> to vector<4xf32>
    %354 = vector.shape_cast %353 : vector<4xf32> to vector<4x1xf32>
    %cst_157 = arith.constant 1.000000e+00 : f32
    %355 = vector.broadcast %cst_157 : f32 to vector<4x1xf32>
    %356 = arith.maximumf %354, %355 : vector<4x1xf32>
    %cst_158 = arith.constant dense<0.000000e+00> : vector<4x8xf32>
    %357 = tpu.matmul %352, %351, %cst_158 {dimension_numbers = #tpu.dot_dimension_numbers<[1], [0], [0], [1], [0, 0, 1, 1], [], []>} : vector<4x8xf32>, vector<8x8xf32>, vector<4x8xf32> -> vector<4x8xf32>
    %358 = vector.broadcast %356 : vector<4x1xf32> to vector<4x8xf32>
    %359 = arith.divf %357, %358 : vector<4x8xf32>
    %360 = arith.mulf %337, %359 : vector<4x8xf32>
    %361 = arith.negf %360 : vector<4x8xf32>
    %362 = math.exp %361 : vector<4x8xf32>
    %cst_159 = arith.constant 1.000000e+00 : f32
    %363 = vector.broadcast %cst_159 : f32 to vector<4x8xf32>
    %364 = arith.addf %363, %362 : vector<4x8xf32>
    %365 = arith.divf %363, %364 : vector<4x8xf32>
    %366 = arith.mulf %344, %359 : vector<4x8xf32>
    %367 = arith.negf %366 : vector<4x8xf32>
    %368 = math.exp %367 : vector<4x8xf32>
    %cst_160 = arith.constant 1.000000e+00 : f32
    %369 = vector.broadcast %cst_160 : f32 to vector<4x8xf32>
    %370 = arith.addf %369, %368 : vector<4x8xf32>
    %371 = arith.divf %369, %370 : vector<4x8xf32>
    %372 = arith.subf %365, %371 : vector<4x8xf32>
    %373 = vector.broadcast %330 : vector<4x1xf32> to vector<4x8xf32>
    %374 = arith.mulf %373, %372 : vector<4x8xf32>
    %375 = arith.mulf %374, %352 : vector<4x8xf32>
    %376 = tpu.transpose %375, [1, 0] : vector<4x8xf32> -> vector<8x4xf32>
    %c0_161 = arith.constant 0 : index
    %c0_162 = arith.constant 0 : index
    %377 = vector.load %arg15[%c0_161, %c0_162] : memref<32x8xf32, #tpu.memory_space<vmem>>, vector<32x8xf32>
    %c0_163 = arith.constant 0 : index
    %c0_164 = arith.constant 0 : index
    %378 = vector.load %arg16[%c0_163, %c0_164] : memref<32x1xf32, #tpu.memory_space<vmem>>, vector<32x1xf32>
    %cst_165 = arith.constant dense<0.000000e+00> : vector<32x4xf32>
    %379 = tpu.matmul %377, %376, %cst_165 {dimension_numbers = #tpu.dot_dimension_numbers<[1], [0], [0], [1], [0, 0, 1, 1], [], []>} : vector<32x8xf32>, vector<8x4xf32>, vector<32x4xf32> -> vector<32x4xf32>
    %380 = vector.broadcast %378 : vector<32x1xf32> to vector<32x4xf32>
    %381 = arith.addf %379, %380 : vector<32x4xf32>
    %382 = math.tanh %381 : vector<32x4xf32>
    %c0_166 = arith.constant 0 : index
    %c0_167 = arith.constant 0 : index
    %383 = vector.load %arg17[%c0_166, %c0_167] : memref<16x32xf32, #tpu.memory_space<vmem>>, vector<16x32xf32>
    %c0_168 = arith.constant 0 : index
    %c0_169 = arith.constant 0 : index
    %384 = vector.load %arg18[%c0_168, %c0_169] : memref<16x1xf32, #tpu.memory_space<vmem>>, vector<16x1xf32>
    %cst_170 = arith.constant dense<0.000000e+00> : vector<16x4xf32>
    %385 = tpu.matmul %383, %382, %cst_170 {dimension_numbers = #tpu.dot_dimension_numbers<[1], [0], [0], [1], [0, 0, 1, 1], [], []>} : vector<16x32xf32>, vector<32x4xf32>, vector<16x4xf32> -> vector<16x4xf32>
    %386 = vector.broadcast %384 : vector<16x1xf32> to vector<16x4xf32>
    %387 = arith.addf %385, %386 : vector<16x4xf32>
    %388 = math.tanh %387 : vector<16x4xf32>
    %c0_171 = arith.constant 0 : index
    %c0_172 = arith.constant 0 : index
    %389 = vector.load %arg19[%c0_171, %c0_172] : memref<8x16xf32, #tpu.memory_space<vmem>>, vector<8x16xf32>
    %c0_173 = arith.constant 0 : index
    %c0_174 = arith.constant 0 : index
    %390 = vector.load %arg20[%c0_173, %c0_174] : memref<8x1xf32, #tpu.memory_space<vmem>>, vector<8x1xf32>
    %cst_175 = arith.constant dense<0.000000e+00> : vector<8x4xf32>
    %391 = tpu.matmul %389, %388, %cst_175 {dimension_numbers = #tpu.dot_dimension_numbers<[1], [0], [0], [1], [0, 0, 1, 1], [], []>} : vector<8x16xf32>, vector<16x4xf32>, vector<8x4xf32> -> vector<8x4xf32>
    %392 = vector.broadcast %390 : vector<8x1xf32> to vector<8x4xf32>
    %393 = arith.addf %391, %392 : vector<8x4xf32>
    %394 = math.tanh %393 : vector<8x4xf32>
    %c0_176 = arith.constant 0 : index
    %c0_177 = arith.constant 0 : index
    %395 = vector.load %arg21[%c0_176, %c0_177] : memref<1x8xf32, #tpu.memory_space<vmem>>, vector<1x8xf32>
    %c0_178 = arith.constant 0 : index
    %c0_179 = arith.constant 0 : index
    %396 = vector.load %arg22[%c0_178, %c0_179] : memref<1x1xf32, #tpu.memory_space<vmem>>, vector<1x1xf32>
    %cst_180 = arith.constant dense<0.000000e+00> : vector<1x4xf32>
    %397 = tpu.matmul %395, %394, %cst_180 {dimension_numbers = #tpu.dot_dimension_numbers<[1], [0], [0], [1], [0, 0, 1, 1], [], []>} : vector<1x8xf32>, vector<8x4xf32>, vector<1x4xf32> -> vector<1x4xf32>
    %398 = vector.broadcast %396 : vector<1x1xf32> to vector<1x4xf32>
    %399 = arith.addf %397, %398 : vector<1x4xf32>
    %400 = arith.negf %399 : vector<1x4xf32>
    %401 = math.exp %400 : vector<1x4xf32>
    %cst_181 = arith.constant 1.000000e+00 : f32
    %402 = vector.broadcast %cst_181 : f32 to vector<1x4xf32>
    %403 = arith.addf %402, %401 : vector<1x4xf32>
    %404 = arith.divf %402, %403 : vector<1x4xf32>
    %c0_182 = arith.constant 0 : index
    %c0_183 = arith.constant 0 : index
    %405 = vector.load %arg26[%c0_182, %c0_183] : memref<1x4xf32, #tpu.memory_space<vmem>>, vector<1x4xf32>
    tpu.vector_store %arg26[%c0_182, %c0_183], %404 {strides = array<i32>} : memref<1x4xf32, #tpu.memory_space<vmem>>, vector<1x4xf32>,
    return
  }
}

</mosaic_0001>

<bundles_post_ra>
// kernel: tpu_custom_call.1
= control target key start
LH: loop header
LB: loop body
LE: loop exit
PB: predicated region body
PF: predicated region fallthrough
CT: control target
= control target key end

     0   :  { %s5131_s0 = inlined_call_operand.hbm [shape: bf16[24,32], index: 0, kind: input, shape index: {}]   ;;  %s5132_s1 = inlined_call_operand.hbm [shape: bf16[32,16], index: 1, kind: input, shape index: {}]   ;;  %s5133_s2 = inlined_call_operand.hbm [shape: bf16[32,16], index: 2, kind: input, shape index: {}]   ;;  %s5134_s3 = inlined_call_operand.hbm [shape: bf16[24,16], index: 3, kind: input, shape index: {}]   ;;  %s5135_s4 = inlined_call_operand.hbm [shape: bf16[24,24], index: 4, kind: input, shape index: {}]   ;;  %s5136_s5 = inlined_call_operand.hbm [shape: bf16[32,32], index: 5, kind: input, shape index: {}]   ;;  %s5137_s6 = inlined_call_operand.hbm [shape: bf16[32,32], index: 6, kind: input, shape index: {}]   ;;  %s5138_s7 = inlined_call_operand.hbm [shape: bf16[24,24], index: 7, kind: input, shape index: {}]   ;;  %s5139_s8 = inlined_call_operand.hbm [shape: bf16[32,32], index: 8, kind: input, shape index: {}]   ;;  %s5140_s9 = inlined_call_operand.hbm [shape: f32[16,1], index: 9, kind: input, shape index: {}]   ;;  %s5141_s10 = inlined_call_operand.hbm [shape: f32[4,16,16], index: 10, kind: input, shape index: {}]   ;;  %s5142_s11 = inlined_call_operand.hbm [shape: f32[4,1,16], index: 11, kind: input, shape index: {}]   ;;  %s5143_s12 = inlined_call_operand.hbm [shape: f32[4,1,16], index: 12, kind: input, shape index: {}]   ;;  %s5144_s13 = inlined_call_operand.hbm [shape: f32[3,16,8], index: 13, kind: input, shape index: {}]   ;;  %s5145_s14 = inlined_call_operand.hbm [shape: f32[3,1,8], index: 14, kind: input, shape index: {}]   ;;  %s5146_s15 = inlined_call_operand.hbm [shape: f32[32,8], index: 15, kind: input, shape index: {}]   ;;  %s5147_s16 = inlined_call_operand.hbm [shape: f32[32,1], index: 16, kind: input, shape index: {}]   ;;  %s5148_s17 = inlined_call_operand.hbm [shape: f32[16,32], index: 17, kind: input, shape index: {}]   ;;  %s5149_s18 = inlined_call_operand.hbm [shape: f32[16,1], index: 18, kind: input, shape index: {}]   ;;  %s5150_s19 = inlined_call_operand.hbm [shape: f32[8,16], index: 19, kind: input, shape index: {}]   ;;  %s5151_s20 = inlined_call_operand.hbm [shape: f32[8,1], index: 20, kind: input, shape index: {}]   ;;  %s5152_s21 = inlined_call_operand.hbm [shape: f32[1,8], index: 21, kind: input, shape index: {}]   ;;  %s5153_s22 = inlined_call_operand.<no memory space> [shape: f32[1,1], index: 22, kind: input, shape index: {}]   ;;  %s5154_s23 = inlined_call_operand.hbm [shape: f32[4,8], index: 23, kind: input, shape index: {}]   ;;  %s5155_s24 = inlined_call_operand.hbm [shape: s32[4], index: 24, kind: input, shape index: {}]   ;;  %s5156_s25 = inlined_call_operand.hbm [shape: s32[4], index: 25, kind: input, shape index: {}]   ;;  %s5157_s26 = inlined_call_operand.hbm [shape: f32[1,4], index: 26, kind: output, shape index: {}]  }
   0x1   :  { %5175 = sst [smem:[#allocation60_spill]] %s5131_s0  ;;  %v31_v0 = vstv %s5153_s22 }
   0x2   :  { %5176 = sst [smem:[#allocation61_spill]] %s5132_s1  ;;  %32 = vst [vmem:[#allocation3] sm:$0x1] %v31_v0 }
   0x3   :  { %5177 = sst [smem:[#allocation62_spill]] %s5133_s2 }
   0x4   :  { %5178 = sst [smem:[#allocation63_spill]] %s5134_s3 }
   0x5   :  { %5179 = sst [smem:[#allocation64_spill]] %s5135_s4 }
   0x6   :  { %5180 = sst [smem:[#allocation65_spill]] %s5136_s5 }
   0x7   :  { %5181 = sst [smem:[#allocation66_spill]] %s5137_s6 }
   0x8   :  { %5182 = sst [smem:[#allocation67_spill]] %s5138_s7 }
   0x9   :  { %5183 = sst [smem:[#allocation68_spill]] %s5139_s8 }
   0xa   :  { %5184 = sst [smem:[#allocation69_spill]] %s5140_s9 }
   0xb   :  { %5185 = sst [smem:[#allocation70_spill]] %s5141_s10 }
   0xc   :  { %5186 = sst [smem:[#allocation71_spill]] %s5156_s25 }
   0xd   :  { %5187 = sst [smem:[#allocation72_spill]] %s5157_s26 }
   0xe   :  { %33 = vsyncpa [#allocation5], 0 }
   0xf   :  { %34 = vsyncpa [#allocation9], 0 }
  0x10   :  { %35 = vsyncpa [#allocation12], 0 }
  0x11   :  { %36 = vsyncpa [#allocation15], 0 }
  0x12   :  { %37 = vsyncpa [#allocation18], 0 }
  0x13   :  { %38 = vsyncpa [#allocation21], 0 }
  0x14   :  { %39 = vsyncpa [#allocation24], 0 }
  0x15   :  { %40 = vsyncpa [#allocation27], 0 }
  0x16   :  { %41 = vsyncpa [#allocation30], 0 }
  0x17   :  { %42 = vsyncpa [#allocation33], 0 }
  0x18   :  { %43 = vsyncpa [#allocation36], 0 }
  0x19   :  { %44 = vsyncpa [#allocation39], 0 }
  0x1a   :  { %45 = vsyncpa [#allocation7], 0 }
  0x1b   :  { %46 = vsyncpa [#allocation43], 0 }
  0x1c   :  { %47 = vsyncpa [#allocation6], 0  ;;  %s4025_s7 = smov [#allocation8]   ;;  %s4026_s8 = smov [#allocation11]  }
  0x1d   :  { %s65_s28 = sshll.u32 %s4025_s7, 4  ;;  %s89_s22 = sshll.u32 %s4026_s8, 4  ;;  %s66_s28 = int_to_ptr.vmem [resolvable:$true] %s65_s28  ;;  %s4200_s22 = int_to_ptr.vmem [resolvable:$true] %s89_s22 }
  0x1e   :  { %s5188_s0 = sld [smem:[#allocation61_spill]] }
  0x24   :  { %s3447_s9 = scalar_lea.hbm %s5188_s0, 256 }
  0x25   :  { %p3448_p0 = scmp.ne.s32.totalorder %s5188_s0, %s3447_s9  ;;  %p3451_p1 = scmp.lt.u32.totalorder %s3447_s9, %s5188_s0 }
  0x27   :  { %p3453_p2 = pnand %p3451_p1, %p3448_p0 }
  0x29   :  { %3456 = shalt.err (!%p3453_p2)
}
  0x2a   :  { %s3457_s6 = scalar_lea.vmem %s66_s28, 256  ;;  %p3462_p4 = scmp.lt.s32.totalorder %s66_s28, %s66_s28 }
  0x2b   :  { %p3458_p3 = scmp.ne.s32.totalorder %s66_s28, %s3457_s6  ;;  %p3463_p5 = scmp.lt.s32.totalorder %s3457_s6, %s3457_s6 }
  0x2d   :  { %p3464_p6 = por %p3463_p5, %p3462_p4 }
  0x2f   :  { %p3465_p7 = pnand %p3464_p6, %p3458_p3 }
  0x31   :  { %3468 = shalt.err (!%p3465_p7)
}
  0x32   :  { %s5171_s1 = smov 64   ;;  %s5173_s27 = smov 4  }
  0x33   :  { %71 = dma.hbm_to_vmem [thread:$0]  %s5188_s0, 256, %s66_s28, [#allocation9], %s5171_s1, %s5171_s1, %s5173_s27  }
  0x34   :  { %s5189_s29 = sld [smem:[#allocation63_spill]] }
  0x3a   :  { %s3469_s9 = scalar_lea.hbm %s5189_s29, 192 }
  0x3b   :  { %p3470_p8 = scmp.ne.s32.totalorder %s5189_s29, %s3469_s9  ;;  %p3473_p9 = scmp.lt.u32.totalorder %s3469_s9, %s5189_s29 }
  0x3d   :  { %p3475_p10 = pnand %p3473_p9, %p3470_p8 }
  0x3f   :  { %3478 = shalt.err (!%p3475_p10)
}
  0x40   :  { %s3479_s6 = scalar_lea.vmem %s4200_s22, 192  ;;  %p3484_p12 = scmp.lt.s32.totalorder %s4200_s22, %s4200_s22 }
  0x41   :  { %p3480_p11 = scmp.ne.s32.totalorder %s4200_s22, %s3479_s6  ;;  %p3485_p13 = scmp.lt.s32.totalorder %s3479_s6, %s3479_s6 }
  0x43   :  { %p3486_p0 = por %p3485_p13, %p3484_p12 }
  0x45   :  { %p3487_p1 = pnand %p3486_p0, %p3480_p11 }
  0x47   :  { %3490 = shalt.err (!%p3487_p1)
}
  0x48   :  { %95 = dma.hbm_to_vmem [thread:$0]  %s5189_s29, 192, %s4200_s22, [#allocation12], %s5171_s1, %s5171_s1, %s5173_s27  }
  0x49   :  { %s4029_s3 = smov [#allocation14]   ;;  %s4030_s8 = smov [#allocation17]  }
  0x4a   :  { %s113_s7 = sshll.u32 %s4029_s3, 4  ;;  %s137_s4 = sshll.u32 %s4030_s8, 4  ;;  %s114_s7 = int_to_ptr.vmem [resolvable:$true] %s113_s7  ;;  %s4237_s4 = int_to_ptr.vmem [resolvable:$true] %s137_s4 }
  0x4b   :  { %s5190_s2 = sld [smem:[#allocation65_spill]] }
  0x51   :  { %s3491_s5 = scalar_lea.hbm %s5190_s2, 256 }
  0x52   :  { %p3492_p2 = scmp.ne.s32.totalorder %s5190_s2, %s3491_s5  ;;  %p3495_p3 = scmp.lt.u32.totalorder %s3491_s5, %s5190_s2 }
  0x54   :  { %p3497_p4 = pnand %p3495_p3, %p3492_p2 }
  0x56   :  { %3500 = shalt.err (!%p3497_p4)
}
  0x57   :  { %s3501_s22 = scalar_lea.vmem %s114_s7, 256  ;;  %p3506_p6 = scmp.lt.s32.totalorder %s114_s7, %s114_s7 }
  0x58   :  { %p3502_p5 = scmp.ne.s32.totalorder %s114_s7, %s3501_s22  ;;  %p3507_p7 = scmp.lt.s32.totalorder %s3501_s22, %s3501_s22 }
  0x5a   :  { %p3508_p8 = por %p3507_p7, %p3506_p6 }
  0x5c   :  { %p3509_p9 = pnand %p3508_p8, %p3502_p5 }
  0x5e   :  { %3512 = shalt.err (!%p3509_p9)
}
  0x5f   :  { %119 = dma.hbm_to_vmem [thread:$0]  %s5190_s2, 256, %s114_s7, [#allocation15], %s5171_s1, %s5171_s1, %s5173_s27  }
  0x60   :  { %s5191_s25 = sld [smem:[#allocation67_spill]] }
  0x66   :  { %s3513_s26 = scalar_lea.hbm %s5191_s25, 192 }
  0x67   :  { %p3514_p10 = scmp.ne.s32.totalorder %s5191_s25, %s3513_s26  ;;  %p3517_p11 = scmp.lt.u32.totalorder %s3513_s26, %s5191_s25 }
  0x69   :  { %p3519_p12 = pnand %p3517_p11, %p3514_p10 }
  0x6b   :  { %3522 = shalt.err (!%p3519_p12)
}
  0x6c   :  { %s3523_s10 = scalar_lea.vmem %s4237_s4, 192  ;;  %p3528_p0 = scmp.lt.s32.totalorder %s4237_s4, %s4237_s4 }
  0x6d   :  { %p3524_p13 = scmp.ne.s32.totalorder %s4237_s4, %s3523_s10  ;;  %p3529_p1 = scmp.lt.s32.totalorder %s3523_s10, %s3523_s10 }
  0x6f   :  { %p3530_p2 = por %p3529_p1, %p3528_p0 }
  0x71   :  { %p3531_p3 = pnand %p3530_p2, %p3524_p13 }
  0x73   :  { %3534 = shalt.err (!%p3531_p3)
}
  0x74   :  { %143 = dma.hbm_to_vmem [thread:$0]  %s5191_s25, 192, %s4237_s4, [#allocation18], %s5171_s1, %s5171_s1, %s5173_s27  }
  0x75   :  { %s4031_s6 = smov [#allocation20]   ;;  %s5192_s0 = sld [smem:[#allocation69_spill]] }
  0x76   :  { %s161_s22 = sshll.u32 %s4031_s6, 4  ;;  %s162_s22 = int_to_ptr.vmem [resolvable:$true] %s161_s22 }
  0x7b   :  { %s3535_s3 = scalar_lea.hbm %s5192_s0, 256 }
  0x7c   :  { %p3536_p4 = scmp.ne.s32.totalorder %s5192_s0, %s3535_s3  ;;  %p3539_p5 = scmp.lt.u32.totalorder %s3535_s3, %s5192_s0 }
  0x7e   :  { %p3541_p6 = pnand %p3539_p5, %p3536_p4 }
  0x80   :  { %3544 = shalt.err (!%p3541_p6)
}
  0x81   :  { %s3545_s5 = scalar_lea.vmem %s162_s22, 256  ;;  %p3550_p8 = scmp.lt.s32.totalorder %s162_s22, %s162_s22 }
  0x82   :  { %p3546_p7 = scmp.ne.s32.totalorder %s162_s22, %s3545_s5  ;;  %p3551_p9 = scmp.lt.s32.totalorder %s3545_s5, %s3545_s5 }
  0x84   :  { %p3552_p10 = por %p3551_p9, %p3550_p8 }
  0x86   :  { %p3553_p11 = pnand %p3552_p10, %p3546_p7 }
  0x88   :  { %3556 = shalt.err (!%p3553_p11)
}
  0x89   :  { %s4032_s4 = smov 128   ;;  %s4033_s25 = smov 8  }
  0x8a   :  { %167 = dma.hbm_to_vmem [thread:$0]  %s5192_s0, 256, %s162_s22, [#allocation21], %s4032_s4, %s4032_s4, %s4033_s25  }
  0x8b   :  { %s4034_s2 = smov [#allocation23]   ;;  %s3557_s3 = scalar_lea.hbm %s5142_s11, 64 }
  0x8c   :  { %s185_s6 = sshll.u32 %s4034_s2, 4  ;;  %p3558_p12 = scmp.ne.s32.totalorder %s5142_s11, %s3557_s3  ;;  %s186_s6 = int_to_ptr.vmem [resolvable:$true] %s185_s6 }
  0x8d   :  { %p3561_p13 = scmp.lt.u32.totalorder %s3557_s3, %s5142_s11 }
  0x8f   :  { %p3563_p0 = pnand %p3561_p13, %p3558_p12 }
  0x91   :  { %3566 = shalt.err (!%p3563_p0)
}
  0x92   :  { %s3567_s5 = scalar_lea.vmem %s186_s6, 64  ;;  %p3572_p2 = scmp.lt.s32.totalorder %s186_s6, %s186_s6 }
  0x93   :  { %p3568_p1 = scmp.ne.s32.totalorder %s186_s6, %s3567_s5  ;;  %p3573_p3 = scmp.lt.s32.totalorder %s3567_s5, %s3567_s5 }
  0x95   :  { %p3574_p4 = por %p3573_p3, %p3572_p2 }
  0x97   :  { %p3575_p5 = pnand %p3574_p4, %p3568_p1 }
  0x99   :  { %3578 = shalt.err (!%p3575_p5)
}
  0x9a   :  { %s4035_s22 = smov 16   ;;  %s4036_s0 = smov 1  }
  0x9b   :  { %191 = dma.hbm_to_vmem [thread:$0]  %s5142_s11, 64, %s186_s6, [#allocation24], %s4035_s22, %s4035_s22, %s4036_s0  }
  0x9c   :  { %s4037_s2 = smov [#allocation26]   ;;  %s4038_s28 = smov [#allocation29]  }
  0x9d   :  { %s209_s29 = sshll.u32 %s4037_s2, 4  ;;  %s233_s3 = sshll.u32 %s4038_s28, 4  ;;  %s210_s29 = int_to_ptr.vmem [resolvable:$true] %s209_s29  ;;  %s4304_s3 = int_to_ptr.vmem [resolvable:$true] %s233_s3 }
  0x9e   :  { %s3579_s9 = scalar_lea.hbm %s5144_s13, 768 }
  0x9f   :  { %p3580_p6 = scmp.ne.s32.totalorder %s5144_s13, %s3579_s9  ;;  %p3583_p7 = scmp.lt.u32.totalorder %s3579_s9, %s5144_s13 }
  0xa1   :  { %p3585_p8 = pnand %p3583_p7, %p3580_p6 }
  0xa3   :  { %3588 = shalt.err (!%p3585_p8)
}
  0xa4   :  { %s3589_s11 = scalar_lea.vmem %s210_s29, 768  ;;  %p3594_p10 = scmp.lt.s32.totalorder %s210_s29, %s210_s29 }
  0xa5   :  { %p3590_p9 = scmp.ne.s32.totalorder %s210_s29, %s3589_s11  ;;  %p3595_p11 = scmp.lt.s32.totalorder %s3589_s11, %s3589_s11 }
  0xa7   :  { %p3596_p12 = por %p3595_p11, %p3594_p10 }
  0xa9   :  { %p3597_p13 = pnand %p3596_p12, %p3590_p9 }
  0xab   :  { %3600 = shalt.err (!%p3597_p13)
}
  0xac   :  { %215 = dma.hbm_to_vmem [thread:$0]  %s5144_s13, 768, %s210_s29, [#allocation27], %s4032_s4, %s4032_s4, %s4033_s25  }
  0xad   :  { %s3601_s1 = scalar_lea.hbm %s5146_s15, 512 }
  0xae   :  { %p3602_p0 = scmp.ne.s32.totalorder %s5146_s15, %s3601_s1  ;;  %p3605_p1 = scmp.lt.u32.totalorder %s3601_s1, %s5146_s15 }
  0xb0   :  { %p3607_p2 = pnand %p3605_p1, %p3602_p0 }
  0xb2   :  { %3610 = shalt.err (!%p3607_p2)
}
  0xb3   :  { %s3611_s9 = scalar_lea.vmem %s4304_s3, 512  ;;  %p3616_p4 = scmp.lt.s32.totalorder %s4304_s3, %s4304_s3 }
  0xb4   :  { %p3612_p3 = scmp.ne.s32.totalorder %s4304_s3, %s3611_s9  ;;  %p3617_p5 = scmp.lt.s32.totalorder %s3611_s9, %s3611_s9 }
  0xb6   :  { %p3618_p6 = por %p3617_p5, %p3616_p4 }
  0xb8   :  { %p3619_p7 = pnand %p3618_p6, %p3612_p3 }
  0xba   :  { %3622 = shalt.err (!%p3619_p7)
}
  0xbb   :  { %239 = dma.hbm_to_vmem [thread:$0]  %s5146_s15, 512, %s4304_s3, [#allocation30], %s4032_s4, %s4032_s4, %s4033_s25  }
  0xbc   :  { %s4039_s30 = smov [#allocation32]   ;;  %s4040_s11 = smov [#allocation35]  }
  0xbd   :  { %s257_s5 = sshll.u32 %s4039_s30, 4  ;;  %s282_s6 = sshll.u32 %s4040_s11, 4  ;;  %s258_s5 = int_to_ptr.vmem [resolvable:$true] %s257_s5  ;;  %s283_s6 = int_to_ptr.vmem [resolvable:$true] %s282_s6 }
  0xbe   :  { %s3623_s2 = scalar_lea.hbm %s5148_s17, 256 }
  0xbf   :  { %p3624_p8 = scmp.ne.s32.totalorder %s5148_s17, %s3623_s2  ;;  %p3627_p9 = scmp.lt.u32.totalorder %s3623_s2, %s5148_s17 }
  0xc1   :  { %p3629_p10 = pnand %p3627_p9, %p3624_p8 }
  0xc3   :  { %3632 = shalt.err (!%p3629_p10)
}
  0xc4   :  { %s3633_s15 = scalar_lea.vmem %s258_s5, 256  ;;  %p3638_p12 = scmp.lt.s32.totalorder %s258_s5, %s258_s5 }
  0xc5   :  { %p3634_p11 = scmp.ne.s32.totalorder %s258_s5, %s3633_s15  ;;  %p3639_p13 = scmp.lt.s32.totalorder %s3633_s15, %s3633_s15 }
  0xc7   :  { %p3640_p0 = por %p3639_p13, %p3638_p12 }
  0xc9   :  { %p3641_p1 = pnand %p3640_p0, %p3634_p11 }
  0xcb   :  { %3644 = shalt.err (!%p3641_p1)
}
  0xcc   :  { %263 = dma.hbm_to_vmem [thread:$0]  %s5148_s17, 256, %s258_s5, [#allocation33], %s4032_s4, %s4032_s4, %s4033_s25  }
  0xcd   :  { %s3645_s29 = scalar_lea.hbm %s5150_s19, 128 }
  0xce   :  { %p3646_p2 = scmp.ne.s32.totalorder %s5150_s19, %s3645_s29  ;;  %p3649_p3 = scmp.lt.u32.totalorder %s3645_s29, %s5150_s19 }
  0xd0   :  { %p3651_p4 = pnand %p3649_p3, %p3646_p2 }
  0xd2   :  { %3654 = shalt.err (!%p3651_p4)
}
  0xd3   :  { %s3655_s2 = scalar_lea.vmem %s283_s6, 128  ;;  %p3660_p6 = scmp.lt.s32.totalorder %s283_s6, %s283_s6 }
  0xd4   :  { %p3656_p5 = scmp.ne.s32.totalorder %s283_s6, %s3655_s2  ;;  %p3661_p7 = scmp.lt.s32.totalorder %s3655_s2, %s3655_s2 }
  0xd6   :  { %p3662_p8 = por %p3661_p7, %p3660_p6 }
  0xd8   :  { %p3663_p9 = pnand %p3662_p8, %p3656_p5 }
  0xda   :  { %3666 = shalt.err (!%p3663_p9)
}
  0xdb   :  { %285 = dma.hbm_to_vmem [thread:$0]  %s5150_s19, 128, %s283_s6, [#allocation36]  }
  0xdc   :  { %s4041_s1 = smov [#allocation38]   ;;  %s4042_s28 = smov [#allocation4]  }
  0xdd   :  { %s302_s27 = sshll.u32 %s4041_s1, 4  ;;  %s53_s26 = sshll.u32 %s4042_s28, 4  ;;  %s303_s27 = int_to_ptr.vmem [resolvable:$true] %s302_s27  ;;  %s4368_s26 = int_to_ptr.vmem [resolvable:$true] %s53_s26 }
  0xde   :  { %s3667_s8 = scalar_lea.hbm %s5152_s21, 16 }
  0xdf   :  { %p3668_p10 = scmp.ne.s32.totalorder %s5152_s21, %s3667_s8  ;;  %p3671_p11 = scmp.lt.u32.totalorder %s3667_s8, %s5152_s21 }
  0xe1   :  { %p3673_p12 = pnand %p3671_p11, %p3668_p10 }
  0xe3   :  { %3676 = shalt.err (!%p3673_p12)
}
  0xe4   :  { %s3677_s19 = scalar_lea.vmem %s303_s27, 16  ;;  %s3681_s6 = scalar_lea.vmem %s303_s27, 32 }
  0xe5   :  { %p3678_p13 = scmp.ne.s32.totalorder %s303_s27, %s3677_s19  ;;  %p3682_p0 = scmp.lt.s32.totalorder %s303_s27, %s303_s27 }
  0xe6   :  { %p3683_p1 = scmp.lt.s32.totalorder %s3681_s6, %s3677_s19 }
  0xe8   :  { %p3684_p2 = por %p3683_p1, %p3682_p0 }
  0xea   :  { %p3685_p3 = pnand %p3684_p2, %p3678_p13 }
  0xec   :  { %3688 = shalt.err (!%p3685_p3)
}
  0xed   :  { %305 = dma.hbm_to_vmem [thread:$0]  %s5152_s21, 16, %s303_s27, [#allocation39]  }
  0xee   :  { %s5193_s17 = sld [smem:[#allocation60_spill]] }
  0xf4   :  { %s3689_s5 = scalar_lea.hbm %s5193_s17, 192 }
  0xf5   :  { %p3690_p4 = scmp.ne.s32.totalorder %s5193_s17, %s3689_s5  ;;  %p3693_p5 = scmp.lt.u32.totalorder %s3689_s5, %s5193_s17 }
  0xf7   :  { %p3695_p6 = pnand %p3693_p5, %p3690_p4 }
  0xf9   :  { %3698 = shalt.err (!%p3695_p6)
}
  0xfa   :  { %s3699_s8 = scalar_lea.vmem %s4368_s26, 192  ;;  %p3704_p8 = scmp.lt.s32.totalorder %s4368_s26, %s4368_s26 }
  0xfb   :  { %p3700_p7 = scmp.ne.s32.totalorder %s4368_s26, %s3699_s8  ;;  %p3705_p9 = scmp.lt.s32.totalorder %s3699_s8, %s3699_s8 }
  0xfd   :  { %p3706_p10 = por %p3705_p9, %p3704_p8 }
  0xff   :  { %p3707_p11 = pnand %p3706_p10, %p3700_p7 }
 0x101   :  { %3710 = shalt.err (!%p3707_p11)
}
 0x102   :  { %s5194_s21 = smov 4   ;;  %s5195_s27 = smov 64  }
 0x103   :  { %59 = dma.hbm_to_vmem [thread:$0]  %s5193_s17, 192, %s4368_s26, [#allocation5], %s5195_s27, %s5195_s27, %s5194_s21  }
 0x104   :  { %s4043_s29 = smov [#allocation10]   ;;  %s4044_s19 = smov [#allocation13]  }
 0x105   :  { %s77_s30 = sshll.u32 %s4043_s29, 4  ;;  %s101_s6 = sshll.u32 %s4044_s19, 4  ;;  %s78_s30 = int_to_ptr.vmem [resolvable:$true] %s77_s30  ;;  %s4402_s6 = int_to_ptr.vmem [resolvable:$true] %s101_s6 }
 0x106   :  { %s5196_s7 = sld [smem:[#allocation62_spill]] }
 0x10c   :  { %s3711_s2 = scalar_lea.hbm %s5196_s7, 256 }
 0x10d   :  { %p3712_p12 = scmp.ne.s32.totalorder %s5196_s7, %s3711_s2  ;;  %p3715_p13 = scmp.lt.u32.totalorder %s3711_s2, %s5196_s7 }
 0x10f   :  { %p3717_p0 = pnand %p3715_p13, %p3712_p12 }
 0x111   :  { %3720 = shalt.err (!%p3717_p0)
}
 0x112   :  { %s3721_s26 = scalar_lea.vmem %s78_s30, 256  ;;  %p3726_p2 = scmp.lt.s32.totalorder %s78_s30, %s78_s30 }
 0x113   :  { %p3722_p1 = scmp.ne.s32.totalorder %s78_s30, %s3721_s26  ;;  %p3727_p3 = scmp.lt.s32.totalorder %s3721_s26, %s3721_s26 }
 0x115   :  { %p3728_p4 = por %p3727_p3, %p3726_p2 }
 0x117   :  { %p3729_p5 = pnand %p3728_p4, %p3722_p1 }
 0x119   :  { %3732 = shalt.err (!%p3729_p5)
}
 0x11a   :  { %83 = dma.hbm_to_vmem [thread:$0]  %s5196_s7, 256, %s78_s30, [#allocation9], %s5195_s27, %s5195_s27, %s5194_s21  }
 0x11b   :  { %s5197_s13 = sld [smem:[#allocation64_spill]] }
 0x121   :  { %s3733_s29 = scalar_lea.hbm %s5197_s13, 192 }
 0x122   :  { %p3734_p6 = scmp.ne.s32.totalorder %s5197_s13, %s3733_s29  ;;  %p3737_p7 = scmp.lt.u32.totalorder %s3733_s29, %s5197_s13 }
 0x124   :  { %p3739_p8 = pnand %p3737_p7, %p3734_p6 }
 0x126   :  { %3742 = shalt.err (!%p3739_p8)
}
 0x127   :  { %s3743_s5 = scalar_lea.vmem %s4402_s6, 192  ;;  %p3748_p10 = scmp.lt.s32.totalorder %s4402_s6, %s4402_s6 }
 0x128   :  { %p3744_p9 = scmp.ne.s32.totalorder %s4402_s6, %s3743_s5  ;;  %p3749_p11 = scmp.lt.s32.totalorder %s3743_s5, %s3743_s5 }
 0x12a   :  { %p3750_p12 = por %p3749_p11, %p3748_p10 }
 0x12c   :  { %p3751_p13 = pnand %p3750_p12, %p3744_p9 }
 0x12e   :  { %3754 = shalt.err (!%p3751_p13)
}
 0x12f   :  { %107 = dma.hbm_to_vmem [thread:$0]  %s5197_s13, 192, %s4402_s6, [#allocation12], %s5195_s27, %s5195_s27, %s5194_s21  }
 0x130   :  { %s4045_s1 = smov [#allocation16]   ;;  %s4046_s15 = smov [#allocation19]  }
 0x131   :  { %s125_s28 = sshll.u32 %s4045_s1, 4  ;;  %s149_s26 = sshll.u32 %s4046_s15, 4  ;;  %s126_s28 = int_to_ptr.vmem [resolvable:$true] %s125_s28  ;;  %s4439_s26 = int_to_ptr.vmem [resolvable:$true] %s149_s26 }
 0x132   :  { %s5198_s8 = sld [smem:[#allocation66_spill]] }
 0x138   :  { %s3755_s9 = scalar_lea.hbm %s5198_s8, 256 }
 0x139   :  { %p3756_p0 = scmp.ne.s32.totalorder %s5198_s8, %s3755_s9  ;;  %p3759_p1 = scmp.lt.u32.totalorder %s3755_s9, %s5198_s8 }
 0x13b   :  { %p3761_p2 = pnand %p3759_p1, %p3756_p0 }
 0x13d   :  { %3764 = shalt.err (!%p3761_p2)
}
 0x13e   :  { %s3765_s6 = scalar_lea.vmem %s126_s28, 256  ;;  %p3770_p4 = scmp.lt.s32.totalorder %s126_s28, %s126_s28 }
 0x13f   :  { %p3766_p3 = scmp.ne.s32.totalorder %s126_s28, %s3765_s6  ;;  %p3771_p5 = scmp.lt.s32.totalorder %s3765_s6, %s3765_s6 }
 0x141   :  { %p3772_p6 = por %p3771_p5, %p3770_p4 }
 0x143   :  { %p3773_p7 = pnand %p3772_p6, %p3766_p3 }
 0x145   :  { %3776 = shalt.err (!%p3773_p7)
}
 0x146   :  { %131 = dma.hbm_to_vmem [thread:$0]  %s5198_s8, 256, %s126_s28, [#allocation15], %s5195_s27, %s5195_s27, %s5194_s21  }
 0x147   :  { %s5199_s7 = sld [smem:[#allocation68_spill]] }
 0x14d   :  { %s3777_s1 = scalar_lea.hbm %s5199_s7, 256 }
 0x14e   :  { %p3778_p8 = scmp.ne.s32.totalorder %s5199_s7, %s3777_s1  ;;  %p3781_p9 = scmp.lt.u32.totalorder %s3777_s1, %s5199_s7 }
 0x150   :  { %p3783_p10 = pnand %p3781_p9, %p3778_p8 }
 0x152   :  { %3786 = shalt.err (!%p3783_p10)
}
 0x153   :  { %s3787_s29 = scalar_lea.vmem %s4439_s26, 256  ;;  %p3792_p12 = scmp.lt.s32.totalorder %s4439_s26, %s4439_s26 }
 0x154   :  { %p3788_p11 = scmp.ne.s32.totalorder %s4439_s26, %s3787_s29  ;;  %p3793_p13 = scmp.lt.s32.totalorder %s3787_s29, %s3787_s29 }
 0x156   :  { %p3794_p0 = por %p3793_p13, %p3792_p12 }
 0x158   :  { %p3795_p1 = pnand %p3794_p0, %p3788_p11 }
 0x15a   :  { %3798 = shalt.err (!%p3795_p1)
}
 0x15b   :  { %155 = dma.hbm_to_vmem [thread:$0]  %s5199_s7, 256, %s4439_s26, [#allocation18], %s5195_s27, %s5195_s27, %s5194_s21  }
 0x15c   :  { %s4047_s19 = smov [#allocation22]   ;;  %s4048_s10 = smov [#allocation25]  }
 0x15d   :  { %s173_s11 = sshll.u32 %s4047_s19, 4  ;;  %s197_s6 = sshll.u32 %s4048_s10, 4  ;;  %s174_s11 = int_to_ptr.vmem [resolvable:$true] %s173_s11  ;;  %s4476_s6 = int_to_ptr.vmem [resolvable:$true] %s197_s6 }
 0x15e   :  { %s5200_s5 = sld [smem:[#allocation70_spill]] }
 0x164   :  { %s3799_s30 = scalar_lea.hbm %s5200_s5, 1024 }
 0x165   :  { %p3800_p2 = scmp.ne.s32.totalorder %s5200_s5, %s3799_s30  ;;  %p3803_p3 = scmp.lt.u32.totalorder %s3799_s30, %s5200_s5 }
 0x167   :  { %p3805_p4 = pnand %p3803_p3, %p3800_p2 }
 0x169   :  { %3808 = shalt.err (!%p3805_p4)
}
 0x16a   :  { %s3809_s21 = scalar_lea.vmem %s174_s11, 1024  ;;  %p3814_p6 = scmp.lt.s32.totalorder %s174_s11, %s174_s11 }
 0x16b   :  { %p3810_p5 = scmp.ne.s32.totalorder %s174_s11, %s3809_s21  ;;  %p3815_p7 = scmp.lt.s32.totalorder %s3809_s21, %s3809_s21 }
 0x16d   :  { %p3816_p8 = por %p3815_p7, %p3814_p6 }
 0x16f   :  { %p3817_p9 = pnand %p3816_p8, %p3810_p5 }
 0x171   :  { %3820 = shalt.err (!%p3817_p9)
}
 0x172   :  { %179 = dma.hbm_to_vmem [thread:$0]  %s5200_s5, 1024, %s174_s11, [#allocation21], %s4032_s4, %s4032_s4, %s4033_s25  }
 0x173   :  { %s3821_s29 = scalar_lea.hbm %s5143_s12, 64 }
 0x174   :  { %p3822_p10 = scmp.ne.s32.totalorder %s5143_s12, %s3821_s29  ;;  %p3825_p11 = scmp.lt.u32.totalorder %s3821_s29, %s5143_s12 }
 0x176   :  { %p3827_p12 = pnand %p3825_p11, %p3822_p10 }
 0x178   :  { %3830 = shalt.err (!%p3827_p12)
}
 0x179   :  { %s3831_s13 = scalar_lea.vmem %s4476_s6, 64  ;;  %p3836_p0 = scmp.lt.s32.totalorder %s4476_s6, %s4476_s6 }
 0x17a   :  { %p3832_p13 = scmp.ne.s32.totalorder %s4476_s6, %s3831_s13  ;;  %p3837_p1 = scmp.lt.s32.totalorder %s3831_s13, %s3831_s13 }
 0x17c   :  { %p3838_p2 = por %p3837_p1, %p3836_p0 }
 0x17e   :  { %p3839_p3 = pnand %p3838_p2, %p3832_p13 }
 0x180   :  { %3842 = shalt.err (!%p3839_p3)
}
 0x181   :  { %203 = dma.hbm_to_vmem [thread:$0]  %s5143_s12, 64, %s4476_s6, [#allocation24], %s4035_s22, %s4035_s22, %s4036_s0  }
 0x182   :  { %s4049_s5 = smov [#allocation28]   ;;  %s4050_s1 = smov [#allocation31]  }
 0x183   :  { %s221_s30 = sshll.u32 %s4049_s5, 4  ;;  %s245_s15 = sshll.u32 %s4050_s1, 4  ;;  %s222_s30 = int_to_ptr.vmem [resolvable:$true] %s221_s30  ;;  %s4513_s15 = int_to_ptr.vmem [resolvable:$true] %s245_s15 }
 0x184   :  { %s3843_s21 = scalar_lea.hbm %s5145_s14, 48 }
 0x185   :  { %p3844_p4 = scmp.ne.s32.totalorder %s5145_s14, %s3843_s21  ;;  %p3847_p5 = scmp.lt.u32.totalorder %s3843_s21, %s5145_s14 }
 0x187   :  { %p3849_p6 = pnand %p3847_p5, %p3844_p4 }
 0x189   :  { %3852 = shalt.err (!%p3849_p6)
}
 0x18a   :  { %s3853_s12 = scalar_lea.vmem %s222_s30, 48  ;;  %s3857_s6 = scalar_lea.vmem %s222_s30, 64 }
 0x18b   :  { %p3854_p7 = scmp.ne.s32.totalorder %s222_s30, %s3853_s12  ;;  %p3858_p8 = scmp.lt.s32.totalorder %s222_s30, %s222_s30 }
 0x18c   :  { %p3859_p9 = scmp.lt.s32.totalorder %s3857_s6, %s3853_s12 }
 0x18e   :  { %p3860_p10 = por %p3859_p9, %p3858_p8 }
 0x190   :  { %p3861_p11 = pnand %p3860_p10, %p3854_p7 }
 0x192   :  { %3864 = shalt.err (!%p3861_p11)
}
 0x193   :  { %227 = dma.hbm_to_vmem [thread:$0]  %s5145_s14, 48, %s222_s30, [#allocation27], %s4035_s22, %s4035_s22, %s4036_s0  }
 0x194   :  { %s3865_s10 = scalar_lea.hbm %s5147_s16, 512 }
 0x195   :  { %p3866_p12 = scmp.ne.s32.totalorder %s5147_s16, %s3865_s10  ;;  %p3869_p13 = scmp.lt.u32.totalorder %s3865_s10, %s5147_s16 }
 0x197   :  { %p3871_p0 = pnand %p3869_p13, %p3866_p12 }
 0x199   :  { %3874 = shalt.err (!%p3871_p0)
}
 0x19a   :  { %s3875_s1 = scalar_lea.vmem %s4513_s15, 512  ;;  %p3880_p2 = scmp.lt.s32.totalorder %s4513_s15, %s4513_s15 }
 0x19b   :  { %p3876_p1 = scmp.ne.s32.totalorder %s4513_s15, %s3875_s1  ;;  %p3881_p3 = scmp.lt.s32.totalorder %s3875_s1, %s3875_s1 }
 0x19d   :  { %p3882_p4 = por %p3881_p3, %p3880_p2 }
 0x19f   :  { %p3883_p5 = pnand %p3882_p4, %p3876_p1 }
 0x1a1   :  { %3886 = shalt.err (!%p3883_p5)
}
 0x1a2   :  { %251 = dma.hbm_to_vmem [thread:$0]  %s5147_s16, 512, %s4513_s15, [#allocation30], %s4032_s4, %s4032_s4, %s4033_s25  }
 0x1a3   :  { %s4051_s30 = smov [#allocation34]   ;;  %s4052_s3 = smov [#allocation37]  }
 0x1a4   :  { %s269_s17 = sshll.u32 %s4051_s30, 4  ;;  %s292_s21 = sshll.u32 %s4052_s3, 4  ;;  %s270_s17 = int_to_ptr.vmem [resolvable:$true] %s269_s17  ;;  %s293_s21 = int_to_ptr.vmem [resolvable:$true] %s292_s21 }
 0x1a5   :  { %s3887_s7 = scalar_lea.hbm %s5149_s18, 256 }
 0x1a6   :  { %p3888_p6 = scmp.ne.s32.totalorder %s5149_s18, %s3887_s7  ;;  %p3891_p7 = scmp.lt.u32.totalorder %s3887_s7, %s5149_s18 }
 0x1a8   :  { %p3893_p8 = pnand %p3891_p7, %p3888_p6 }
 0x1aa   :  { %3896 = shalt.err (!%p3893_p8)
}
 0x1ab   :  { %s3897_s16 = scalar_lea.vmem %s270_s17, 256  ;;  %p3902_p10 = scmp.lt.s32.totalorder %s270_s17, %s270_s17 }
 0x1ac   :  { %p3898_p9 = scmp.ne.s32.totalorder %s270_s17, %s3897_s16  ;;  %p3903_p11 = scmp.lt.s32.totalorder %s3897_s16, %s3897_s16 }
 0x1ae   :  { %p3904_p12 = por %p3903_p11, %p3902_p10 }
 0x1b0   :  { %p3905_p13 = pnand %p3904_p12, %p3898_p9 }
 0x1b2   :  { %3908 = shalt.err (!%p3905_p13)
}
 0x1b3   :  { %275 = dma.hbm_to_vmem [thread:$0]  %s5149_s18, 256, %s270_s17, [#allocation33], %s4032_s4, %s4032_s4, %s4033_s25  }
 0x1b4   :  { %s3909_s10 = scalar_lea.hbm %s5151_s20, 128 }
 0x1b5   :  { %p3910_p0 = scmp.ne.s32.totalorder %s5151_s20, %s3909_s10  ;;  %p3913_p1 = scmp.lt.u32.totalorder %s3909_s10, %s5151_s20 }
 0x1b7   :  { %p3915_p2 = pnand %p3913_p1, %p3910_p0 }
 0x1b9   :  { %3918 = shalt.err (!%p3915_p2)
}
 0x1ba   :  { %s3919_s1 = scalar_lea.vmem %s293_s21, 128  ;;  %p3924_p4 = scmp.lt.s32.totalorder %s293_s21, %s293_s21 }
 0x1bb   :  { %p3920_p3 = scmp.ne.s32.totalorder %s293_s21, %s3919_s1  ;;  %p3925_p5 = scmp.lt.s32.totalorder %s3919_s1, %s3919_s1 }
 0x1bd   :  { %p3926_p6 = por %p3925_p5, %p3924_p4 }
 0x1bf   :  { %p3927_p7 = pnand %p3926_p6, %p3920_p3 }
 0x1c1   :  { %3930 = shalt.err (!%p3927_p7)
}
 0x1c2   :  { %295 = dma.hbm_to_vmem [thread:$0]  %s5151_s20, 128, %s293_s21, [#allocation36]  }
 0x1c3   :  { %s4053_s25 = smov [#allocation40]   ;;  %s3931_s17 = scalar_lea.hbm %s5154_s23, 64 }
 0x1c4   :  { %s314_s14 = sshll.u32 %s4053_s25, 4  ;;  %p3932_p8 = scmp.ne.s32.totalorder %s5154_s23, %s3931_s17  ;;  %s315_s14 = int_to_ptr.vmem [resolvable:$true] %s314_s14 }
 0x1c5   :  { %p3935_p9 = scmp.lt.u32.totalorder %s3931_s17, %s5154_s23 }
 0x1c7   :  { %p3937_p10 = pnand %p3935_p9, %p3932_p8 }
 0x1c9   :  { %3940 = shalt.err (!%p3937_p10)
}
 0x1ca   :  { %s3941_s9 = scalar_lea.vmem %s315_s14, 64  ;;  %p3946_p12 = scmp.lt.s32.totalorder %s315_s14, %s315_s14 }
 0x1cb   :  { %p3942_p11 = scmp.ne.s32.totalorder %s315_s14, %s3941_s9  ;;  %p3947_p13 = scmp.lt.s32.totalorder %s3941_s9, %s3941_s9 }
 0x1cd   :  { %p3948_p0 = por %p3947_p13, %p3946_p12 }
 0x1cf   :  { %p3949_p1 = pnand %p3948_p0, %p3942_p11 }
 0x1d1   :  { %3952 = shalt.err (!%p3949_p1)
}
 0x1d2   :  { %317 = dma.hbm_to_vmem [thread:$0]  %s5154_s23, 64, %s315_s14, [#allocation39]  }
 0x1d3   :  { %s3953_s29 = scalar_lea.hbm %s5155_s24, 16 }
 0x1d4   :  { %p3954_p2 = scmp.ne.s32.totalorder %s5155_s24, %s3953_s29  ;;  %p3957_p3 = scmp.lt.u32.totalorder %s3953_s29, %s5155_s24 }
 0x1d6   :  { %p3959_p4 = pnand %p3957_p3, %p3954_p2 }
 0x1d8   :  { %3962 = shalt.err (!%p3959_p4)
}
 0x1d9   :  { %s4054_s19 = smov [#allocation41]   ;;  %s5201_s2 = sld [smem:[#allocation71_spill]] }
 0x1da   :  { %325 = dma.hbm_to_smem %s5155_s24, 16, %s4054_s19, [#allocation7]  }
 0x1df   :  { %s3963_s5 = scalar_lea.hbm %s5201_s2, 16 }
 0x1e0   :  { %p3964_p5 = scmp.ne.s32.totalorder %s5201_s2, %s3963_s5  ;;  %p3967_p6 = scmp.lt.u32.totalorder %s3963_s5, %s5201_s2 }
 0x1e2   :  { %p3969_p7 = pnand %p3967_p6, %p3964_p5 }
 0x1e4   :  { %3972 = shalt.err (!%p3969_p7)
}
 0x1e5   :  { %s4055_s14 = smov [#allocation42]  }
 0x1e6   :  { %333 = dma.hbm_to_smem %s5201_s2, 16, %s4055_s14, [#allocation43]  }
 0x1e7   :  { %3995 = dma.done.wait [#allocation5], 192  }
 0x1e8   :  { %3996 = vsyncadd [#allocation5], 4294967104 }
 0x1e9   :  { %3997 = dma.done.wait [#allocation9], 512  }
 0x1ea   :  { %3998 = vsyncadd [#allocation9], 4294966784 }
 0x1eb   :  { %3999 = dma.done.wait [#allocation12], 384  }
 0x1ec   :  { %4000 = vsyncadd [#allocation12], 4294966912 }
 0x1ed   :  { %4001 = dma.done.wait [#allocation15], 512  }
 0x1ee   :  { %4002 = vsyncadd [#allocation15], 4294966784 }
 0x1ef   :  { %4003 = dma.done.wait [#allocation18], 448  }
 0x1f0   :  { %4004 = vsyncadd [#allocation18], 4294966848 }
 0x1f1   :  { %4005 = dma.done.wait [#allocation21], 1280  }
 0x1f2   :  { %4006 = vsyncadd [#allocation21], 4294966016 }
 0x1f3   :  { %4007 = dma.done.wait [#allocation24], 128  }
 0x1f4   :  { %4008 = vsyncadd [#allocation24], 4294967168 }
 0x1f5   :  { %4009 = dma.done.wait [#allocation27], 816  }
 0x1f6   :  { %4010 = vsyncadd [#allocation27], 4294966480 }
 0x1f7   :  { %4011 = dma.done.wait [#allocation30], 1024  }
 0x1f8   :  { %4012 = vsyncadd [#allocation30], 4294966272 }
 0x1f9   :  { %4013 = dma.done.wait [#allocation33], 512  }
 0x1fa   :  { %4014 = vsyncadd [#allocation33], 4294966784 }
 0x1fb   :  { %4015 = dma.done.wait [#allocation36], 256  }
 0x1fc   :  { %4016 = vsyncadd [#allocation36], 4294967040 }
 0x1fd   :  { %4017 = dma.done.wait [#allocation39], 80  }
 0x1fe   :  { %4018 = vsyncadd [#allocation39], 4294967216 }
 0x1ff   :  { %4019 = dma.done.wait [#allocation7], 16  }
 0x200   :  { %4020 = vsyncadd [#allocation7], 4294967280 }
 0x201   :  { %4021 = dma.done.wait [#allocation43], 16  }
 0x202   :  { %4022 = vsyncadd [#allocation43], 4294967280 }
 0x203   :  { %409 = sfence }
 0x204   :  { %v4613_v1 = vld [vmem:[#allocation4] sm:$0xff]   ;;  %v4615_v2 = vld [vmem:[#allocation4 + $0x8] sm:$0xf]  ;;  %v3331_v4 = vld [vmem:[#allocation13] sm:$0xff]   ;;  %vm437_vm0 = vcmask 195584   ;;  %vm444_vm1 = vcmask 1043456  }
 0x205   :  { %v2876_v3 = vcombine.low %v4615_v2, %v4615_v2  ;;  %v4619_v5 = vld [vmem:[#allocation8] sm:$0xff]   ;;  %3060 = vmatprep.subr.bf16.mxu0 %v4613_v1  ;;  %3064 = vmatprep.mubr.msk.bf16.mxu0 %vm437_vm0, %v3331_v4  ;;  %v4627_v7 = vld [vmem:[#allocation13 + $0x8] ss:$0 sps:$4 sm:$0xff]   ;;  %v4629_v8 = vld [vmem:[#allocation8 + $0x8] sm:$0xff]   ;;  %vm598_vm2 = vcmask 261120   ;;  %v419_v21 = vunpack.c.l.bf16 %v4615_v2  ;;  %v417_v23 = vunpack.c.l.bf16 %v4613_v1  ;;  %s4057_s24 = smov 112  }
 0x206   :  { %3061 = vmatpush3.bf16.msra.mxu0 %v4613_v1  ;;  %3072 = vmatprep.mubr.msk.bf16.mxu1 %vm437_vm0, %v3331_v4  ;;  %v4631_v9 = vld [vmem:[#allocation14] sm:$0xff]   ;;  %v4634_v10 = vld [vmem:[#allocation10] sm:$0xff]   ;;  %v4644_v12 = vld [vmem:[#allocation14 + $0x8] sm:$0xff]   ;;  %v418_v24 = vunpack.c.h.bf16 %v4613_v1  ;;  %v572_v34 = vunpack.c.l.bf16 %v4619_v5  ;;  %v575_v35 = vunpack.c.h.bf16 %v4629_v8  ;;  %v573_v36 = vunpack.c.h.bf16 %v4619_v5  ;;  %s5058_s17 = sld [smem:[#allocation42 + $0x2]]  ;;  %s5060_s3 = sld [smem:[#allocation42]] }
 0x207   :  { %3286 = vmatprep.subr.msk.bf16.mxu0 %vm444_vm1, %v2876_v3  ;;  %v446_v6 = vsel %vm444_vm1, %v2876_v3, 0  ;;  %v4642_v11 = vld [vmem:[#allocation10 + $0x8] sm:$0xff]   ;;  %v4647_v13 = vld [vmem:[#allocation16] sm:$0xff]   ;;  %v4656_v14 = vld [vmem:[#allocation16 + $0x8] sm:$0xff]   ;;  %v574_v38 = vunpack.c.l.bf16 %v4629_v8  ;;  %v733_v48 = vunpack.c.l.bf16 %v4634_v10  ;;  %v734_v51 = vunpack.c.h.bf16 %v4634_v10  ;;  %s5062_s27 = sld [smem:[#allocation42 + $0x3]]  ;;  %s2935_s21 = sld [smem:[#allocation41 + $0x1]] }
 0x208   :  { %v4661_v15 = vld [vmem:[#allocation11] sm:$0xff]   ;;  %v4665_v16 = vld [vmem:[#allocation11 + $0x8] sm:$0xf]  ;;  %v3343_v19 = vld [vmem:[#allocation17] sm:$0xff]   ;;  %v736_v50 = vunpack.c.h.bf16 %v4642_v11  ;;  %v735_v53 = vunpack.c.l.bf16 %v4642_v11  ;;  %vm1046_vm3 = vcmask 130048   ;;  %vm4058_vm4 = vmmov 0  }
 0x209   :  { %v2900_v17 = vcombine.low %v4665_v16, %v4665_v16  ;;  %v4671_v20 = vld [vmem:[#allocation17 + $0x8] ss:$0 sps:$4 sm:$0xff]   ;;  %v893_v62 = vunpack.c.l.bf16 %v4665_v16  ;;  %v891_v4 = vunpack.c.l.bf16 %v4661_v15  ;;  %vm1160_vm5 = vcmask 122880   ;;  %s2938_s12 = sld [smem:[#allocation41 + $0x2]]  ;;  %s1992_s6 = sld [smem:[#allocation41]] }
 0x20a   :  { %3063 = vmatpush3.bf16.msra.mxu0 %v446_v6  ;;  %vm2037_vm6 = vcmask 1040384   ;;  %vm2039_vm7 = vcmask 1041408   ;;  %vm2041_vm8 = vcmask 1042432   ;;  %vm2324_vm9 = vcmask 60416   ;;  %s2941_s29 = sld [smem:[#allocation41 + $0x3]]  ;;  %s4061_s11 = smov [#allocation44]  }
 0x20b   :  { %3076 = vmatprep.subr.bf16.mxu0 %v4619_v5  ;;  %v918_v18 = vsel %vm444_vm1, %v2900_v17, 0  ;;  %vm2329_vm10 = vcmask 64512   ;;  %s2835_s2 = sshll.u32 %s4061_s11, 4  ;;  %vm2827_vm11 = vcmask 24576   ;;  %s2836_s2 = int_to_ptr.vmem [resolvable:$true] %s2835_s2 }
 0x20c   :  { %s2017_s7 = scalar_lea.vmem [#allocation20], %s5058_s17  ;;  %s1999_s9 = scalar_lea.vmem [#allocation20], %s5060_s3 }
 0x20d   :  { %3065 = vmatmul.mubr.msk.bf16.vlgmr.msra.gmra.mrb[0].mxu0 %vm437_vm0, %v4627_v7  ;;  %s2026_s20 = scalar_lea.vmem [#allocation20], %s5062_s27  ;;  %s2003_s16 = scalar_lea.vmem [#allocation2], %s2935_s21 }
 0x20e   :  { %3077 = vmatpush3.bf16.msra.mxu0 %v4619_v5  ;;  %3080 = vmatprep.mubr.msk.bf16.mxu0 %vm598_vm2, %v4631_v9  ;;  %s2866_s10 = scalar_lea.vmem [#allocation2], %s5058_s17  ;;  %s2870_s13 = scalar_lea.vmem [#allocation2], %s5062_s27 }
 0x20f   :  { %3078 = vmatprep.subr.bf16.mxu0 %v4629_v8  ;;  %s2012_s15 = scalar_lea.vmem [#allocation2], %s2938_s12  ;;  %s1994_s8 = scalar_lea.vmem [#allocation2], %s1992_s6 }
 0x210   :  { %s2021_s28 = scalar_lea.vmem [#allocation2], %s2941_s29  ;;  %s2858_s23 = scalar_lea.vmem [#allocation2], %s5060_s3 }
 0x211   :  { %s3973_s5 = scalar_lea.vmem %s2836_s2, 16  ;;  %s3977_s1 = scalar_lea.vmem %s2836_s2, 32 }
 0x212   :  { %3079 = vmatpush3.bf16.msra.mxu0 %v4629_v8  ;;  %p3974_p8 = scmp.ne.s32.totalorder %s2836_s2, %s3973_s5  ;;  %p3978_p9 = scmp.lt.s32.totalorder %s2836_s2, %s2836_s2 }
 0x213   :  { %3092 = vmatprep.subr.bf16.mxu0 %v4634_v10  ;;  %p3979_p10 = scmp.lt.s32.totalorder %s3977_s1, %s3973_s5 }
 0x215   :  { %3081 = vmatmul.mubr.msk.bf16.vlgmr.msra.gmra.mrb[4].mxu0 %vm598_vm2, %v4644_v12  ;;  %p3980_p11 = por %p3979_p10, %p3978_p9 }
 0x216   :  { %3093 = vmatpush3.bf16.msra.mxu0 %v4634_v10  ;;  %3096 = vmatprep.mubr.msk.bf16.mxu0 %vm598_vm2, %v4647_v13 }
 0x217   :  { %3094 = vmatprep.subr.bf16.mxu0 %v4642_v11  ;;  %p3981_p12 = pnand %p3980_p11, %p3974_p8 }
 0x21a   :  { %3095 = vmatpush3.bf16.msra.mxu0 %v4642_v11 }
 0x21b   :  { %3108 = vmatprep.subr.bf16.mxu0 %v4661_v15 }
 0x21d   :  { %3097 = vmatmul.mubr.msk.bf16.vlgmr.msra.gmra.mrb[8].mxu0 %vm598_vm2, %v4656_v14 }
 0x21e   :  { %3109 = vmatpush3.bf16.msra.mxu0 %v4661_v15  ;;  %3112 = vmatprep.mubr.msk.bf16.mxu0 %vm437_vm0, %v3343_v19 }
 0x21f   :  { %3288 = vmatprep.subr.msk.bf16.mxu0 %vm444_vm1, %v2900_v17  ;;  %v1037_v17 = vld [vmem:[#allocation22 + $0x8] sm:$0xff] }
 0x222   :  { %3111 = vmatpush3.bf16.msra.mxu0 %v918_v18 }
 0x225   :  { %3113 = vmatmul.mubr.msk.bf16.vlgmr.msra.gmra.mrb[12].mxu0 %vm437_vm0, %v4671_v20 }
 0x2e0   :  { %v3066_v22 = vpop.f32.mrb[0].mxu0 }
 0x2e1   :  { %v4681_v25 = vadd.f32 %v3066_v22, %v419_v21  ;;  %v482_v26 = vpop.f32.mrb[1].mxu0 }
 0x2e2   :  { %v3067_v27 = vpop.f32.mrb[2].mxu0  ;;  %v4685_v29 = vadd.f32 %v482_v26, %v417_v23 }
 0x2e3   :  { %v485_v28 = vpop.f32.mrb[3].mxu0  ;;  %v503_v32 = vpack.c.bf16 %v4681_v25, %v4681_v25  ;;  %v4056_v27 = vmov 0.0|0.0  }
 0x2e4   :  { %v4689_v30 = vadd.f32 %v485_v28, %v418_v24  ;;  %v1206_v28 = vld [vmem:[#allocation22 + $0x10] sm:$0xff] }
 0x2e5   :  { %v505_v44 = vsel %vm444_vm1, %v503_v32, 0 }
 0x2e6   :  { %v502_v31 = vpack.c.bf16 %v4689_v30, %v4685_v29  ;;  %v500_v2 = vadd.f32 %v4689_v30, %v418_v24 }
 0x2e8   :  { %3068 = vmatprep.subr.bf16.mxu1 %v502_v31  ;;  %v3082_v33 = vpop.f32.mrb[4].mxu0 }
 0x2e9   :  { %3069 = vmatpush3.bf16.msra.mxu1 %v502_v31  ;;  %v639_v37 = vpop.f32.mrb[5].mxu0  ;;  %v4715_v45 = vadd.f32 %v3082_v33, %v574_v38  ;;  %v1207_v31 = vld [vmem:[#allocation22 + $0x18] sm:$0xff] }
 0x2ea   :  { %3287 = vmatprep.subr.msk.bf16.mxu1 %vm444_vm1, %v503_v32  ;;  %v3083_v39 = vpop.f32.mrb[6].mxu0  ;;  %v4702_v41 = vadd.f32 %v639_v37, %v572_v34  ;;  %v3255_v32 = vpack.c.bf16 %v1207_v31, %v1206_v28 }
 0x2eb   :  { %v642_v40 = vpop.f32.mrb[7].mxu0  ;;  %v4706_v42 = vadd.f32 %v3083_v39, %v575_v35 }
 0x2ec   :  { %v4710_v43 = vadd.f32 %v642_v40, %v573_v36 }
 0x2ed   :  { %3071 = vmatpush3.bf16.msra.mxu1 %v505_v44  ;;  %v663_v49 = vpack.c.bf16 %v4706_v42, %v4715_v45 }
 0x2ee   :  { %v662_v46 = vpack.c.bf16 %v4710_v43, %v4702_v41  ;;  %v659_v28 = vadd.f32 %v4710_v43, %v573_v36 }
 0x2f0   :  { %3073 = vmatmul.mubr.msk.bf16.vlgmr.msra.gmra.mrb[0].mxu1 %vm437_vm0, %v4627_v7  ;;  %3084 = vmatprep.subr.bf16.mxu1 %v662_v46  ;;  %v3098_v47 = vpop.f32.mrb[8].mxu0  ;;  %v892_v7 = vunpack.c.h.bf16 %v4661_v15 }
 0x2f1   :  { %3085 = vmatpush3.bf16.msra.mxu1 %v662_v46  ;;  %v799_v52 = vpop.f32.mrb[9].mxu0  ;;  %3088 = vmatprep.mubr.msk.bf16.mxu1 %vm598_vm2, %v4631_v9  ;;  %v4743_v59 = vadd.f32 %v3098_v47, %v735_v53  ;;  %v501_v46 = vadd.f32 %v4681_v25, %v419_v21 }
 0x2f2   :  { %3086 = vmatprep.subr.bf16.mxu1 %v663_v49  ;;  %v3099_v54 = vpop.f32.mrb[10].mxu0  ;;  %v4731_v56 = vadd.f32 %v799_v52, %v733_v48 }
 0x2f3   :  { %v802_v55 = vpop.f32.mrb[11].mxu0  ;;  %v4735_v57 = vadd.f32 %v3099_v54, %v736_v50 }
 0x2f4   :  { %v4739_v58 = vadd.f32 %v802_v55, %v734_v51  ;;  %v1403_v55 = vld [vmem:[#allocation22 + $0x20] sm:$0xff] }
 0x2f5   :  { %3087 = vmatpush3.bf16.msra.mxu1 %v663_v49  ;;  %v823_v61 = vpack.c.bf16 %v4735_v57, %v4743_v59  ;;  %v499_v49 = vadd.f32 %v4685_v29, %v417_v23 }
 0x2f6   :  { %v822_v60 = vpack.c.bf16 %v4739_v58, %v4731_v56 }
 0x2f8   :  { %3089 = vmatmul.mubr.msk.bf16.vlgmr.msra.gmra.mrb[4].mxu1 %vm598_vm2, %v4644_v12  ;;  %3100 = vmatprep.subr.bf16.mxu1 %v822_v60  ;;  %v3114_v63 = vpop.f32.mrb[12].mxu0 }
 0x2f9   :  { %3101 = vmatpush3.bf16.msra.mxu1 %v822_v60  ;;  %3104 = vmatprep.mubr.msk.bf16.mxu1 %vm598_vm2, %v4647_v13  ;;  %v4759_v0 = vadd.f32 %v3114_v63, %v893_v62  ;;  %v954_v3 = vpop.f32.mrb[13].mxu0  ;;  %v1404_v60 = vld [vmem:[#allocation22 + $0x28] sm:$0xff] }
 0x2fa   :  { %3102 = vmatprep.subr.bf16.mxu1 %v823_v61  ;;  %v3115_v6 = vpop.f32.mrb[14].mxu0  ;;  %v4765_v12 = vadd.f32 %v954_v3, %v891_v4 }
 0x2fb   :  { %v957_v9 = vpop.f32.mrb[15].mxu0  ;;  %v973_v10 = vadd.f32 %v4759_v0, %v893_v62 }
 0x2fc   :  { %v4769_v13 = vadd.f32 %v957_v9, %v892_v7 }
 0x2fd   :  { %3103 = vmatpush3.bf16.msra.mxu1 %v823_v61 }
 0x2fe   :  { %v974_v22 = vpack.c.bf16 %v4769_v13, %v4765_v12 }
 0x300   :  { %3105 = vmatmul.mubr.msk.bf16.vlgmr.msra.gmra.mrb[8].mxu1 %vm598_vm2, %v4656_v14  ;;  %v1036_v14 = vld [vmem:[#allocation22] sm:$0xff]  ;;  %3116 = vmatprep.subr.bf16.mxu1 %v974_v22 }
 0x301   :  { %3120 = vmatprep.mubr.msk.bf16.mxu1 %vm437_vm0, %v3343_v19  ;;  %v3251_v18 = vpack.c.bf16 %v1037_v17, %v1036_v14  ;;  %v975_v19 = vpack.c.bf16 %v4759_v0, %v4759_v0  ;;  %3117 = vmatpush3.bf16.msra.mxu1 %v974_v22 }
 0x303   :  { %3252 = vmatprep.subr.bf16.mxu0 %v3251_v18  ;;  %3289 = vmatprep.subr.msk.bf16.mxu1 %vm444_vm1, %v975_v19  ;;  %v977_v26 = vsel %vm444_vm1, %v975_v19, 0 }
 0x304   :  { %3254 = vmatpush3.bf16.msra.mxu0 %v3251_v18  ;;  %v658_v18 = vadd.f32 %v4702_v41, %v572_v34 }
 0x305   :  { %3119 = vmatpush3.bf16.msra.mxu1 %v977_v26  ;;  %3259 = vmatprep.subr.bf16.mxu0 %v4056_v27  ;;  %v661_v26 = vadd.f32 %v4706_v42, %v575_v35 }
 0x306   :  { %3256 = vmatprep.subr.bf16.mxu1 %v3255_v32 }
 0x308   :  { %3121 = vmatmul.mubr.msk.bf16.vlgmr.msra.gmra.mrb[12].mxu1 %vm437_vm0, %v4671_v20 }
 0x309   :  { %3258 = vmatpush3.bf16.msra.mxu1 %v3255_v32 }
 0x3c3   :  { %v3074_v33 = vpop.f32.mrb[0].mxu1 }
 0x3c4   :  { %v557_v37 = vadd.f32 %v3074_v33, %v4681_v25  ;;  %v541_v39 = vpop.f32.mrb[1].mxu1  ;;  %v3260_v25 = vpack.c.bf16 %v1404_v60, %v1403_v55 }
 0x3c5   :  { %v555_v40 = vadd.f32 %v541_v39, %v4685_v29  ;;  %v3075_v44 = vpop.f32.mrb[2].mxu1 }
 0x3c6   :  { %v560_v20 = vmul.f32 0.5, %v557_v37  ;;  %v544_v47 = vpop.f32.mrb[3].mxu1  ;;  %v818_v44 = vadd.f32 %v4731_v56, %v733_v48 }
 0x3c7   :  { %v558_v52 = vmul.f32 0.5, %v555_v40  ;;  %v556_v54 = vadd.f32 %v544_v47, %v4689_v30  ;;  %v660_v30 = vadd.f32 %v4715_v45, %v574_v38  ;;  %v820_v40 = vadd.f32 %v4743_v59, %v735_v53 }
 0x3c8   :  { %v4789_v61 = vadd.f32 %v560_v20, %v501_v46  ;;  %v819_v53 = vadd.f32 %v4739_v58, %v734_v51 }
 0x3c9   :  { %v4794_v63 = vadd.f32 %v558_v52, %v499_v49  ;;  %v559_v21 = vmul.f32 0.5, %v556_v54  ;;  %v821_v52 = vadd.f32 %v4735_v57, %v736_v50 }
 0x3cb   :  { %v4796_v3 = vadd.f32 %v559_v21, %v500_v2  ;;  %1224 = vrot.lane.b32.xlu1 %v4794_v63, %s4057_s24  ;;  %v3090_v23 = vpop.f32.mrb[4].mxu1  ;;  %3128 = vmatprep.mubr.msk.f32.mxu0 %vm1046_vm3, %v4794_v63  ;;  %v972_v21 = vadd.f32 %v4769_v13, %v892_v7 }
 0x3cc   :  { %v715_v29 = vadd.f32 %v3090_v23, %v4715_v45  ;;  %v698_v6 = vpop.f32.mrb[5].mxu1 }
 0x3cd   :  { %v713_v1 = vadd.f32 %v698_v6, %v4702_v41  ;;  %v3091_v24 = vpop.f32.mrb[6].mxu1  ;;  %3129 = vmatmul.mubr.msk.f32.vlgmr.msra.gmra.mrb[16].mxu0 %vm1046_vm3, %v4796_v3  ;;  %v1585_v6 = vld [vmem:[#allocation22 + $0x30] sm:$0xff] }
 0x3ce   :  { %v719_v9 = vmul.f32 0.5, %v715_v29  ;;  %v716_v14 = vadd.f32 %v3091_v24, %v4706_v42  ;;  %v701_v17 = vpop.f32.mrb[7].mxu1  ;;  %3261 = vmatpush3.bf16.msra.mxu0 %v3260_v25  ;;  %v2905_v24 = vld [vmem:[#allocation23] ss:$0 sm:$0xff] }
 0x3cf   :  { %v717_v19 = vmul.f32 0.5, %v713_v1  ;;  %v714_v22 = vadd.f32 %v701_v17, %v4710_v43  ;;  %1226 = vrot.lane.b32.xlu1 %v4796_v3, %s4057_s24  ;;  %v4059_v43 = vmov 0.0   ;;  %v1586_v1 = vld [vmem:[#allocation22 + $0x38] sm:$0xff] }
 0x3d0   :  { %v4819_v38 = vadd.f32 %v719_v9, %v660_v30  ;;  %v720_v45 = vmul.f32 0.5, %v716_v14  ;;  %v3262_v15 = vpack.c.bf16 %v1586_v1, %v1585_v6 }
 0x3d1   :  { %v4824_v31 = vadd.f32 %v717_v19, %v658_v18  ;;  %v718_v34 = vmul.f32 0.5, %v714_v22 }
 0x3d2   :  { %v4826_v41 = vadd.f32 %v720_v45, %v661_v26  ;;  %3131 = vmatprep.mubr.msk.f32.mxu0 %vm1046_vm3, %v4819_v38  ;;  %3263 = vmatprep.subr.bf16.mxu1 %v3262_v15 }
 0x3d3   :  { %v4830_v32 = vadd.f32 %v718_v34, %v659_v28  ;;  %v3106_v8 = vpop.f32.mrb[8].mxu1 }
 0x3d4   :  { %v875_v35 = vadd.f32 %v3106_v8, %v4743_v59  ;;  %v858_v42 = vpop.f32.mrb[9].mxu1  ;;  %3132 = vmatmul.mubr.msk.f32.gmra.mrb[18].mxu0 %vm1046_vm3, %v4826_v41 }
 0x3d5   :  { %v873_v5 = vadd.f32 %v858_v42, %v4731_v56  ;;  %v3107_v36 = vpop.f32.mrb[10].mxu1  ;;  %3148 = vmatprep.mubr.msk.f32.mxu0 %vm4058_vm4, %v4059_v43 }
 0x3d6   :  { %v879_v33 = vmul.f32 0.5, %v875_v35  ;;  %v876_v37 = vadd.f32 %v3107_v36, %v4735_v57  ;;  %v861_v39 = vpop.f32.mrb[11].mxu1  ;;  %v971_v57 = vadd.f32 %v4765_v12, %v891_v4 }
 0x3d7   :  { %v877_v46 = vmul.f32 0.5, %v873_v5  ;;  %v874_v20 = vadd.f32 %v861_v39, %v4739_v58 }
 0x3d8   :  { %v880_v47 = vmul.f32 0.5, %v876_v37  ;;  %3149 = vmatmul.mubr.msk.f32.vlgmr.msra.gmra.mrb[20].mxu0 %vm1046_vm3, %v4789_v61  ;;  %v4848_v49 = vadd.f32 %v879_v33, %v820_v40 }
 0x3d9   :  { %v4856_v59 = vadd.f32 %v877_v46, %v818_v44  ;;  %v878_v48 = vmul.f32 0.5, %v874_v20  ;;  %3151 = vmatprep.mubr.msk.f32.mxu0 %vm4058_vm4, %v4059_v43  ;;  %v2910_v20 = vld [vmem:[#allocation23 + $0x1] ss:$0 sm:$0xff] }
 0x3da   :  { %1214 = vrot.lane.b32.xlu0 %v4848_v49, %s4035_s22  ;;  %v4862_v56 = vadd.f32 %v880_v47, %v821_v52 }
 0x3db   :  { %v4864_v54 = vadd.f32 %v878_v48, %v819_v53  ;;  %v3122_v11 = vpop.f32.mrb[12].mxu1 }
 0x3dc   :  { %v1029_v50 = vadd.f32 %v3122_v11, %v4759_v0  ;;  %v1013_v51 = vpop.f32.mrb[13].mxu1 }
 0x3dd   :  { %v1027_v58 = vadd.f32 %v1013_v51, %v4765_v12  ;;  %v3123_v55 = vpop.f32.mrb[14].mxu1 }
 0x3de   :  { %1216 = vrot.lane.b32.xlu0 %v4862_v56, %s4035_s22  ;;  %v1032_v60 = vmul.f32 0.5, %v1029_v50  ;;  %v1016_v2 = vpop.f32.mrb[15].mxu1 }
 0x3df   :  { %v1030_v25 = vmul.f32 0.5, %v1027_v58  ;;  %v1028_v16 = vadd.f32 %v1016_v2, %v4769_v13 }
 0x3e0   :  { %v4880_v62 = vadd.f32 %v1032_v60, %v973_v10 }
 0x3e1   :  { %v4882_v0 = vadd.f32 %v1030_v25, %v971_v57  ;;  %v1031_v23 = vmul.f32 0.5, %v1028_v16  ;;  %v4916_v16 = vld [vmem:[#allocation25 + $0x1] sm:$0x1] }
 0x3e3   :  { %v4884_v29 = vadd.f32 %v1031_v23, %v972_v21 }
 0x43d   :  { %v1225_v4 = vpop.permute.xlu1 %1224 }
 0x43e   :  { %3138 = vmatprep.mubr.msk.f32.mxu1 %vm1046_vm3, %v1225_v4 }
 0x441   :  { %v1227_v12 = vpop.permute.xlu1 %1226 }
 0x442   :  { %3139 = vmatmul.mubr.msk.f32.vlgmr.msra.gmra.mrb[16].mxu1 %vm1046_vm3, %v1227_v12 }
 0x443   :  { %3265 = vmatpush3.bf16.msra.mxu1 %v3262_v15 }
 0x44c   :  { %v1215_v7 = vpop.permute.xlu0 %1214 }
 0x44d   :  { %1228 = vrot.lane.b32.xlu0 %v1215_v7, %s4057_s24 }
 0x450   :  { %v1217_v13 = vpop.permute.xlu0 %1216 }
 0x451   :  { %1230 = vrot.lane.b32.xlu1 %v1217_v13, %s4057_s24  ;;  %v2919_v13 = vld [vmem:[#allocation23 + $0x3] ss:$0 sm:$0xff] }
 0x4a0   :  { %v3130_v30 = vpop.f32.mrb[16].mxu0 }
 0x4a1   :  { %v1131_v9 = vadd.f32 %v3130_v30, %v2905_v24  ;;  %v1125_v14 = vpop.f32.mrb[17].mxu0 }
 0x4a2   :  { %v1126_v17 = vadd.f32 %v2905_v24, %v1125_v14 }
 0x4a3   :  { %3353 = vtanh.f32 %v1131_v9 }
 0x4a4   :  { %3355 = vtanh.f32 %v1126_v17 }
 0x4a7   :  { %v3133_v18 = vpop.f32.mrb[18].mxu0 }
 0x4a8   :  { %v1141_v19 = vadd.f32 %v3133_v18, %v2905_v24  ;;  %v1135_v22 = vpop.f32.mrb[19].mxu0 }
 0x4a9   :  { %v1136_v26 = vadd.f32 %v2905_v24, %v1135_v22 }
 0x4aa   :  { %3357 = vtanh.f32 %v1141_v19 }
 0x4ab   :  { %3359 = vtanh.f32 %v1136_v26  ;;  %v4890_v45 = vpop.f32.mrb[20].mxu0 }
 0x4ac   :  { %v3150_v28 = vpop.f32.mrb[21].mxu0 }
 0x4ad   :  { %v3354_v34 = vpop.eup %3353 }
 0x4ae   :  { %v3356_v8 = vpop.eup %3355  ;;  %v1149_v35 = vsel %vm1046_vm3, %v3354_v34, 0.0 }
 0x4af   :  { %v1148_v42 = vsel %vm1046_vm3, %v3356_v8, 0.0 }
 0x4b0   :  { %v4894_v5 = vadd.f32 %v1149_v35, %v1148_v42 }
 0x4b4   :  { %v3358_v36 = vpop.eup %3357 }
 0x4b5   :  { %v3360_v33 = vpop.eup %3359  ;;  %v1165_v37 = vsel %vm1046_vm3, %v3358_v36, 0.0 }
 0x4b6   :  { %v1164_v39 = vsel %vm1046_vm3, %v3360_v33, 0.0 }
 0x4b7   :  { %v4898_v40 = vadd.f32 %v1165_v37, %v1164_v39 }
 0x4bf   :  { %v1229_v44 = vpop.permute.xlu0 %1228 }
 0x4c0   :  { %3141 = vmatprep.mubr.msk.f32.mxu1 %vm1046_vm3, %v1229_v44 }
 0x4c3   :  { %v1231_v46 = vpop.permute.xlu1 %1230 }
 0x4c4   :  { %3142 = vmatmul.mubr.msk.f32.gmra.mrb[18].mxu1 %vm1046_vm3, %v1231_v46 }
 0x4c5   :  { %3161 = vmatprep.mubr.msk.f32.mxu1 %vm1046_vm3, %v4824_v31 }
 0x4c8   :  { %3162 = vmatmul.mubr.msk.f32.vlgmr.msra.gmra.mrb[20].mxu1 %vm1046_vm3, %v4830_v32 }
 0x4c9   :  { %3164 = vmatprep.mubr.msk.f32.mxu1 %vm1046_vm3, %v4856_v59 }
 0x4cc   :  { %3165 = vmatmul.mubr.msk.f32.gmra.mrb[22].mxu1 %vm1046_vm3, %v4864_v54 }
 0x4cd   :  { %3167 = vmatprep.mubr.msk.f32.mxu1 %vm1046_vm3, %v4882_v0 }
 0x4d0   :  { %3168 = vmatmul.mubr.msk.f32.gmra.mrb[24].mxu1 %vm1046_vm3, %v4884_v29 }
 0x515   :  { %v3140_v47 = vpop.f32.mrb[16].mxu1 }
 0x516   :  { %v1312_v52 = vadd.f32 %v3140_v47, %v2910_v20  ;;  %v1306_v53 = vpop.f32.mrb[17].mxu1 }
 0x517   :  { %v1307_v48 = vadd.f32 %v2910_v20, %v1306_v53 }
 0x518   :  { %3361 = vtanh.f32 %v1312_v52 }
 0x519   :  { %3363 = vtanh.f32 %v1307_v48 }
 0x522   :  { %v3362_v11 = vpop.eup %3361 }
 0x523   :  { %v3364_v10 = vpop.eup %3363  ;;  %v1330_v50 = vsel %vm1046_vm3, %v3362_v11, 0.0 }
 0x524   :  { %v1329_v51 = vsel %vm1046_vm3, %v3364_v10, 0.0 }
 0x525   :  { %v1331_v57 = vadd.f32 %v1330_v50, %v1329_v51 }
 0x527   :  { %v1332_v58 = vrot.slane %v1331_v57, 4 }
 0x529   :  { %v1333_v55 = vadd.f32 %v1332_v58, %v1331_v57 }
 0x52b   :  { %v1334_v60 = vrot.slane %v1333_v55, 2 }
 0x52d   :  { %v1335_v2 = vadd.f32 %v1334_v60, %v1333_v55 }
 0x52f   :  { %v1336_v21 = vrot.slane %v1335_v2, 1 }
 0x531   :  { %v1337_v25 = vadd.f32 %v1336_v21, %v1335_v2 }
 0x533   :  { %v1338_v23 = vmul.f32 0.0625, %v1337_v25 }
 0x535   :  { %v1339_v4 = vmul.f32 %v1338_v23, %v4916_v16 }
 0x537   :  { %v1340_v12 = vsel %vm1160_vm5, %v1339_v4, 0.0 }
 0x538   :  { %1341 = vadd.xlane.f32.xlu0 %v1340_v12 }
 0x597   :  { %v3143_v6 = vpop.f32.mrb[18].mxu1 }
 0x598   :  { %v1322_v1 = vadd.f32 %v3143_v6, %v2910_v20  ;;  %v1316_v15 = vpop.f32.mrb[19].mxu1 }
 0x599   :  { %v1317_v7 = vadd.f32 %v2910_v20, %v1316_v15 }
 0x59a   :  { %3365 = vtanh.f32 %v1322_v1 }
 0x59b   :  { %3367 = vtanh.f32 %v1317_v7  ;;  %v3163_v24 = vpop.f32.mrb[20].mxu1 }
 0x59c   :  { %v1687_v30 = vadd.f32 %v3163_v24, %v2919_v13  ;;  %v1681_v9 = vpop.f32.mrb[21].mxu1 }
 0x59d   :  { %v1682_v14 = vadd.f32 %v2919_v13, %v1681_v9 }
 0x59e   :  { %3369 = vtanh.f32 %v1687_v30 }
 0x59f   :  { %3371 = vtanh.f32 %v1682_v14  ;;  %v3166_v17 = vpop.f32.mrb[22].mxu1 }
 0x5a0   :  { %v1697_v18 = vadd.f32 %v3166_v17, %v2919_v13  ;;  %v1691_v19 = vpop.f32.mrb[23].mxu1 }
 0x5a1   :  { %v1692_v22 = vadd.f32 %v2919_v13, %v1691_v19 }
 0x5a2   :  { %3373 = vtanh.f32 %v1697_v18 }
 0x5a3   :  { %3375 = vtanh.f32 %v1692_v22  ;;  %v3169_v26 = vpop.f32.mrb[24].mxu1 }
 0x5a4   :  { %v3366_v28 = vpop.eup %3365  ;;  %v1707_v34 = vadd.f32 %v3169_v26, %v2919_v13  ;;  %v1701_v8 = vpop.f32.mrb[25].mxu1  ;;  %v1590_v26 = vld [vmem:[#allocation25 + $0x3] sm:$0x1] }
 0x5a5   :  { %v3368_v35 = vpop.eup %3367  ;;  %v1702_v42 = vadd.f32 %v2919_v13, %v1701_v8  ;;  %v1344_v36 = vsel %vm1046_vm3, %v3366_v28, 0.0 }
 0x5a6   :  { %3377 = vtanh.f32 %v1707_v34  ;;  %v1343_v33 = vsel %vm1046_vm3, %v3368_v35, 0.0 }
 0x5a7   :  { %3379 = vtanh.f32 %v1702_v42  ;;  %v1345_v37 = vadd.f32 %v1344_v36, %v1343_v33 }
 0x5a8   :  { %v3370_v39 = vpop.eup %3369 }
 0x5a9   :  { %v3372_v44 = vpop.eup %3371  ;;  %v1346_v46 = vrot.slane %v1345_v37, 4  ;;  %v1717_v20 = vsel %vm1046_vm3, %v3370_v39, 0.0 }
 0x5aa   :  { %v1716_v47 = vsel %vm1046_vm3, %v3372_v44, 0.0 }
 0x5ab   :  { %v1347_v52 = vadd.f32 %v1346_v46, %v1345_v37  ;;  %v1718_v53 = vadd.f32 %v1717_v20, %v1716_v47 }
 0x5ac   :  { %v3374_v48 = vpop.eup %3373 }
 0x5ad   :  { %v3376_v11 = vpop.eup %3375  ;;  %v1348_v10 = vrot.slane %v1347_v52, 2  ;;  %v1719_v50 = vrot.slane %v1718_v53, 4  ;;  %v1731_v51 = vsel %vm1046_vm3, %v3374_v48, 0.0 }
 0x5ae   :  { %v1730_v57 = vsel %vm1046_vm3, %v3376_v11, 0.0 }
 0x5af   :  { %v1349_v58 = vadd.f32 %v1348_v10, %v1347_v52  ;;  %v1720_v55 = vadd.f32 %v1719_v50, %v1718_v53  ;;  %v1732_v60 = vadd.f32 %v1731_v51, %v1730_v57 }
 0x5b0   :  { %v3378_v2 = vpop.eup %3377 }
 0x5b1   :  { %v3380_v21 = vpop.eup %3379  ;;  %v1350_v25 = vrot.slane %v1349_v58, 1  ;;  %v1721_v23 = vrot.slane %v1720_v55, 2  ;;  %v1733_v4 = vrot.slane %v1732_v60, 4  ;;  %v1745_v12 = vsel %vm1046_vm3, %v3378_v2, 0.0 }
 0x5b2   :  { %v1744_v6 = vsel %vm1046_vm3, %v3380_v21, 0.0 }
 0x5b3   :  { %v1351_v1 = vadd.f32 %v1350_v25, %v1349_v58  ;;  %v1722_v15 = vadd.f32 %v1721_v23, %v1720_v55  ;;  %v1734_v7 = vadd.f32 %v1733_v4, %v1732_v60  ;;  %v1746_v13 = vadd.f32 %v1745_v12, %v1744_v6 }
 0x5b5   :  { %v1352_v24 = vmul.f32 0.0625, %v1351_v1  ;;  %v1723_v30 = vrot.slane %v1722_v15, 1  ;;  %v1735_v9 = vrot.slane %v1734_v7, 2  ;;  %v1747_v14 = vrot.slane %v1746_v13, 4 }
 0x5b7   :  { %v1353_v17 = vmul.f32 %v1352_v24, %v4916_v16  ;;  %v1724_v18 = vadd.f32 %v1723_v30, %v1722_v15  ;;  %v1736_v19 = vadd.f32 %v1735_v9, %v1734_v7  ;;  %v1748_v22 = vadd.f32 %v1747_v14, %v1746_v13 }
 0x5b8   :  { %v1188_v30 = vlaneseq }
 0x5b9   :  { %v1354_v28 = vsel %vm1160_vm5, %v1353_v17, 0.0  ;;  %v1725_v34 = vmul.f32 0.0625, %v1724_v18  ;;  %v1737_v8 = vrot.slane %v1736_v19, 1  ;;  %v1749_v35 = vrot.slane %v1748_v22, 2 }
 0x5ba   :  { %1355 = vadd.xlane.f32.xlu1 %v1354_v28  ;;  %v1189_v9 = vshrl.u32 %v1188_v30, 7 }
 0x5bb   :  { %v1726_v42 = vmul.f32 %v1725_v34, %v1590_v26  ;;  %v1738_v36 = vadd.f32 %v1737_v8, %v1736_v19  ;;  %v1750_v33 = vadd.f32 %v1749_v35, %v1748_v22 }
 0x5bc   :  { %v4933_v18 = vsub.s32 0, %v1189_v9  ;;  %v3345_v9 = vld [vmem:[#allocation19] sm:$0xff]  }
 0x5bd   :  { %v1727_v37 = vsel %vm1160_vm5, %v1726_v42, 0.0  ;;  %v1739_v39 = vmul.f32 0.0625, %v1738_v36  ;;  %v1751_v44 = vrot.slane %v1750_v33, 1  ;;  %v1151_v42 = vrot.slane %v4894_v5, 4  ;;  %3182 = vmatprep.mubr.msk.bf16.mxu1 %vm598_vm2, %v3345_v9 }
 0x5be   :  { %1728 = vadd.xlane.f32.xlu0 %v1727_v37 }
 0x5bf   :  { %v1740_v46 = vmul.f32 %v1739_v39, %v1590_v26  ;;  %v1752_v16 = vadd.f32 %v1751_v44, %v1750_v33  ;;  %v1152_v37 = vadd.f32 %v1151_v42, %v4894_v5  ;;  %v1167_v39 = vrot.slane %v4898_v40, 4 }
 0x5c1   :  { %v1741_v20 = vsel %vm1160_vm5, %v1740_v46, 0.0  ;;  %v1753_v47 = vmul.f32 0.0625, %v1752_v16  ;;  %v1153_v44 = vrot.slane %v1152_v37, 2  ;;  %v1168_v16 = vadd.f32 %v1167_v39, %v4898_v40 }
 0x5c2   :  { %1742 = vadd.xlane.f32.xlu1 %v1741_v20 }
 0x5c3   :  { %v1754_v52 = vmul.f32 %v1753_v47, %v1590_v26 }
 0x5c5   :  { %v1755_v53 = vsel %vm1160_vm5, %v1754_v52, 0.0  ;;  %v1342_v48 = vpop.xlane.xlu0 %1341 }
 0x5c6   :  { %1756 = vadd.xlane.f32.xlu0 %v1755_v53  ;;  %v1154_v53 = vadd.f32 %v1153_v44, %v1152_v37  ;;  %v4974_v37 = vld [vmem:[#allocation25 + $0x2] sm:$0x1] }
 0x5c8   :  { %v1155_v40 = vrot.slane %v1154_v53, 1 }
 0x647   :  { %v1356_v11 = vpop.xlane.xlu1 %1355 }
 0x648   :  { %v1357_v10 = vmax.f32 %v1342_v48, %v1356_v11 }
 0x64a   :  { %v1358_v50 = vsub.f32 %v1342_v48, %v1357_v10  ;;  %v1361_v51 = vsub.f32 %v1356_v11, %v1357_v10  ;;  %v1169_v11 = vrot.slane %v1168_v16, 2 }
 0x64b   :  { %v1729_v55 = vpop.xlane.xlu0 %1728 }
 0x64c   :  { %v1359_v57 = vmul.f32 1.442695, %v1358_v50  ;;  %v1362_v58 = vmul.f32 1.442695, %v1361_v51 }
 0x64e   :  { %3381 = vpow2.f32 %v1359_v57 }
 0x64f   :  { %3383 = vpow2.f32 %v1362_v58  ;;  %v1743_v60 = vpop.xlane.xlu1 %1742 }
 0x650   :  { %v1758_v2 = vmax.f32 %v1729_v55, %v1743_v60 }
 0x653   :  { %v1757_v21 = vpop.xlane.xlu0 %1756 }
 0x654   :  { %v1759_v25 = vmax.f32 %v1758_v2, %v1757_v21  ;;  %v1170_v2 = vadd.f32 %v1169_v11, %v1168_v16 }
 0x656   :  { %v1760_v23 = vsub.f32 %v1729_v55, %v1759_v25  ;;  %v1763_v4 = vsub.f32 %v1743_v60, %v1759_v25  ;;  %v1766_v12 = vsub.f32 %v1757_v21, %v1759_v25 }
 0x658   :  { %v3382_v6 = vpop.eup %3381  ;;  %v1761_v1 = vmul.f32 1.442695, %v1760_v23  ;;  %v1764_v15 = vmul.f32 1.442695, %v1763_v4  ;;  %v1767_v13 = vmul.f32 1.442695, %v1766_v12 }
 0x659   :  { %v3384_v7 = vpop.eup %3383  ;;  %v1171_v23 = vrot.slane %v1170_v2, 1 }
 0x65a   :  { %v1364_v24 = vadd.f32 %v3384_v7, %v3382_v6  ;;  %3385 = vpow2.f32 %v1761_v1 }
 0x65b   :  { %3387 = vpow2.f32 %v1764_v15  ;;  %v1172_v4 = vadd.f32 %v1171_v23, %v1170_v2  ;;  %v4961_v15 = vld [vmem:[#allocation23 + $0x2] ss:$0 sm:$0xff] }
 0x65c   :  { %3389 = vrcp.f32 %v1364_v24 }
 0x65d   :  { %3391 = vpow2.f32 %v1767_v13 }
 0x664   :  { %v3386_v14 = vpop.eup %3385 }
 0x665   :  { %v3388_v17 = vpop.eup %3387 }
 0x666   :  { %v3390_v19 = vpop.eup %3389  ;;  %v1769_v22 = vadd.f32 %v3388_v17, %v3386_v14 }
 0x667   :  { %v3392_v26 = vpop.eup %3391  ;;  %v1375_v28 = vmul.f32 %v3390_v19, %v3384_v7  ;;  %v1366_v34 = vmul.f32 %v3390_v19, %v3382_v6  ;;  %v1173_v6 = vmul.f32 0.0625, %v1172_v4  ;;  %v1492_v7 = vadd.f32 %v4961_v15, %v4890_v45 }
 0x668   :  { %v1770_v8 = vadd.f32 %v3392_v26, %v1769_v22 }
 0x669   :  { %v1379_v35 = vrot.slane %v1375_v28, %v4933_v18  ;;  %v1370_v24 = vrot.slane %v1366_v34, %v4933_v18 }
 0x66a   :  { %3393 = vrcp.f32 %v1770_v8 }
 0x66b   :  { %v1381_v36 = vmul.f32 %v1379_v35, %v4862_v56  ;;  %v1380_v33 = vmul.f32 %v1379_v35, %v4848_v49  ;;  %3395 = vtanh.f32 %v1492_v7 }
 0x66d   :  { %1386 = vrot.lane.b32.xlu1 %v1381_v36, %s4035_s22  ;;  %1384 = vrot.lane.b32.xlu0 %v1380_v33, %s4035_s22  ;;  %s5056_s22 = sld [smem:[#allocation42 + $0x1]] }
 0x673   :  { %s2008_s26 = scalar_lea.vmem [#allocation20], %s5056_s22  ;;  %s2862_s19 = scalar_lea.vmem [#allocation2], %s5056_s22 }
 0x674   :  { %v3394_v46 = vpop.eup %3393 }
 0x675   :  { %v1772_v20 = vmul.f32 %v3394_v46, %v3386_v14  ;;  %v1781_v47 = vmul.f32 %v3394_v46, %v3388_v17  ;;  %v1790_v52 = vmul.f32 %v3394_v46, %v3392_v26  ;;  %v3396_v13 = vpop.eup %3395  ;;  %v1371_v14 = vmul.f32 %v1370_v24, %v4794_v63 }
 0x676   :  { %v1508_v30 = vsel %vm1046_vm3, %v3396_v13, 0.0  ;;  %v1372_v17 = vmul.f32 %v1370_v24, %v4796_v3 }
 0x677   :  { %v1776_v56 = vrot.slane %v1772_v20, %v4933_v18  ;;  %v1785_v49 = vrot.slane %v1781_v47, %v4933_v18  ;;  %v1794_v48 = vrot.slane %v1790_v52, %v4933_v18  ;;  %v1509_v8 = vrot.slane %v1508_v30, 4 }
 0x679   :  { %v1777_v10 = vmul.f32 %v1776_v56, %v4824_v31  ;;  %v1778_v5 = vmul.f32 %v1776_v56, %v4830_v32  ;;  %v1786_v50 = vmul.f32 %v1785_v49, %v4856_v59  ;;  %v1787_v51 = vmul.f32 %v1785_v49, %v4864_v54  ;;  %v1039_v54 = vld [vmem:[#allocation25] sm:$0x1] }
 0x67a   :  { %v1795_v55 = vmul.f32 %v1794_v48, %v4882_v0  ;;  %v1796_v60 = vmul.f32 %v1794_v48, %v4884_v29  ;;  %v1156_v32 = vadd.f32 %v1155_v40, %v1154_v53  ;;  %v1174_v29 = vmul.f32 %v1173_v6, %v1039_v54 }
 0x67b   :  { %v1788_v57 = vadd.f32 %v1786_v50, %v1777_v10  ;;  %v1789_v58 = vadd.f32 %v1787_v51, %v1778_v5  ;;  %v1510_v45 = vadd.f32 %v1509_v8, %v1508_v30 }
 0x67c   :  { %v1158_v59 = vmul.f32 0.0625, %v1156_v32  ;;  %v1175_v1 = vsel %vm1160_vm5, %v1174_v29, 0.0 }
 0x67d   :  { %v4953_v21 = vadd.f32 %v1795_v55, %v1788_v57  ;;  %v4955_v25 = vadd.f32 %v1796_v60, %v1789_v58  ;;  %v1511_v34 = vrot.slane %v1510_v45, 2 }
 0x67e   :  { %v1159_v12 = vmul.f32 %v1158_v59, %v1039_v54 }
 0x67f   :  { %v1803_v31 = vpack.c.bf16 %v4955_v25, %v4953_v21  ;;  %v1512_v35 = vadd.f32 %v1511_v34, %v1510_v45 }
 0x680   :  { %v1161_v0 = vsel %vm1160_vm5, %v1159_v12, 0.0 }
 0x681   :  { %3170 = vmatprep.subr.bf16.mxu0 %v1803_v31  ;;  %v1513_v42 = vrot.slane %v1512_v35, 1 }
 0x682   :  { %3171 = vmatpush3.bf16.msra.mxu0 %v1803_v31 }
 0x683   :  { %v1514_v36 = vadd.f32 %v1513_v42, %v1512_v35 }
 0x685   :  { %v1516_v33 = vmul.f32 0.125, %v1514_v36 }
 0x687   :  { %v1517_v39 = vmul.f32 %v1516_v33, %v4974_v37 }
 0x689   :  { %v1518_v44 = vsel %vm1160_vm5, %v1517_v39, 0.0 }
 0x68c   :  { %1162 = vadd.xlane.f32.xlu0 %v1161_v0 }
 0x691   :  { %1176 = vadd.xlane.f32.xlu1 %v1175_v1 }
 0x6df   :  { %v1385_v19 = vpop.permute.xlu0 %1384  ;;  %v1387_v22 = vpop.permute.xlu1 %1386 }
 0x6e0   :  { %v1390_v26 = vadd.f32 %v1385_v19, %v1371_v14  ;;  %v1391_v28 = vadd.f32 %v1387_v22, %v1372_v17 }
 0x6e2   :  { %1396 = vrot.lane.b32.xlu1 %v1391_v28, %s4057_s24  ;;  %1394 = vrot.lane.b32.xlu0 %v1390_v26, %s4057_s24 }
 0x6e6   :  { %1410 = vrot.lane.b32.xlu1 %v4789_v61, %s4057_s24 }
 0x701   :  { %1519 = vadd.xlane.f32.xlu0 %v1518_v44 }
 0x719   :  { %v1163_v46 = vpop.xlane.xlu0 %1162 }
 0x71e   :  { %v1177_v16 = vpop.xlane.xlu1 %1176 }
 0x71f   :  { %v1178_v20 = vmax.f32 %v1163_v46, %v1177_v16 }
 0x721   :  { %v1179_v47 = vsub.f32 %v1163_v46, %v1178_v20  ;;  %v1182_v52 = vsub.f32 %v1177_v16, %v1178_v20 }
 0x723   :  { %v1180_v53 = vmul.f32 1.442695, %v1179_v47  ;;  %v1183_v56 = vmul.f32 1.442695, %v1182_v52 }
 0x725   :  { %3397 = vpow2.f32 %v1180_v53 }
 0x726   :  { %3399 = vpow2.f32 %v1183_v56 }
 0x72f   :  { %v3398_v49 = vpop.eup %3397 }
 0x730   :  { %v3400_v48 = vpop.eup %3399 }
 0x731   :  { %v1185_v11 = vadd.f32 %v3400_v48, %v3398_v49 }
 0x733   :  { %3401 = vrcp.f32 %v1185_v11 }
 0x73d   :  { %v3402_v10 = vpop.eup %3401 }
 0x73e   :  { %v1187_v5 = vmul.f32 %v3402_v10, %v3398_v49  ;;  %v1196_v50 = vmul.f32 %v3402_v10, %v3400_v48 }
 0x740   :  { %v1191_v51 = vrot.slane %v1187_v5, %v4933_v18  ;;  %v1200_v40 = vrot.slane %v1196_v50, %v4933_v18 }
 0x742   :  { %v1193_v57 = vmul.f32 %v1191_v51, %v4796_v3  ;;  %v1202_v58 = vmul.f32 %v1200_v40, %v4826_v41  ;;  %v1192_v55 = vmul.f32 %v1191_v51, %v4794_v63  ;;  %v1201_v60 = vmul.f32 %v1200_v40, %v4819_v38  ;;  %v4995_v63 = vld [vmem:[#allocation19 + $0x8] sm:$0xff]  }
 0x744   :  { %v1204_v2 = vadd.f32 %v1202_v58, %v1193_v57  ;;  %v1203_v31 = vadd.f32 %v1201_v60, %v1192_v55 }
 0x754   :  { %v1397_v32 = vpop.permute.xlu1 %1396  ;;  %v1395_v23 = vpop.permute.xlu0 %1394 }
 0x755   :  { %v4984_v59 = vmul.f32 %v1397_v32, %v1204_v2  ;;  %v4986_v54 = vmul.f32 %v1395_v23, %v1203_v31 }
 0x757   :  { %v1804_v4 = vpack.c.bf16 %v4984_v59, %v4986_v54 }
 0x758   :  { %v1411_v12 = vpop.permute.xlu1 %1410 }
 0x759   :  { %3152 = vmatmul.mubr.msk.f32.gmra.mrb[22].mxu0 %vm1046_vm3, %v1411_v12  ;;  %3172 = vmatprep.subr.bf16.mxu0 %v1804_v4 }
 0x75a   :  { %3173 = vmatpush3.bf16.msra.mxu0 %v1804_v4  ;;  %3154 = vmatprep.mubr.msk.f32.mxu0 %vm4058_vm4, %v4059_v43 }
 0x75d   :  { %3155 = vmatmul.mubr.msk.f32.gmra.mrb[24].mxu0 %vm1046_vm3, %v4880_v62 }
 0x75e   :  { %3174 = vmatprep.mubr.msk.bf16.mxu0 %vm598_vm2, %v3345_v9 }
 0x761   :  { %3175 = vmatmul.mubr.msk.bf16.vlgmr.msra.gmra.mrb[28].mxu0 %vm598_vm2, %v4995_v63 }
 0x762   :  { %3190 = vmatprep.mubr.msk.bf16.mxu0 %vm598_vm2, %v3345_v9 }
 0x78e   :  { %v1520_v56 = vpop.xlane.xlu0 %1519 }
 0x82c   :  { %v1496_v3 = vpop.f32.mrb[22].mxu0 }
 0x82d   :  { %v1497_v38 = vadd.f32 %v4961_v15, %v1496_v3  ;;  %v3153_v41 = vpop.f32.mrb[23].mxu0 }
 0x82f   :  { %3403 = vtanh.f32 %v1497_v38 }
 0x830   :  { %v1501_v6 = vpop.f32.mrb[24].mxu0 }
 0x831   :  { %v1502_v0 = vadd.f32 %v4961_v15, %v1501_v6  ;;  %v3156_v29 = vpop.f32.mrb[25].mxu0 }
 0x833   :  { %3405 = vtanh.f32 %v1502_v0 }
 0x834   :  { %v5003_v1 = vpop.f32.mrb[28].mxu0 }
 0x835   :  { %v5005_v7 = vpop.f32.mrb[29].mxu0  ;;  %v1872_v41 = vadd.f32 %v5003_v1, %v4986_v54 }
 0x836   :  { %v5007_v13 = vpop.f32.mrb[30].mxu0  ;;  %v1870_v6 = vadd.f32 %v5005_v7, %v4953_v21 }
 0x837   :  { %v1875_v24 = vpack.c.bf16 %v5007_v13, %v5003_v1  ;;  %v5011_v30 = vpop.f32.mrb[31].mxu0  ;;  %v1873_v29 = vadd.f32 %v5007_v13, %v4984_v59  ;;  %v2240_v59 = vld [vmem:[#allocation26 + $0x20] sm:$0xff] }
 0x838   :  { %v1874_v9 = vpack.c.bf16 %v5011_v30, %v5005_v7  ;;  %v2241_v7 = vld [vmem:[#allocation26 + $0x28] sm:$0xff] }
 0x839   :  { %v3404_v14 = vpop.eup %3403  ;;  %v3273_v13 = vpack.c.bf16 %v2241_v7, %v2240_v59 }
 0x83a   :  { %3178 = vmatprep.subr.bf16.mxu1 %v1874_v9  ;;  %v1521_v15 = vsel %vm1046_vm3, %v3404_v14, 0.0  ;;  %v1871_v14 = vadd.f32 %v5011_v30, %v4955_v25 }
 0x83b   :  { %3179 = vmatpush3.bf16.msra.mxu1 %v1874_v9  ;;  %v1522_v17 = vrot.slane %v1521_v15, 4 }
 0x83c   :  { %3180 = vmatprep.subr.bf16.mxu1 %v1875_v24 }
 0x83d   :  { %v3406_v19 = vpop.eup %3405  ;;  %v1523_v22 = vadd.f32 %v1522_v17, %v1521_v15 }
 0x83e   :  { %v1533_v26 = vsel %vm1046_vm3, %v3406_v19, 0.0 }
 0x83f   :  { %3181 = vmatpush3.bf16.msra.mxu1 %v1875_v24  ;;  %v1524_v28 = vrot.slane %v1523_v22, 2  ;;  %v1534_v8 = vrot.slane %v1533_v26, 4 }
 0x840   :  { %3266 = vmatprep.subr.bf16.mxu1 %v4056_v27 }
 0x841   :  { %v1525_v45 = vadd.f32 %v1524_v28, %v1523_v22  ;;  %v1535_v34 = vadd.f32 %v1534_v8, %v1533_v26 }
 0x842   :  { %3183 = vmatmul.mubr.msk.bf16.vlgmr.msra.gmra.mrb[28].mxu1 %vm598_vm2, %v4995_v63 }
 0x843   :  { %v1526_v35 = vrot.slane %v1525_v45, 1  ;;  %v1536_v42 = vrot.slane %v1535_v34, 2  ;;  %3198 = vmatprep.mubr.msk.f32.mxu1 %vm4058_vm4, %v4059_v43 }
 0x845   :  { %v1527_v36 = vadd.f32 %v1526_v35, %v1525_v45  ;;  %v1537_v33 = vadd.f32 %v1536_v42, %v1535_v34  ;;  %v2073_v35 = vld [vmem:[#allocation26] sm:$0xff]  ;;  %v2074_v42 = vld [vmem:[#allocation26 + $0x8] sm:$0xff] }
 0x847   :  { %v1528_v39 = vmul.f32 0.125, %v1527_v36  ;;  %v1538_v44 = vrot.slane %v1537_v33, 1 }
 0x849   :  { %v1529_v46 = vmul.f32 %v1528_v39, %v4974_v37  ;;  %v1539_v16 = vadd.f32 %v1538_v44, %v1537_v33  ;;  %v2000_v33 = vld [vmem:[%s1999_s9] sm:$0x1] }
 0x84a   :  { %v2027_v39 = vld [vmem:[%s2026_s20] sm:$0x1] }
 0x84b   :  { %v1530_v20 = vsel %vm1160_vm5, %v1529_v46, 0.0  ;;  %v1540_v47 = vmul.f32 0.125, %v1539_v16  ;;  %v2062_v16 = vrot.slane %v2027_v39, 5  ;;  %v2738_v39 = vld [vmem:[#allocation3] sm:$0x1] }
 0x84c   :  { %1531 = vadd.xlane.f32.xlu1 %v1530_v20 }
 0x84d   :  { %v1541_v52 = vmul.f32 %v1540_v47, %v4974_v37 }
 0x84f   :  { %v1542_v53 = vsel %vm1160_vm5, %v1541_v52, 0.0 }
 0x850   :  { %1543 = vadd.xlane.f32.xlu0 %v1542_v53 }
 0x8d9   :  { %v1532_v49 = vpop.xlane.xlu1 %1531 }
 0x8da   :  { %v1545_v48 = vmax.f32 %v1520_v56, %v1532_v49 }
 0x8dd   :  { %v1544_v11 = vpop.xlane.xlu0 %1543 }
 0x8de   :  { %v1546_v10 = vmax.f32 %v1545_v48, %v1544_v11  ;;  %v4060_v48 = vmov 0  }
 0x8df   :  { %3327 = vset.pattern.permute.xlu1 %v4060_v48  ;;  %3328 = vset.pattern.permute.xlu0 %v4060_v48 }
 0x8e0   :  { %v1547_v5 = vsub.f32 %v1520_v56, %v1546_v10  ;;  %v1550_v50 = vsub.f32 %v1532_v49, %v1546_v10  ;;  %v1553_v51 = vsub.f32 %v1544_v11, %v1546_v10  ;;  %v5071_v56 = vld [vmem:[#allocation40] sm:$0xf] }
 0x8e1   :  { %v2325_v49 = vsel %vm2324_vm9, %v5071_v56, 0.0 }
 0x8e2   :  { %v1548_v40 = vmul.f32 1.442695, %v1547_v5  ;;  %v1551_v57 = vmul.f32 1.442695, %v1550_v50  ;;  %v1554_v58 = vmul.f32 1.442695, %v1553_v51  ;;  %2326 = vadd.xlane.f32.xlu1 %v2325_v49 }
 0x8e3   :  { %v2432_v5 = vld [vmem:[#allocation31 + $0x8] sm:$0xff]  ;;  %v2433_v50 = vld [vmem:[#allocation31 + $0x10] sm:$0xff]  ;;  %v2947_v49 = vld [vmem:[#allocation28 + $0x1] ss:$0 sm:$0xff] }
 0x8e4   :  { %3407 = vpow2.f32 %v1548_v40  ;;  %v2561_v51 = vld [vmem:[#allocation34] sm:$0xff]  ;;  %v2657_v40 = vld [vmem:[#allocation37] sm:$0xff] }
 0x8e5   :  { %3409 = vpow2.f32 %v1551_v57 }
 0x8e6   :  { %3411 = vpow2.f32 %v1554_v58 }
 0x8ee   :  { %v3408_v55 = vpop.eup %3407 }
 0x8ef   :  { %v3410_v60 = vpop.eup %3409 }
 0x8f0   :  { %v1556_v37 = vadd.f32 %v3410_v60, %v3408_v55  ;;  %v3412_v2 = vpop.eup %3411 }
 0x8f2   :  { %v1557_v31 = vadd.f32 %v3412_v2, %v1556_v37 }
 0x8f4   :  { %3413 = vrcp.f32 %v1557_v31 }
 0x8fe   :  { %v3414_v32 = vpop.eup %3413 }
 0x8ff   :  { %v1566_v23 = vmul.f32 %v3414_v32, %v3410_v60  ;;  %v1577_v4 = vmul.f32 %v3414_v32, %v3412_v2  ;;  %v1559_v12 = vmul.f32 %v3414_v32, %v3408_v55 }
 0x901   :  { %v1570_v3 = vrot.slane %v1566_v23, %v4933_v18  ;;  %v1563_v25 = vrot.slane %v1559_v12, %v4933_v18  ;;  %v1581_v30 = vrot.slane %v1577_v4, %v4933_v18 }
 0x903   :  { %v1571_v38 = vmul.f32 %v1570_v3, %v4789_v61  ;;  %v1564_v26 = vmul.f32 %v1563_v25, %v4789_v61  ;;  %v1582_v8 = vmul.f32 %v1581_v30, %v4880_v62  ;;  %v2009_v61 = vld [vmem:[%s2008_s26] sm:$0x1] }
 0x904   :  { %v2018_v62 = vld [vmem:[%s2017_s7] sm:$0x1]  ;;  %v2056_v36 = vrot.slane %v2009_v61, 7  ;;  %v2431_v61 = vld [vmem:[#allocation31] sm:$0xff] }
 0x905   :  { %1573 = vrot.lane.b32.xlu0 %v1571_v38, %s4057_s24  ;;  %v2059_v44 = vrot.slane %v2018_v62, 6  ;;  %v2156_v38 = vld [vmem:[#allocation26 + $0x10] sm:$0xff] }
 0x906   :  { %v2064_v46 = vsel %vm2037_vm6, %v2000_v33, %v2056_v36  ;;  %v2434_v62 = vld [vmem:[#allocation31 + $0x18] sm:$0xff] }
 0x907   :  { %v2065_v20 = vsel %vm2039_vm7, %v2064_v46, %v2059_v44  ;;  %v2562_v36 = vld [vmem:[#allocation34 + $0x8] sm:$0xff] }
 0x908   :  { %v2066_v47 = vsel %vm2041_vm8, %v2065_v20, %v2062_v16 }
 0x909   :  { %v2944_v52 = vmul.f32 -1.442695, %v2066_v47  ;;  %2437 = vperm.xlu0 %3328, %v2431_v61  }
 0x90b   :  { %3415 = vpow2.f32 %v2944_v52 }
 0x90d   :  { %2452 = vperm.xlu0 %3328, %v2434_v62  }
 0x911   :  { %2570 = vperm.xlu0 %3328, %v2562_v36   ;;  %v2656_v36 = vld [vmem:[#allocation35] sm:$0xff] }
 0x915   :  { %v3184_v0 = vpop.f32.mrb[28].mxu1  ;;  %v3416_v53 = vpop.eup %3415  ;;  %2741 = vperm.xlu0 %3328, %v2738_v39  }
 0x916   :  { %v5035_v24 = vadd.f32 %v3184_v0, %v1872_v41  ;;  %v1910_v9 = vpop.f32.mrb[29].mxu1  ;;  %v2070_v11 = vadd.f32 1.0, %v3416_v53  ;;  %v2157_v41 = vld [vmem:[#allocation26 + $0x18] sm:$0xff]  ;;  %v2945_v53 = vld [vmem:[#allocation28] ss:$0 sm:$0xff] }
 0x917   :  { %v5039_v15 = vadd.f32 %v1910_v9, %v1870_v6  ;;  %v3185_v17 = vpop.f32.mrb[30].mxu1 }
 0x918   :  { %v5041_v19 = vadd.f32 %v3185_v17, %v1873_v29  ;;  %v1930_v22 = vpack.c.bf16 %v3185_v17, %v3184_v0  ;;  %v1913_v54 = vpop.f32.mrb[31].mxu1  ;;  %3417 = vrcp.f32 %v2070_v11 }
 0x919   :  { %v5043_v1 = vadd.f32 %v1913_v54, %v1871_v14  ;;  %v1929_v21 = vpack.c.bf16 %v1913_v54, %v1910_v9 }
 0x91b   :  { %3186 = vmatprep.subr.bf16.mxu0 %v1929_v21 }
 0x91c   :  { %3187 = vmatpush3.bf16.msra.mxu0 %v1929_v21 }
 0x91d   :  { %3188 = vmatprep.subr.bf16.mxu0 %v1930_v22 }
 0x920   :  { %3189 = vmatpush3.bf16.msra.mxu0 %v1930_v22 }
 0x921   :  { %3272 = vmatprep.subr.bf16.mxu0 %v4056_v27 }
 0x922   :  { %v3418_v10 = vpop.eup %3417 }
 0x923   :  { %3191 = vmatmul.mubr.msk.bf16.vlgmr.msra.gmra.mrb[32].mxu0 %vm598_vm2, %v4995_v63  ;;  %v3267_v63 = vpack.c.bf16 %v2074_v42, %v2073_v35  ;;  %2422 = vperm.xlu1 %3327, %v3418_v10  }
 0x924   :  { %3274 = vmatpush3.bf16.msra.mxu0 %v3273_v13  ;;  %3212 = vmatprep.mubr.msk.f32.mxu0 %vm4058_vm4, %v4059_v43 }
 0x925   :  { %3268 = vmatpush3.bf16.msra.mxu1 %v3267_v63  ;;  %v2427_v63 = vld [vmem:[#allocation29] sm:$0xff] }
 0x926   :  { %3269 = vmatprep.subr.bf16.mxu1 %v4056_v27 }
 0x927   :  { %2442 = vperm.xlu1 %3327, %v2432_v5  }
 0x92b   :  { %2447 = vperm.xlu1 %3327, %v2433_v50  }
 0x92f   :  { %2565 = vperm.xlu1 %3327, %v2561_v51  }
 0x933   :  { %2660 = vperm.xlu1 %3327, %v2657_v40  }
 0x96f   :  { %v2327_v20 = vpop.xlane.xlu1 %2326 }
 0x970   :  { %v2328_v47 = vmax.f32 %v2327_v20, 1.0 }
 0x972   :  { %3419 = vrcp.f32 %v2328_v47 }
 0x977   :  { %v1574_v28 = vpop.permute.xlu0 %1573 }
 0x978   :  { %v1576_v45 = vadd.f32 %v1574_v28, %v1564_v26 }
 0x97a   :  { %v1583_v34 = vadd.f32 %v1582_v8, %v1576_v45  ;;  %v2949_v45 = vld [vmem:[#allocation28 + $0x2] ss:$0 sm:$0xff] }
 0x97c   :  { %3213 = vmatmul.mubr.msk.f32.vlgmr.msra.gmra.mrb[26].mxu0 %vm1046_vm3, %v1583_v34  ;;  %v3420_v52 = vpop.eup %3419 }
 0x97d   :  { %3222 = vmatprep.mubr.msk.f32.mxu0 %vm2329_vm10, %v2427_v63 }
 0x9f6   :  { %v3192_v57 = vpop.f32.mrb[32].mxu0 }
 0x9f7   :  { %v1982_v58 = vadd.f32 %v3192_v57, %v5035_v24  ;;  %v1965_v55 = vpop.f32.mrb[33].mxu0 }
 0x9f8   :  { %v1980_v60 = vadd.f32 %v1965_v55, %v5039_v15  ;;  %v3193_v37 = vpop.f32.mrb[34].mxu0  ;;  %v3270_v15 = vpack.c.bf16 %v2157_v41, %v2156_v38  ;;  %v2428_v38 = vld [vmem:[#allocation29 + $0x8] sm:$0xff]  ;;  %v2429_v41 = vld [vmem:[#allocation29 + $0x10] sm:$0xff] }
 0x9f9   :  { %v1986_v2 = vmul.f32 0.25, %v1982_v58  ;;  %v1983_v31 = vadd.f32 %v3193_v37, %v5041_v19  ;;  %v1968_v32 = vpop.f32.mrb[35].mxu0 }
 0x9fa   :  { %v1984_v23 = vmul.f32 0.25, %v1980_v60  ;;  %v1981_v4 = vadd.f32 %v1968_v32, %v5043_v1 }
 0x9fb   :  { %1990 = vst.msk [vmem:[#allocation2 + $0x10] sm:$0xff] %vm1046_vm3, %v1986_v2  ;;  %v1987_v12 = vmul.f32 0.25, %v1983_v31 }
 0x9fc   :  { %1988 = vst.msk [vmem:[#allocation2] sm:$0xff] %vm1046_vm3, %v1984_v23  ;;  %v1985_v3 = vmul.f32 0.25, %v1981_v4  ;;  %v2423_v4 = vpop.permute.xlu1 %2422 }
 0x9fd   :  { %1991 = vst.msk [vmem:[#allocation2 + $0x18] sm:$0xff] %vm1046_vm3, %v1987_v12 }
 0x9fe   :  { %1989 = vst.msk [vmem:[#allocation2 + $0x8] sm:$0xff] %vm1046_vm3, %v1985_v3 }
 0xa05   :  { %v2004_v6 = vld [vmem:[%s2003_s16] sm:$0x1]  ;;  %v2937_v17 = vld [vmem:[%s2862_s19 + $0x10] sm:$0x1] }
 0xa06   :  { %v2013_v0 = vld [vmem:[%s2012_s15] sm:$0x1]  ;;  %v2029_v24 = vrot.slane %v2004_v6, 7  ;;  %v2940_v19 = vld [vmem:[%s2866_s10 + $0x10] sm:$0x1]  ;;  %v2044_v21 = vrot.slane %v2937_v17, 7 }
 0xa07   :  { %v2022_v29 = vld [vmem:[%s2021_s28] sm:$0x1]  ;;  %v2032_v9 = vrot.slane %v2013_v0, 6  ;;  %v2943_v1 = vld [vmem:[%s2870_s13 + $0x10] sm:$0x1]  ;;  %v2047_v59 = vrot.slane %v2940_v19, 6 }
 0xa08   :  { %v1995_v14 = vld [vmem:[%s1994_s8] sm:$0x1]  ;;  %v2035_v22 = vrot.slane %v2022_v29, 5  ;;  %v2934_v13 = vld [vmem:[%s2858_s23 + $0x10] sm:$0x1]  ;;  %v2050_v30 = vrot.slane %v2943_v1, 5  ;;  %v2443_v29 = vpop.permute.xlu1 %2442 }
 0xa09   :  { %v2038_v54 = vsel %vm2037_vm6, %v1995_v14, %v2029_v24  ;;  %v2052_v26 = vsel %vm2037_vm6, %v2934_v13, %v2044_v21  ;;  %v2430_v6 = vld [vmem:[#allocation29 + $0x18] sm:$0xff]  ;;  %v2559_v0 = vld [vmem:[#allocation32] sm:$0xff] }
 0xa0a   :  { %v2040_v7 = vsel %vm2039_vm7, %v2038_v54, %v2032_v9  ;;  %v2053_v28 = vsel %vm2039_vm7, %v2052_v26, %v2047_v59  ;;  %v2560_v26 = vld [vmem:[#allocation32 + $0x8] sm:$0xff] }
 0xa0b   :  { %v2042_v25 = vsel %vm2041_vm8, %v2040_v7, %v2035_v22  ;;  %v2054_v8 = vsel %vm2041_vm8, %v2053_v28, %v2050_v30 }
 0xa0c   :  { %3199 = vmatmul.mubr.msk.f32.vlgmr.msra.gmra.mrb[26].mxu1 %vm1046_vm3, %v2042_v25  ;;  %v2448_v19 = vpop.permute.xlu1 %2447 }
 0xa0d   :  { %3271 = vmatpush3.bf16.msra.mxu1 %v3270_v15  ;;  %3205 = vmatprep.mubr.msk.f32.mxu1 %vm4058_vm4, %v4059_v43 }
 0xa0e   :  { %3215 = vmatprep.subr.mxu1 %v4059_v43 }
 0xa10   :  { %3206 = vmatmul.mubr.msk.f32.vlgmr.msra.gmra.mrb[32].mxu1 %vm1046_vm3, %v2054_v8 }
 0xa11   :  { %3217 = vmatprep.mubr.msk.f32.mxu1 %vm4058_vm4, %v4059_v43 }
 0xa4f   :  { %v2319_v34 = vpop.f32.mrb[26].mxu0 }
 0xa50   :  { %v2320_v35 = vadd.f32 %v2949_v45, %v2319_v34  ;;  %v3214_v42 = vpop.f32.mrb[27].mxu0  ;;  %v2566_v45 = vpop.permute.xlu1 %2565 }
 0xa52   :  { %3216 = vmatpush3.msra.mxu1 %v2320_v35 }
 0xa53   :  { %3218 = vmatmul.mubr.msk.f32.vlgmr.msra.gmra.mrb[34].mxu1 %vm2329_vm10, %v5071_v56 }
 0xa54   :  { %3236 = vmatprep.mubr.msk.f32.mxu1 %vm598_vm2, %v2559_v0 }
 0xadf   :  { %v2151_v33 = vpop.f32.mrb[26].mxu1 }
 0xae0   :  { %v3200_v44 = vpop.f32.mrb[27].mxu1  ;;  %v2152_v11 = vadd.f32 %v2945_v53, %v2151_v33  ;;  %v2661_v33 = vpop.permute.xlu1 %2660 }
 0xae3   :  { %v2235_v46 = vpop.f32.mrb[32].mxu1 }
 0xae4   :  { %v3207_v16 = vpop.f32.mrb[33].mxu1  ;;  %v2236_v10 = vadd.f32 %v2947_v49, %v2235_v46 }
 0xb26   :  { %v2399_v48 = vpop.f32.mrb[34].mxu1 }
 0xb27   :  { %v2404_v5 = vmul.f32 %v3420_v52, %v2399_v48  ;;  %v3219_v50 = vpop.f32.mrb[35].mxu1 }
 0xb29   :  { %v2405_v51 = vmul.f32 %v2404_v5, %v2152_v11  ;;  %v2412_v40 = vmul.f32 %v2404_v5, %v2236_v10 }
 0xb2b   :  { %v2952_v57 = vmul.f32 -1.442695, %v2405_v51  ;;  %v2953_v58 = vmul.f32 -1.442695, %v2412_v40 }
 0xb2d   :  { %3421 = vpow2.f32 %v2952_v57 }
 0xb2e   :  { %3423 = vpow2.f32 %v2953_v58 }
 0xb37   :  { %v3422_v55 = vpop.eup %3421 }
 0xb38   :  { %v3424_v60 = vpop.eup %3423  ;;  %v2409_v37 = vadd.f32 1.0, %v3422_v55 }
 0xb39   :  { %v2416_v2 = vadd.f32 1.0, %v3424_v60 }
 0xb3a   :  { %3425 = vrcp.f32 %v2409_v37 }
 0xb3b   :  { %3427 = vrcp.f32 %v2416_v2 }
 0xb44   :  { %v3426_v31 = vpop.eup %3425 }
 0xb45   :  { %v3428_v32 = vpop.eup %3427 }
 0xb46   :  { %v2419_v23 = vsub.f32 %v3426_v31, %v3428_v32 }
 0xb48   :  { %v2425_v12 = vmul.f32 %v2423_v4, %v2419_v23 }
 0xb4a   :  { %v2426_v3 = vmul.f32 %v2425_v12, %v5071_v56  ;;  %v2438_v56 = vpop.permute.xlu0 %2437 }
 0xb4c   :  { %3220 = vmatprep.subr.msk.mxu0 %vm2329_vm10, %v2426_v3 }
 0xb4d   :  { %3221 = vmatpush3.xpose.msk.msra.mxu0 %vm2329_vm10, %v2426_v3 }
 0xb4e   :  { %3283 = vmatprep.subr.bf16.mxu0 %v4056_v27  ;;  %v2453_v27 = vpop.permute.xlu0 %2452 }
 0xb50   :  { %3223 = vmatmul.mubr.msk.f32.vlgmr.msra.gmra.mrb[36].mxu0 %vm2329_vm10, %v2428_v38 }
 0xb51   :  { %3225 = vmatprep.mubr.msk.f32.mxu0 %vm2329_vm10, %v2429_v41 }
 0xb52   :  { %v2571_v28 = vpop.permute.xlu0 %2570 }
 0xb54   :  { %3226 = vmatmul.mubr.msk.f32.gmra.mrb[38].mxu0 %vm2329_vm10, %v2430_v6 }
 0xb55   :  { %3243 = vmatprep.mubr.msk.f32.mxu0 %vm4058_vm4, %v4059_v43 }
 0xb56   :  { %v2742_v20 = vpop.permute.xlu0 %2741 }
 0xb57   :  { %v2747_v47 = vrot.slane %v2742_v20, %v4933_v18 }
 0xc23   :  { %v3224_v24 = vpop.f32.mrb[36].mxu0 }
 0xc24   :  { %v2542_v9 = vadd.f32 %v3224_v24, %v2443_v29  ;;  %v2536_v14 = vpop.f32.mrb[37].mxu0 }
 0xc25   :  { %v2537_v15 = vadd.f32 %v2536_v14, %v2438_v56 }
 0xc26   :  { %3429 = vtanh.f32 %v2542_v9 }
 0xc27   :  { %3431 = vtanh.f32 %v2537_v15  ;;  %v3227_v17 = vpop.f32.mrb[38].mxu0 }
 0xc28   :  { %v2552_v22 = vadd.f32 %v3227_v17, %v2453_v27  ;;  %v2546_v54 = vpop.f32.mrb[39].mxu0 }
 0xc29   :  { %v2547_v1 = vadd.f32 %v2546_v54, %v2448_v19 }
 0xc2a   :  { %3433 = vtanh.f32 %v2552_v22 }
 0xc2b   :  { %3435 = vtanh.f32 %v2547_v1 }
 0xc30   :  { %v3430_v21 = vpop.eup %3429 }
 0xc31   :  { %v3432_v59 = vpop.eup %3431 }
 0xc32   :  { %v3275_v7 = vpack.c.bf16 %v3430_v21, %v3432_v59 }
 0xc34   :  { %v3434_v13 = vpop.eup %3433  ;;  %3276 = vmatprep.subr.bf16.mxu1 %v3275_v7 }
 0xc35   :  { %v3436_v25 = vpop.eup %3435  ;;  %3278 = vmatpush3.bf16.msra.mxu1 %v3275_v7 }
 0xc36   :  { %v3279_v30 = vpack.c.bf16 %v3434_v13, %v3436_v25 }
 0xc38   :  { %3280 = vmatprep.subr.bf16.mxu1 %v3279_v30 }
 0xc39   :  { %3282 = vmatpush3.bf16.msra.mxu1 %v3279_v30 }
 0xc3a   :  { %3246 = vmatprep.subr.mxu1 %v4059_v43 }
 0xc3c   :  { %3237 = vmatmul.mubr.msk.f32.vlgmr.msra.gmra.mrb[36].mxu1 %vm598_vm2, %v2560_v26 }
 0xc3d   :  { %3248 = vmatprep.mubr.msk.f32.mxu1 %vm4058_vm4, %v4059_v43  ;;  %v2737_v43 = vld [vmem:[#allocation38] sm:$0x1] }
 0xd0f   :  { %v3238_v8 = vpop.f32.mrb[36].mxu1 }
 0xd10   :  { %v2651_v34 = vadd.f32 %v3238_v8, %v2571_v28  ;;  %v2645_v35 = vpop.f32.mrb[37].mxu1 }
 0xd11   :  { %v2646_v42 = vadd.f32 %v2645_v35, %v2566_v45 }
 0xd12   :  { %3437 = vtanh.f32 %v2651_v34 }
 0xd13   :  { %3439 = vtanh.f32 %v2646_v42 }
 0xd1c   :  { %v3438_v63 = vpop.eup %3437 }
 0xd1d   :  { %v3440_v61 = vpop.eup %3439 }
 0xd1e   :  { %v3284_v62 = vpack.c.bf16 %v3438_v63, %v3440_v61 }
 0xd20   :  { %3285 = vmatpush3.bf16.msra.mxu0 %v3284_v62 }
 0xd23   :  { %3244 = vmatmul.mubr.msk.f32.vlgmr.msra.gmra.mrb[40].mxu0 %vm1046_vm3, %v2656_v36 }
 0xdf6   :  { %v2732_v39 = vpop.f32.mrb[40].mxu0 }
 0xdf7   :  { %v2733_v44 = vadd.f32 %v2732_v39, %v2661_v33  ;;  %v3245_v46 = vpop.f32.mrb[41].mxu0 }
 0xdf9   :  { %3441 = vtanh.f32 %v2733_v44 }
 0xe03   :  { %v3442_v16 = vpop.eup %3441 }
 0xe04   :  { %3247 = vmatpush3.msra.mxu1 %v3442_v16 }
 0xe05   :  { %3249 = vmatmul.mubr.msk.f32.vlgmr.msra.gmra.mrb[38].mxu1 %vm2329_vm10, %v2737_v43 }
 0xed8   :  { %v2817_v52 = vpop.f32.mrb[38].mxu1 }
 0xed9   :  { %v2818_v53 = vadd.f32 %v2817_v52, %v2747_v47  ;;  %v3250_v49 = vpop.f32.mrb[39].mxu1 }
 0xedb   :  { %v2963_v48 = vmul.f32 -1.442695, %v2818_v53 }
 0xedd   :  { %3443 = vpow2.f32 %v2963_v48 }
 0xee7   :  { %v3444_v11 = vpop.eup %3443 }
 0xee8   :  { %v2824_v10 = vadd.f32 1.0, %v3444_v11 }
 0xeea   :  { %3445 = vrcp.f32 %v2824_v10 }
 0xef4   :  { %v3446_v5 = vpop.eup %3445 }
 0xef5   :  { %2828 = vst.msk [vmem:[#allocation44] sm:$0x1] %vm2827_vm11, %v3446_v5 }
 0xef6   :  { %3984 = shalt.err (!%p3981_p12)
}
 0xef7   :  { %s5202_s25 = sld [smem:[#allocation72_spill]] }
 0xefd   :  { %s3985_s14 = scalar_lea.hbm %s5202_s25, 16 }
 0xefe   :  { %p3986_p13 = scmp.ne.s32.totalorder %s5202_s25, %s3985_s14  ;;  %p3989_p0 = scmp.lt.u32.totalorder %s3985_s14, %s5202_s25 }
 0xf00   :  { %p3991_p1 = pnand %p3989_p0, %p3986_p13 }
 0xf02   :  { %3994 = shalt.err (!%p3991_p1)
}
 0xf03   :  { %2838 = dma.vmem_to_hbm [thread:$0]  %s2836_s2, 16, %s5202_s25, [#allocation6]  }
 0xf04   :  { %4023 = dma.done.wait [#allocation6], 16  }
 0xf05   :  { %4024 = vsyncadd [#allocation6], 4294967280 }
 0xf06   :  { %2842 = vsyncpa [#allocation5], 1 }
 0xf07   :  { %2843 = vsyncpa [#allocation9], 1 }
 0xf08   :  { %2844 = vsyncpa [#allocation12], 1 }
 0xf09   :  { %2845 = vsyncpa [#allocation15], 1 }
 0xf0a   :  { %2846 = vsyncpa [#allocation18], 1 }
 0xf0b   :  { %2847 = vsyncpa [#allocation21], 1 }
 0xf0c   :  { %2848 = vsyncpa [#allocation24], 1 }
 0xf0d   :  { %2849 = vsyncpa [#allocation27], 1 }
 0xf0e   :  { %2850 = vsyncpa [#allocation30], 1 }
 0xf0f   :  { %2851 = vsyncpa [#allocation33], 1 }
 0xf10   :  { %2852 = vsyncpa [#allocation36], 1 }
 0xf11   :  { %2853 = vsyncpa [#allocation39], 1 }
 0xf12   :  { %2854 = vsyncpa [#allocation6], 1 }
 0xf13   :  { %2855 = vsyncpa [#allocation7], 1 }
 0xf14   :  { %2856 = vsyncpa [#allocation43], 1 }

</bundles_post_ra>
